<compile_context>
chip_gen: v6e
topology: v6e:2x2x1
jax: 0.10.0
libtpu: 0.0.40
codegen_flags: <defaults>
</compile_context>

<pallas_src>
import functools

import jax
import jax.numpy as jnp
from jax.experimental import pallas as pl
from jax.experimental.pallas import tpu as pltpu


# ----------------------------- fused Pallas kernel ---------------------------

def _bilstm_lockstep_kernel(*refs, T, B, H, num_layers):
    """Fused lockstep bidirectional multi-layer LSTM + fc head.

    Ref layout (inputs, then output, then scratch):
      x_ref:              (T*B, Din_pad)  time-major, batch/feature padded
      per layer:          w_in1 (.,8H), w_in2 (.,8H), b (1,8H), w_hh (8H,8H)
      s (1,8H) activation lane scale, fc_wf (8H,128), fc_wb (8H,128), fc_b (1,128)
      out_ref: (B, 128)   lane-dense, result in lane 0
      scratch: q1 (T*B,8H), q2 (T*B,8H), [seq (T*B,8H) if num_layers > 1]

    Wide state (B, 8H): gate groups [i_f i_b | f_f f_b | g_f g_b | o_f o_b];
    h/c meaningful on lanes [0,2H) = [h_fwd | h_bwd].  Zero rows [2H,8H) in
    every host-prepared weight kill the garbage lanes (bounded, no inf/nan).
    gx for fused step t = q1[t] + q2[T-1-t] (time-reversal handled by the
    staging offsets, no runtime shuffles).
    """
    W = 8 * H
    idx = 0
    x_ref = refs[idx]; idx += 1
    layer_refs = []
    for _ in range(num_layers):
        layer_refs.append(refs[idx:idx + 4]); idx += 4
    s_ref, fc_wf_ref, fc_wb_ref, fc_b_ref = refs[idx:idx + 4]; idx += 4
    out_ref = refs[idx]; idx += 1
    q1_ref, q2_ref = refs[idx:idx + 2]; idx += 2
    seq_ref = refs[idx] if num_layers > 1 else None

    # Hoisted loop invariants (JAX does not CSE broadcast_in_dim).
    s = jnp.broadcast_to(s_ref[...], (B, W))        # 2 on g lanes, 1 elsewhere
    one_minus_s = 1.0 - s

    h_first = None   # fused step 0     of last layer -> holds h_bwd(T-1)
    h_last = None    # fused step T-1   of last layer -> holds h_fwd(T-1)

    for l in range(num_layers):
        w_in1_ref, w_in2_ref, b_ref, w_hh_ref = layer_refs[l]
        last_layer = l == num_layers - 1

        # Input projection for the whole sequence: two matmuls per layer, off
        # the serial chain, staged into VMEM so the recurrence keeps O(1)
        # live vregs per step.  Bias folded into q1.
        src = x_ref[...] if l == 0 else seq_ref[...]
        q1_ref[...] = jnp.dot(src, w_in1_ref[...],
                              preferred_element_type=jnp.float32) + b_ref[...]
        q2_ref[...] = jnp.dot(src, w_in2_ref[...],
                              preferred_element_type=jnp.float32)

        w_hh = w_hh_ref[...]                         # (8H,8H), rows [2H:) are 0
        h = jnp.zeros((B, W), jnp.float32)
        c = jnp.zeros((B, W), jnp.float32)

        # Fully-unrolled lockstep recurrence (static, small T).
        for t in range(T):
            gates = (q1_ref[pl.ds(t * B, B), :]
                     + q2_ref[pl.ds((T - 1 - t) * B, B), :]
                     + jnp.dot(h, w_hh, preferred_element_type=jnp.float32))
            # Single transcendental: tanh(x) = 2*sigmoid(2x) - 1, applied via
            # the per-lane scale s (s=2 on g lanes -> tanh, s=1 -> sigmoid).
            act = jax.nn.sigmoid(gates * s) * s + one_minus_s
            f_al = pltpu.roll(act, 6 * H, axis=1)    # lanes [0,2H): f_{f,b}
            g_al = pltpu.roll(act, 4 * H, axis=1)    # lanes [0,2H): g_{f,b}
            o_al = pltpu.roll(act, 2 * H, axis=1)    # lanes [0,2H): o_{f,b}
            c = f_al * c + act * g_al                # lanes [0,2H): f*c + i*g
            h = o_al * jnp.tanh(c)                   # lanes [0,2H): o*tanh(c)
            if not last_layer:
                seq_ref[pl.ds(t * B, B), :] = h      # full-width aligned store
            if last_layer and t == 0:
                h_first = h
            if last_layer and t == T - 1:
                h_last = h

    # fc head on out[:, -1, :] = [h_fwd(T-1) || h_bwd(T-1)].
    # h_fwd(T-1) lives in lanes [0,H) of the step-(T-1) state, h_bwd(T-1) in
    # lanes [H,2H) of the step-0 state; zero-padded (8H,128) fc matrices pick
    # them out and produce a lane-dense (B,128) output (result in lane 0).
    out_ref[...] = (
        jnp.dot(h_last, fc_wf_ref[...], preferred_element_type=jnp.float32)
        + jnp.dot(h_first, fc_wb_ref[...], preferred_element_type=jnp.float32)
        + fc_b_ref[...])


# ------------------------------ wrapper --------------------------------------

def bidirectional_rnn_model(x, kp):
    """Forward pass matching BidirectionalRNNModel.forward (eval mode).

    x: (B, T, input_size) batch-first (PyTorch convention).  Returns (B, 1).
    """
    B, T, Din = x.shape
    H = kp["hidden_size"]
    num_layers = kp["num_layers"]
    Din_pad = kp["input_size_padded"]

    # Pad batch to a sublane multiple (8) and features to a lane multiple
    # (128) so every vreg / MXU operand row is full.
    B_pad = max(8, ((B + 7) // 8) * 8)
    x_tm = jnp.transpose(x, (1, 0, 2)).astype(jnp.float32)       # (T, B, Din)
    x_tm = jnp.pad(x_tm, ((0, 0), (0, B_pad - B), (0, Din_pad - Din)))
    x_flat = x_tm.reshape(T * B_pad, Din_pad)

    args = [x_flat]
    for layer_flat in kp["layers"]:
        args.extend(layer_flat)
    args += [kp["act_scale"], kp["fc_wf"], kp["fc_wb"], kp["fc_b"]]

    # VMEM scratch: staged input projections q1/q2 plus one inter-layer
    # sequence buffer (consumed before it is overwritten, so no ping-pong).
    scratch = [pltpu.VMEM((T * B_pad, 8 * H), jnp.float32),
               pltpu.VMEM((T * B_pad, 8 * H), jnp.float32)]
    if num_layers > 1:
        scratch.append(pltpu.VMEM((T * B_pad, 8 * H), jnp.float32))

    kernel = functools.partial(_bilstm_lockstep_kernel,
                               T=T, B=B_pad, H=H, num_layers=num_layers)

    out = pl.pallas_call(
        kernel,
        out_shape=jax.ShapeDtypeStruct((B_pad, 128), jnp.float32),
        in_specs=[pl.BlockSpec(memory_space=pltpu.MemorySpace.VMEM)] * len(args),
        out_specs=pl.BlockSpec(memory_space=pltpu.MemorySpace.VMEM),
        scratch_shapes=scratch,
        compiler_params=pltpu.CompilerParams(
            vmem_limit_bytes=32 * 1024 * 1024),
    )(*args)
    return out[:B, :1]


# -------------------- parameter construction / preparation -------------------

def make_params(key, input_size, hidden_size, num_layers):
    """Raw params in PyTorch layout: weight_ih (4H, in), weight_hh (4H, H),
    bias_ih / bias_hh (4H,), fc weight (1, 2H), fc bias (1,)."""
    H = hidden_size
    bound = 1.0 / jnp.sqrt(jnp.float32(H))
    layers = []
    for layer in range(num_layers):
        din = input_size if layer == 0 else 2 * H
        dirs = {}
        for dname in ("fwd", "bwd"):
            key, k1, k2, k3, k4 = jax.random.split(key, 5)
            dirs[dname] = {
                "w_ih": jax.random.uniform(k1, (4 * H, din), jnp.float32, -bound, bound),
                "w_hh": jax.random.uniform(k2, (4 * H, H), jnp.float32, -bound, bound),
                "b_ih": jax.random.uniform(k3, (4 * H,), jnp.float32, -bound, bound),
                "b_hh": jax.random.uniform(k4, (4 * H,), jnp.float32, -bound, bound),
            }
        layers.append(dirs)
    key, kw, kb = jax.random.split(key, 3)
    fcb = 1.0 / jnp.sqrt(jnp.float32(2 * H))
    return {
        "layers": layers,
        "fc_w": jax.random.uniform(kw, (1, 2 * H), jnp.float32, -fcb, fcb),
        "fc_b": jax.random.uniform(kb, (1,), jnp.float32, -fcb, fcb),
    }


def _widen_gate_cols(w, d, H):
    """Scatter (rows, 4H) gate-major columns [i|f|g|o] into a (rows, 8H)
    matrix whose 2H-wide gate groups are direction interleaved
    [i_f i_b | f_f f_b | g_f g_b | o_f o_b].  d=0 -> fwd slots, d=1 -> bwd."""
    rows = w.shape[0]
    out = jnp.zeros((rows, 8 * H), jnp.float32)
    for k in range(4):
        out = out.at[:, (2 * k + d) * H:(2 * k + d + 1) * H].set(
            w[:, k * H:(k + 1) * H])
    return out


def prepare_kernel_params(raw, hidden_size):
    """Host-side one-time prep: build the lockstep (direction-fused) weights.

    - w_hh_big (8H,8H): rows [0,H) route h_fwd to fwd gate columns, rows
      [H,2H) route h_bwd to bwd gate columns; other rows zero (kill garbage).
    - w_in1/w_in2 produce q1/q2 such that gx_fused[t] = q1[t] + q2[T-1-t]
      gives every gate its time-aligned input (no runtime shuffles).
    - fc weights padded to lane-dense (8H,128) matrices selecting
      h_fwd(T-1) (rows [0,H)) and h_bwd(T-1) (rows [H,2H)) into lane 0.
    """
    H = hidden_size
    Wd = 8 * H
    num_layers = len(raw["layers"])
    din0 = raw["layers"][0]["fwd"]["w_ih"].shape[1]
    din_pad = ((din0 + 127) // 128) * 128

    layers_flat = []
    for l, lp in enumerate(raw["layers"]):
        f, b = lp["fwd"], lp["bwd"]
        w_ih_f = jnp.asarray(f["w_ih"]).T                      # (din, 4H)
        w_ih_b = jnp.asarray(b["w_ih"]).T
        w_hh_f = jnp.asarray(f["w_hh"]).T                      # (H, 4H)
        w_hh_b = jnp.asarray(b["w_hh"]).T
        bias = (_widen_gate_cols((f["b_ih"] + f["b_hh"]).reshape(1, 4 * H), 0, H)
                + _widen_gate_cols((b["b_ih"] + b["b_hh"]).reshape(1, 4 * H), 1, H))

        w_hh_big = jnp.zeros((Wd, Wd), jnp.float32)
        w_hh_big = w_hh_big.at[:H].set(_widen_gate_cols(w_hh_f, 0, H))
        w_hh_big = w_hh_big.at[H:2 * H].set(_widen_gate_cols(w_hh_b, 1, H))

        if l == 0:
            # q1[t] = x_t -> fwd gates (+ all biases); q2[t] = x_t -> bwd gates.
            w_in1 = jnp.zeros((din_pad, Wd), jnp.float32).at[:din0].set(
                _widen_gate_cols(w_ih_f, 0, H))
            w_in2 = jnp.zeros((din_pad, Wd), jnp.float32).at[:din0].set(
                _widen_gate_cols(w_ih_b, 1, H))
        else:
            # Previous layer's seq row t holds [h_f(t) | h_b(T-1-t) | garbage].
            # M1: h_f -> fwd gates, h_b -> bwd gates; M2: h_f -> bwd, h_b -> fwd.
            # Then q1[t] + q2[T-1-t] feeds every gate its time-aligned input.
            w_in1 = jnp.zeros((Wd, Wd), jnp.float32)
            w_in1 = w_in1.at[:H].set(_widen_gate_cols(w_ih_f[:H], 0, H))
            w_in1 = w_in1.at[H:2 * H].set(_widen_gate_cols(w_ih_b[H:2 * H], 1, H))
            w_in2 = jnp.zeros((Wd, Wd), jnp.float32)
            w_in2 = w_in2.at[:H].set(_widen_gate_cols(w_ih_b[:H], 1, H))
            w_in2 = w_in2.at[H:2 * H].set(_widen_gate_cols(w_ih_f[H:2 * H], 0, H))
        layers_flat.append((w_in1, w_in2, bias, w_hh_big))

    # Activation lane scale: tanh(x) = 2*sigmoid(2x) - 1 on the g lanes.
    act_scale = jnp.ones((1, Wd), jnp.float32).at[:, 4 * H:6 * H].set(2.0)

    fc_w = jnp.asarray(raw["fc_w"])                            # (1, 2H)
    fc_wf = jnp.zeros((Wd, 128), jnp.float32).at[:H, 0].set(fc_w[0, :H])
    fc_wb = jnp.zeros((Wd, 128), jnp.float32).at[H:2 * H, 0].set(fc_w[0, H:2 * H])
    fc_b = jnp.full((1, 128), jnp.asarray(raw["fc_b"])[0], jnp.float32)
    return {
        "hidden_size": H,
        "num_layers": num_layers,
        "input_size_padded": din_pad,
        "layers": layers_flat,
        "act_scale": act_scale,
        "fc_wf": fc_wf,
        "fc_wb": fc_wb,
        "fc_b": fc_b,
    }


# ------------------------- pure-JAX reference (check) ------------------------

def _ref_lstm_dir(x_tm, w_ih, w_hh, b_ih, b_hh):
    H = w_hh.shape[1]
    B = x_tm.shape[1]

    def step(carry, xt):
        h, c = carry
        gates = xt @ w_ih.T + h @ w_hh.T + b_ih + b_hh
        i = jax.nn.sigmoid(gates[:, 0 * H:1 * H])
        f = jax.nn.sigmoid(gates[:, 1 * H:2 * H])
        g = jnp.tanh(gates[:, 2 * H:3 * H])
        o = jax.nn.sigmoid(gates[:, 3 * H:4 * H])
        c = f * c + i * g
        h = o * jnp.tanh(c)
        return (h, c), h

    init = (jnp.zeros((B, H), jnp.float32), jnp.zeros((B, H), jnp.float32))
    _, hs = jax.lax.scan(step, init, x_tm)
    return hs


def reference_model(x, raw):
    x_tm = jnp.transpose(x, (1, 0, 2)).astype(jnp.float32)
    layer_in = x_tm
    for lp in raw["layers"]:
        fwd = _ref_lstm_dir(layer_in, lp["fwd"]["w_ih"], lp["fwd"]["w_hh"],
                            lp["fwd"]["b_ih"], lp["fwd"]["b_hh"])
        bwd = _ref_lstm_dir(layer_in[::-1], lp["bwd"]["w_ih"], lp["bwd"]["w_hh"],
                            lp["bwd"]["b_ih"], lp["bwd"]["b_hh"])[::-1]
        layer_in = jnp.concatenate([fwd, bwd], axis=-1)
    return layer_in[-1] @ raw["fc_w"].T + raw["fc_b"]


# ----------------------------------- main ------------------------------------

if __name__ == "__main__":
    B, T = 2, 8
    INPUT_SIZE, HIDDEN_SIZE, NUM_LAYERS = 16, 32, 2

    key = jax.random.PRNGKey(0)
    key, kx = jax.random.split(key)
    x = jax.random.normal(kx, (B, T, INPUT_SIZE), jnp.float32)

    raw_params = make_params(key, INPUT_SIZE, HIDDEN_SIZE, NUM_LAYERS)
    kernel_params = prepare_kernel_params(raw_params, HIDDEN_SIZE)

    out = jax.block_until_ready(bidirectional_rnn_model(x, kernel_params))
    assert out.shape == (B, 1), out.shape

    ref = jax.block_until_ready(reference_model(x, raw_params))
    # Tolerance covers MXU default-precision matmul differences between the
    # Pallas kernel and the XLA reference, plus the tanh=2*sigmoid(2x)-1
    # rewrite (~ulp level); a real bug would miss by orders of magnitude more.
    assert jnp.allclose(out, ref, atol=2e-3, rtol=2e-3), (out, ref)

    print("KERNEL_OK")
</pallas_src>

<mosaic_0001>
module attributes {stable_mosaic.version = 11 : i64} {
  func.func @_bilstm_lockstep_kernel(%arg0: memref<64x128xf32, #tpu.memory_space<vmem>>, %arg1: memref<128x256xf32, #tpu.memory_space<vmem>>, %arg2: memref<128x256xf32, #tpu.memory_space<vmem>>, %arg3: memref<1x256xf32, #tpu.memory_space<vmem>>, %arg4: memref<256x256xf32, #tpu.memory_space<vmem>>, %arg5: memref<256x256xf32, #tpu.memory_space<vmem>>, %arg6: memref<256x256xf32, #tpu.memory_space<vmem>>, %arg7: memref<1x256xf32, #tpu.memory_space<vmem>>, %arg8: memref<256x256xf32, #tpu.memory_space<vmem>>, %arg9: memref<1x256xf32, #tpu.memory_space<vmem>>, %arg10: memref<256x128xf32, #tpu.memory_space<vmem>>, %arg11: memref<256x128xf32, #tpu.memory_space<vmem>>, %arg12: memref<1x128xf32, #tpu.memory_space<vmem>>, %arg13: memref<8x128xf32, #tpu.memory_space<vmem>>, %arg14: memref<64x256xf32, #tpu.memory_space<vmem>>, %arg15: memref<64x256xf32, #tpu.memory_space<vmem>>, %arg16: memref<64x256xf32, #tpu.memory_space<vmem>>) attributes {dimension_semantics = [], scalar_prefetch = 0 : i64, scratch_operands = 3 : i64, tpu.core_type = #tpu.core_type<tc>} {
    %c0 = arith.constant 0 : index
    %c0_0 = arith.constant 0 : index
    %0 = vector.load %arg9[%c0, %c0_0] : memref<1x256xf32, #tpu.memory_space<vmem>>, vector<1x256xf32>
    %1 = vector.shape_cast %0 : vector<1x256xf32> to vector<1x256xf32>
    %2 = vector.broadcast %1 : vector<1x256xf32> to vector<8x256xf32>
    %cst = arith.constant 1.000000e+00 : f32
    %3 = vector.broadcast %cst : f32 to vector<8x256xf32>
    %4 = arith.subf %3, %2 : vector<8x256xf32>
    %c0_1 = arith.constant 0 : index
    %c0_2 = arith.constant 0 : index
    %5 = vector.load %arg0[%c0_1, %c0_2] : memref<64x128xf32, #tpu.memory_space<vmem>>, vector<64x128xf32>
    %c0_3 = arith.constant 0 : index
    %c0_4 = arith.constant 0 : index
    %6 = vector.load %arg1[%c0_3, %c0_4] : memref<128x256xf32, #tpu.memory_space<vmem>>, vector<128x256xf32>
    %cst_5 = arith.constant dense<0.000000e+00> : vector<64x256xf32>
    %7 = tpu.matmul %5, %6, %cst_5 {dimension_numbers = #tpu.dot_dimension_numbers<[1], [0], [0], [1], [0, 0, 1, 1], [], []>} : vector<64x128xf32>, vector<128x256xf32>, vector<64x256xf32> -> vector<64x256xf32>
    %c0_6 = arith.constant 0 : index
    %c0_7 = arith.constant 0 : index
    %8 = vector.load %arg3[%c0_6, %c0_7] : memref<1x256xf32, #tpu.memory_space<vmem>>, vector<1x256xf32>
    %9 = vector.broadcast %8 : vector<1x256xf32> to vector<64x256xf32>
    %10 = arith.addf %7, %9 : vector<64x256xf32>
    %c0_8 = arith.constant 0 : index
    %c0_9 = arith.constant 0 : index
    %11 = vector.load %arg14[%c0_8, %c0_9] : memref<64x256xf32, #tpu.memory_space<vmem>>, vector<64x256xf32>
    tpu.vector_store %arg14[%c0_8, %c0_9], %10 {strides = array<i32>} : memref<64x256xf32, #tpu.memory_space<vmem>>, vector<64x256xf32>,
    %c0_10 = arith.constant 0 : index
    %c0_11 = arith.constant 0 : index
    %12 = vector.load %arg2[%c0_10, %c0_11] : memref<128x256xf32, #tpu.memory_space<vmem>>, vector<128x256xf32>
    %cst_12 = arith.constant dense<0.000000e+00> : vector<64x256xf32>
    %13 = tpu.matmul %5, %12, %cst_12 {dimension_numbers = #tpu.dot_dimension_numbers<[1], [0], [0], [1], [0, 0, 1, 1], [], []>} : vector<64x128xf32>, vector<128x256xf32>, vector<64x256xf32> -> vector<64x256xf32>
    %c0_13 = arith.constant 0 : index
    %c0_14 = arith.constant 0 : index
    %14 = vector.load %arg15[%c0_13, %c0_14] : memref<64x256xf32, #tpu.memory_space<vmem>>, vector<64x256xf32>
    tpu.vector_store %arg15[%c0_13, %c0_14], %13 {strides = array<i32>} : memref<64x256xf32, #tpu.memory_space<vmem>>, vector<64x256xf32>,
    %c0_15 = arith.constant 0 : index
    %c0_16 = arith.constant 0 : index
    %15 = vector.load %arg4[%c0_15, %c0_16] : memref<256x256xf32, #tpu.memory_space<vmem>>, vector<256x256xf32>
    %cst_17 = arith.constant 0.000000e+00 : f32
    %16 = vector.broadcast %cst_17 : f32 to vector<8x256xf32>
    %cst_18 = arith.constant 0.000000e+00 : f32
    %17 = vector.broadcast %cst_18 : f32 to vector<8x256xf32>
    %c0_19 = arith.constant 0 : index
    %c0_20 = arith.constant 0 : index
    %18 = vector.load %arg14[%c0_19, %c0_20] : memref<64x256xf32, #tpu.memory_space<vmem>>, vector<8x256xf32>
    %c56 = arith.constant 56 : index
    %c0_21 = arith.constant 0 : index
    %19 = vector.load %arg15[%c56, %c0_21] : memref<64x256xf32, #tpu.memory_space<vmem>>, vector<8x256xf32>
    %20 = arith.addf %18, %19 : vector<8x256xf32>
    %cst_22 = arith.constant dense<0.000000e+00> : vector<8x256xf32>
    %21 = tpu.matmul %16, %15, %cst_22 {dimension_numbers = #tpu.dot_dimension_numbers<[1], [0], [0], [1], [0, 0, 1, 1], [], []>} : vector<8x256xf32>, vector<256x256xf32>, vector<8x256xf32> -> vector<8x256xf32>
    %22 = arith.addf %20, %21 : vector<8x256xf32>
    %23 = arith.mulf %22, %2 : vector<8x256xf32>
    %24 = arith.negf %23 : vector<8x256xf32>
    %25 = math.exp %24 : vector<8x256xf32>
    %cst_23 = arith.constant 1.000000e+00 : f32
    %26 = vector.broadcast %cst_23 : f32 to vector<8x256xf32>
    %27 = arith.addf %26, %25 : vector<8x256xf32>
    %28 = arith.divf %26, %27 : vector<8x256xf32>
    %29 = arith.mulf %28, %2 : vector<8x256xf32>
    %30 = arith.addf %29, %4 : vector<8x256xf32>
    %c192_i32 = arith.constant 192 : i32
    %31 = tpu.dynamic_rotate %30 by %c192_i32 dim 1 : vector<8x256xf32>, i32 -> vector<8x256xf32>
    %c128_i32 = arith.constant 128 : i32
    %32 = tpu.dynamic_rotate %30 by %c128_i32 dim 1 : vector<8x256xf32>, i32 -> vector<8x256xf32>
    %c64_i32 = arith.constant 64 : i32
    %33 = tpu.dynamic_rotate %30 by %c64_i32 dim 1 : vector<8x256xf32>, i32 -> vector<8x256xf32>
    %34 = arith.mulf %31, %17 : vector<8x256xf32>
    %35 = arith.mulf %30, %32 : vector<8x256xf32>
    %36 = arith.addf %34, %35 : vector<8x256xf32>
    %37 = math.tanh %36 : vector<8x256xf32>
    %38 = arith.mulf %33, %37 : vector<8x256xf32>
    %c0_24 = arith.constant 0 : index
    %c0_25 = arith.constant 0 : index
    %39 = vector.load %arg16[%c0_24, %c0_25] : memref<64x256xf32, #tpu.memory_space<vmem>>, vector<8x256xf32>
    tpu.vector_store %arg16[%c0_24, %c0_25], %38 {strides = array<i32>} : memref<64x256xf32, #tpu.memory_space<vmem>>, vector<8x256xf32>,
    %c8 = arith.constant 8 : index
    %c0_26 = arith.constant 0 : index
    %40 = vector.load %arg14[%c8, %c0_26] : memref<64x256xf32, #tpu.memory_space<vmem>>, vector<8x256xf32>
    %c48 = arith.constant 48 : index
    %c0_27 = arith.constant 0 : index
    %41 = vector.load %arg15[%c48, %c0_27] : memref<64x256xf32, #tpu.memory_space<vmem>>, vector<8x256xf32>
    %42 = arith.addf %40, %41 : vector<8x256xf32>
    %cst_28 = arith.constant dense<0.000000e+00> : vector<8x256xf32>
    %43 = tpu.matmul %38, %15, %cst_28 {dimension_numbers = #tpu.dot_dimension_numbers<[1], [0], [0], [1], [0, 0, 1, 1], [], []>} : vector<8x256xf32>, vector<256x256xf32>, vector<8x256xf32> -> vector<8x256xf32>
    %44 = arith.addf %42, %43 : vector<8x256xf32>
    %45 = arith.mulf %44, %2 : vector<8x256xf32>
    %46 = arith.negf %45 : vector<8x256xf32>
    %47 = math.exp %46 : vector<8x256xf32>
    %cst_29 = arith.constant 1.000000e+00 : f32
    %48 = vector.broadcast %cst_29 : f32 to vector<8x256xf32>
    %49 = arith.addf %48, %47 : vector<8x256xf32>
    %50 = arith.divf %48, %49 : vector<8x256xf32>
    %51 = arith.mulf %50, %2 : vector<8x256xf32>
    %52 = arith.addf %51, %4 : vector<8x256xf32>
    %c192_i32_30 = arith.constant 192 : i32
    %53 = tpu.dynamic_rotate %52 by %c192_i32_30 dim 1 : vector<8x256xf32>, i32 -> vector<8x256xf32>
    %c128_i32_31 = arith.constant 128 : i32
    %54 = tpu.dynamic_rotate %52 by %c128_i32_31 dim 1 : vector<8x256xf32>, i32 -> vector<8x256xf32>
    %c64_i32_32 = arith.constant 64 : i32
    %55 = tpu.dynamic_rotate %52 by %c64_i32_32 dim 1 : vector<8x256xf32>, i32 -> vector<8x256xf32>
    %56 = arith.mulf %53, %36 : vector<8x256xf32>
    %57 = arith.mulf %52, %54 : vector<8x256xf32>
    %58 = arith.addf %56, %57 : vector<8x256xf32>
    %59 = math.tanh %58 : vector<8x256xf32>
    %60 = arith.mulf %55, %59 : vector<8x256xf32>
    %c8_33 = arith.constant 8 : index
    %c0_34 = arith.constant 0 : index
    %61 = vector.load %arg16[%c8_33, %c0_34] : memref<64x256xf32, #tpu.memory_space<vmem>>, vector<8x256xf32>
    tpu.vector_store %arg16[%c8_33, %c0_34], %60 {strides = array<i32>} : memref<64x256xf32, #tpu.memory_space<vmem>>, vector<8x256xf32>,
    %c16 = arith.constant 16 : index
    %c0_35 = arith.constant 0 : index
    %62 = vector.load %arg14[%c16, %c0_35] : memref<64x256xf32, #tpu.memory_space<vmem>>, vector<8x256xf32>
    %c40 = arith.constant 40 : index
    %c0_36 = arith.constant 0 : index
    %63 = vector.load %arg15[%c40, %c0_36] : memref<64x256xf32, #tpu.memory_space<vmem>>, vector<8x256xf32>
    %64 = arith.addf %62, %63 : vector<8x256xf32>
    %cst_37 = arith.constant dense<0.000000e+00> : vector<8x256xf32>
    %65 = tpu.matmul %60, %15, %cst_37 {dimension_numbers = #tpu.dot_dimension_numbers<[1], [0], [0], [1], [0, 0, 1, 1], [], []>} : vector<8x256xf32>, vector<256x256xf32>, vector<8x256xf32> -> vector<8x256xf32>
    %66 = arith.addf %64, %65 : vector<8x256xf32>
    %67 = arith.mulf %66, %2 : vector<8x256xf32>
    %68 = arith.negf %67 : vector<8x256xf32>
    %69 = math.exp %68 : vector<8x256xf32>
    %cst_38 = arith.constant 1.000000e+00 : f32
    %70 = vector.broadcast %cst_38 : f32 to vector<8x256xf32>
    %71 = arith.addf %70, %69 : vector<8x256xf32>
    %72 = arith.divf %70, %71 : vector<8x256xf32>
    %73 = arith.mulf %72, %2 : vector<8x256xf32>
    %74 = arith.addf %73, %4 : vector<8x256xf32>
    %c192_i32_39 = arith.constant 192 : i32
    %75 = tpu.dynamic_rotate %74 by %c192_i32_39 dim 1 : vector<8x256xf32>, i32 -> vector<8x256xf32>
    %c128_i32_40 = arith.constant 128 : i32
    %76 = tpu.dynamic_rotate %74 by %c128_i32_40 dim 1 : vector<8x256xf32>, i32 -> vector<8x256xf32>
    %c64_i32_41 = arith.constant 64 : i32
    %77 = tpu.dynamic_rotate %74 by %c64_i32_41 dim 1 : vector<8x256xf32>, i32 -> vector<8x256xf32>
    %78 = arith.mulf %75, %58 : vector<8x256xf32>
    %79 = arith.mulf %74, %76 : vector<8x256xf32>
    %80 = arith.addf %78, %79 : vector<8x256xf32>
    %81 = math.tanh %80 : vector<8x256xf32>
    %82 = arith.mulf %77, %81 : vector<8x256xf32>
    %c16_42 = arith.constant 16 : index
    %c0_43 = arith.constant 0 : index
    %83 = vector.load %arg16[%c16_42, %c0_43] : memref<64x256xf32, #tpu.memory_space<vmem>>, vector<8x256xf32>
    tpu.vector_store %arg16[%c16_42, %c0_43], %82 {strides = array<i32>} : memref<64x256xf32, #tpu.memory_space<vmem>>, vector<8x256xf32>,
    %c24 = arith.constant 24 : index
    %c0_44 = arith.constant 0 : index
    %84 = vector.load %arg14[%c24, %c0_44] : memref<64x256xf32, #tpu.memory_space<vmem>>, vector<8x256xf32>
    %c32 = arith.constant 32 : index
    %c0_45 = arith.constant 0 : index
    %85 = vector.load %arg15[%c32, %c0_45] : memref<64x256xf32, #tpu.memory_space<vmem>>, vector<8x256xf32>
    %86 = arith.addf %84, %85 : vector<8x256xf32>
    %cst_46 = arith.constant dense<0.000000e+00> : vector<8x256xf32>
    %87 = tpu.matmul %82, %15, %cst_46 {dimension_numbers = #tpu.dot_dimension_numbers<[1], [0], [0], [1], [0, 0, 1, 1], [], []>} : vector<8x256xf32>, vector<256x256xf32>, vector<8x256xf32> -> vector<8x256xf32>
    %88 = arith.addf %86, %87 : vector<8x256xf32>
    %89 = arith.mulf %88, %2 : vector<8x256xf32>
    %90 = arith.negf %89 : vector<8x256xf32>
    %91 = math.exp %90 : vector<8x256xf32>
    %cst_47 = arith.constant 1.000000e+00 : f32
    %92 = vector.broadcast %cst_47 : f32 to vector<8x256xf32>
    %93 = arith.addf %92, %91 : vector<8x256xf32>
    %94 = arith.divf %92, %93 : vector<8x256xf32>
    %95 = arith.mulf %94, %2 : vector<8x256xf32>
    %96 = arith.addf %95, %4 : vector<8x256xf32>
    %c192_i32_48 = arith.constant 192 : i32
    %97 = tpu.dynamic_rotate %96 by %c192_i32_48 dim 1 : vector<8x256xf32>, i32 -> vector<8x256xf32>
    %c128_i32_49 = arith.constant 128 : i32
    %98 = tpu.dynamic_rotate %96 by %c128_i32_49 dim 1 : vector<8x256xf32>, i32 -> vector<8x256xf32>
    %c64_i32_50 = arith.constant 64 : i32
    %99 = tpu.dynamic_rotate %96 by %c64_i32_50 dim 1 : vector<8x256xf32>, i32 -> vector<8x256xf32>
    %100 = arith.mulf %97, %80 : vector<8x256xf32>
    %101 = arith.mulf %96, %98 : vector<8x256xf32>
    %102 = arith.addf %100, %101 : vector<8x256xf32>
    %103 = math.tanh %102 : vector<8x256xf32>
    %104 = arith.mulf %99, %103 : vector<8x256xf32>
    %c24_51 = arith.constant 24 : index
    %c0_52 = arith.constant 0 : index
    %105 = vector.load %arg16[%c24_51, %c0_52] : memref<64x256xf32, #tpu.memory_space<vmem>>, vector<8x256xf32>
    tpu.vector_store %arg16[%c24_51, %c0_52], %104 {strides = array<i32>} : memref<64x256xf32, #tpu.memory_space<vmem>>, vector<8x256xf32>,
    %c32_53 = arith.constant 32 : index
    %c0_54 = arith.constant 0 : index
    %106 = vector.load %arg14[%c32_53, %c0_54] : memref<64x256xf32, #tpu.memory_space<vmem>>, vector<8x256xf32>
    %c24_55 = arith.constant 24 : index
    %c0_56 = arith.constant 0 : index
    %107 = vector.load %arg15[%c24_55, %c0_56] : memref<64x256xf32, #tpu.memory_space<vmem>>, vector<8x256xf32>
    %108 = arith.addf %106, %107 : vector<8x256xf32>
    %cst_57 = arith.constant dense<0.000000e+00> : vector<8x256xf32>
    %109 = tpu.matmul %104, %15, %cst_57 {dimension_numbers = #tpu.dot_dimension_numbers<[1], [0], [0], [1], [0, 0, 1, 1], [], []>} : vector<8x256xf32>, vector<256x256xf32>, vector<8x256xf32> -> vector<8x256xf32>
    %110 = arith.addf %108, %109 : vector<8x256xf32>
    %111 = arith.mulf %110, %2 : vector<8x256xf32>
    %112 = arith.negf %111 : vector<8x256xf32>
    %113 = math.exp %112 : vector<8x256xf32>
    %cst_58 = arith.constant 1.000000e+00 : f32
    %114 = vector.broadcast %cst_58 : f32 to vector<8x256xf32>
    %115 = arith.addf %114, %113 : vector<8x256xf32>
    %116 = arith.divf %114, %115 : vector<8x256xf32>
    %117 = arith.mulf %116, %2 : vector<8x256xf32>
    %118 = arith.addf %117, %4 : vector<8x256xf32>
    %c192_i32_59 = arith.constant 192 : i32
    %119 = tpu.dynamic_rotate %118 by %c192_i32_59 dim 1 : vector<8x256xf32>, i32 -> vector<8x256xf32>
    %c128_i32_60 = arith.constant 128 : i32
    %120 = tpu.dynamic_rotate %118 by %c128_i32_60 dim 1 : vector<8x256xf32>, i32 -> vector<8x256xf32>
    %c64_i32_61 = arith.constant 64 : i32
    %121 = tpu.dynamic_rotate %118 by %c64_i32_61 dim 1 : vector<8x256xf32>, i32 -> vector<8x256xf32>
    %122 = arith.mulf %119, %102 : vector<8x256xf32>
    %123 = arith.mulf %118, %120 : vector<8x256xf32>
    %124 = arith.addf %122, %123 : vector<8x256xf32>
    %125 = math.tanh %124 : vector<8x256xf32>
    %126 = arith.mulf %121, %125 : vector<8x256xf32>
    %c32_62 = arith.constant 32 : index
    %c0_63 = arith.constant 0 : index
    %127 = vector.load %arg16[%c32_62, %c0_63] : memref<64x256xf32, #tpu.memory_space<vmem>>, vector<8x256xf32>
    tpu.vector_store %arg16[%c32_62, %c0_63], %126 {strides = array<i32>} : memref<64x256xf32, #tpu.memory_space<vmem>>, vector<8x256xf32>,
    %c40_64 = arith.constant 40 : index
    %c0_65 = arith.constant 0 : index
    %128 = vector.load %arg14[%c40_64, %c0_65] : memref<64x256xf32, #tpu.memory_space<vmem>>, vector<8x256xf32>
    %c16_66 = arith.constant 16 : index
    %c0_67 = arith.constant 0 : index
    %129 = vector.load %arg15[%c16_66, %c0_67] : memref<64x256xf32, #tpu.memory_space<vmem>>, vector<8x256xf32>
    %130 = arith.addf %128, %129 : vector<8x256xf32>
    %cst_68 = arith.constant dense<0.000000e+00> : vector<8x256xf32>
    %131 = tpu.matmul %126, %15, %cst_68 {dimension_numbers = #tpu.dot_dimension_numbers<[1], [0], [0], [1], [0, 0, 1, 1], [], []>} : vector<8x256xf32>, vector<256x256xf32>, vector<8x256xf32> -> vector<8x256xf32>
    %132 = arith.addf %130, %131 : vector<8x256xf32>
    %133 = arith.mulf %132, %2 : vector<8x256xf32>
    %134 = arith.negf %133 : vector<8x256xf32>
    %135 = math.exp %134 : vector<8x256xf32>
    %cst_69 = arith.constant 1.000000e+00 : f32
    %136 = vector.broadcast %cst_69 : f32 to vector<8x256xf32>
    %137 = arith.addf %136, %135 : vector<8x256xf32>
    %138 = arith.divf %136, %137 : vector<8x256xf32>
    %139 = arith.mulf %138, %2 : vector<8x256xf32>
    %140 = arith.addf %139, %4 : vector<8x256xf32>
    %c192_i32_70 = arith.constant 192 : i32
    %141 = tpu.dynamic_rotate %140 by %c192_i32_70 dim 1 : vector<8x256xf32>, i32 -> vector<8x256xf32>
    %c128_i32_71 = arith.constant 128 : i32
    %142 = tpu.dynamic_rotate %140 by %c128_i32_71 dim 1 : vector<8x256xf32>, i32 -> vector<8x256xf32>
    %c64_i32_72 = arith.constant 64 : i32
    %143 = tpu.dynamic_rotate %140 by %c64_i32_72 dim 1 : vector<8x256xf32>, i32 -> vector<8x256xf32>
    %144 = arith.mulf %141, %124 : vector<8x256xf32>
    %145 = arith.mulf %140, %142 : vector<8x256xf32>
    %146 = arith.addf %144, %145 : vector<8x256xf32>
    %147 = math.tanh %146 : vector<8x256xf32>
    %148 = arith.mulf %143, %147 : vector<8x256xf32>
    %c40_73 = arith.constant 40 : index
    %c0_74 = arith.constant 0 : index
    %149 = vector.load %arg16[%c40_73, %c0_74] : memref<64x256xf32, #tpu.memory_space<vmem>>, vector<8x256xf32>
    tpu.vector_store %arg16[%c40_73, %c0_74], %148 {strides = array<i32>} : memref<64x256xf32, #tpu.memory_space<vmem>>, vector<8x256xf32>,
    %c48_75 = arith.constant 48 : index
    %c0_76 = arith.constant 0 : index
    %150 = vector.load %arg14[%c48_75, %c0_76] : memref<64x256xf32, #tpu.memory_space<vmem>>, vector<8x256xf32>
    %c8_77 = arith.constant 8 : index
    %c0_78 = arith.constant 0 : index
    %151 = vector.load %arg15[%c8_77, %c0_78] : memref<64x256xf32, #tpu.memory_space<vmem>>, vector<8x256xf32>
    %152 = arith.addf %150, %151 : vector<8x256xf32>
    %cst_79 = arith.constant dense<0.000000e+00> : vector<8x256xf32>
    %153 = tpu.matmul %148, %15, %cst_79 {dimension_numbers = #tpu.dot_dimension_numbers<[1], [0], [0], [1], [0, 0, 1, 1], [], []>} : vector<8x256xf32>, vector<256x256xf32>, vector<8x256xf32> -> vector<8x256xf32>
    %154 = arith.addf %152, %153 : vector<8x256xf32>
    %155 = arith.mulf %154, %2 : vector<8x256xf32>
    %156 = arith.negf %155 : vector<8x256xf32>
    %157 = math.exp %156 : vector<8x256xf32>
    %cst_80 = arith.constant 1.000000e+00 : f32
    %158 = vector.broadcast %cst_80 : f32 to vector<8x256xf32>
    %159 = arith.addf %158, %157 : vector<8x256xf32>
    %160 = arith.divf %158, %159 : vector<8x256xf32>
    %161 = arith.mulf %160, %2 : vector<8x256xf32>
    %162 = arith.addf %161, %4 : vector<8x256xf32>
    %c192_i32_81 = arith.constant 192 : i32
    %163 = tpu.dynamic_rotate %162 by %c192_i32_81 dim 1 : vector<8x256xf32>, i32 -> vector<8x256xf32>
    %c128_i32_82 = arith.constant 128 : i32
    %164 = tpu.dynamic_rotate %162 by %c128_i32_82 dim 1 : vector<8x256xf32>, i32 -> vector<8x256xf32>
    %c64_i32_83 = arith.constant 64 : i32
    %165 = tpu.dynamic_rotate %162 by %c64_i32_83 dim 1 : vector<8x256xf32>, i32 -> vector<8x256xf32>
    %166 = arith.mulf %163, %146 : vector<8x256xf32>
    %167 = arith.mulf %162, %164 : vector<8x256xf32>
    %168 = arith.addf %166, %167 : vector<8x256xf32>
    %169 = math.tanh %168 : vector<8x256xf32>
    %170 = arith.mulf %165, %169 : vector<8x256xf32>
    %c48_84 = arith.constant 48 : index
    %c0_85 = arith.constant 0 : index
    %171 = vector.load %arg16[%c48_84, %c0_85] : memref<64x256xf32, #tpu.memory_space<vmem>>, vector<8x256xf32>
    tpu.vector_store %arg16[%c48_84, %c0_85], %170 {strides = array<i32>} : memref<64x256xf32, #tpu.memory_space<vmem>>, vector<8x256xf32>,
    %c56_86 = arith.constant 56 : index
    %c0_87 = arith.constant 0 : index
    %172 = vector.load %arg14[%c56_86, %c0_87] : memref<64x256xf32, #tpu.memory_space<vmem>>, vector<8x256xf32>
    %c0_88 = arith.constant 0 : index
    %c0_89 = arith.constant 0 : index
    %173 = vector.load %arg15[%c0_88, %c0_89] : memref<64x256xf32, #tpu.memory_space<vmem>>, vector<8x256xf32>
    %174 = arith.addf %172, %173 : vector<8x256xf32>
    %cst_90 = arith.constant dense<0.000000e+00> : vector<8x256xf32>
    %175 = tpu.matmul %170, %15, %cst_90 {dimension_numbers = #tpu.dot_dimension_numbers<[1], [0], [0], [1], [0, 0, 1, 1], [], []>} : vector<8x256xf32>, vector<256x256xf32>, vector<8x256xf32> -> vector<8x256xf32>
    %176 = arith.addf %174, %175 : vector<8x256xf32>
    %177 = arith.mulf %176, %2 : vector<8x256xf32>
    %178 = arith.negf %177 : vector<8x256xf32>
    %179 = math.exp %178 : vector<8x256xf32>
    %cst_91 = arith.constant 1.000000e+00 : f32
    %180 = vector.broadcast %cst_91 : f32 to vector<8x256xf32>
    %181 = arith.addf %180, %179 : vector<8x256xf32>
    %182 = arith.divf %180, %181 : vector<8x256xf32>
    %183 = arith.mulf %182, %2 : vector<8x256xf32>
    %184 = arith.addf %183, %4 : vector<8x256xf32>
    %c192_i32_92 = arith.constant 192 : i32
    %185 = tpu.dynamic_rotate %184 by %c192_i32_92 dim 1 : vector<8x256xf32>, i32 -> vector<8x256xf32>
    %c128_i32_93 = arith.constant 128 : i32
    %186 = tpu.dynamic_rotate %184 by %c128_i32_93 dim 1 : vector<8x256xf32>, i32 -> vector<8x256xf32>
    %c64_i32_94 = arith.constant 64 : i32
    %187 = tpu.dynamic_rotate %184 by %c64_i32_94 dim 1 : vector<8x256xf32>, i32 -> vector<8x256xf32>
    %188 = arith.mulf %185, %168 : vector<8x256xf32>
    %189 = arith.mulf %184, %186 : vector<8x256xf32>
    %190 = arith.addf %188, %189 : vector<8x256xf32>
    %191 = math.tanh %190 : vector<8x256xf32>
    %192 = arith.mulf %187, %191 : vector<8x256xf32>
    %c56_95 = arith.constant 56 : index
    %c0_96 = arith.constant 0 : index
    %193 = vector.load %arg16[%c56_95, %c0_96] : memref<64x256xf32, #tpu.memory_space<vmem>>, vector<8x256xf32>
    tpu.vector_store %arg16[%c56_95, %c0_96], %192 {strides = array<i32>} : memref<64x256xf32, #tpu.memory_space<vmem>>, vector<8x256xf32>,
    %c0_97 = arith.constant 0 : index
    %c0_98 = arith.constant 0 : index
    %194 = vector.load %arg16[%c0_97, %c0_98] : memref<64x256xf32, #tpu.memory_space<vmem>>, vector<64x256xf32>
    %c0_99 = arith.constant 0 : index
    %c0_100 = arith.constant 0 : index
    %195 = vector.load %arg5[%c0_99, %c0_100] : memref<256x256xf32, #tpu.memory_space<vmem>>, vector<256x256xf32>
    %cst_101 = arith.constant dense<0.000000e+00> : vector<64x256xf32>
    %196 = tpu.matmul %194, %195, %cst_101 {dimension_numbers = #tpu.dot_dimension_numbers<[1], [0], [0], [1], [0, 0, 1, 1], [], []>} : vector<64x256xf32>, vector<256x256xf32>, vector<64x256xf32> -> vector<64x256xf32>
    %c0_102 = arith.constant 0 : index
    %c0_103 = arith.constant 0 : index
    %197 = vector.load %arg7[%c0_102, %c0_103] : memref<1x256xf32, #tpu.memory_space<vmem>>, vector<1x256xf32>
    %198 = vector.broadcast %197 : vector<1x256xf32> to vector<64x256xf32>
    %199 = arith.addf %196, %198 : vector<64x256xf32>
    %c0_104 = arith.constant 0 : index
    %c0_105 = arith.constant 0 : index
    %200 = vector.load %arg14[%c0_104, %c0_105] : memref<64x256xf32, #tpu.memory_space<vmem>>, vector<64x256xf32>
    tpu.vector_store %arg14[%c0_104, %c0_105], %199 {strides = array<i32>} : memref<64x256xf32, #tpu.memory_space<vmem>>, vector<64x256xf32>,
    %c0_106 = arith.constant 0 : index
    %c0_107 = arith.constant 0 : index
    %201 = vector.load %arg6[%c0_106, %c0_107] : memref<256x256xf32, #tpu.memory_space<vmem>>, vector<256x256xf32>
    %cst_108 = arith.constant dense<0.000000e+00> : vector<64x256xf32>
    %202 = tpu.matmul %194, %201, %cst_108 {dimension_numbers = #tpu.dot_dimension_numbers<[1], [0], [0], [1], [0, 0, 1, 1], [], []>} : vector<64x256xf32>, vector<256x256xf32>, vector<64x256xf32> -> vector<64x256xf32>
    %c0_109 = arith.constant 0 : index
    %c0_110 = arith.constant 0 : index
    %203 = vector.load %arg15[%c0_109, %c0_110] : memref<64x256xf32, #tpu.memory_space<vmem>>, vector<64x256xf32>
    tpu.vector_store %arg15[%c0_109, %c0_110], %202 {strides = array<i32>} : memref<64x256xf32, #tpu.memory_space<vmem>>, vector<64x256xf32>,
    %c0_111 = arith.constant 0 : index
    %c0_112 = arith.constant 0 : index
    %204 = vector.load %arg8[%c0_111, %c0_112] : memref<256x256xf32, #tpu.memory_space<vmem>>, vector<256x256xf32>
    %cst_113 = arith.constant 0.000000e+00 : f32
    %205 = vector.broadcast %cst_113 : f32 to vector<8x256xf32>
    %cst_114 = arith.constant 0.000000e+00 : f32
    %206 = vector.broadcast %cst_114 : f32 to vector<8x256xf32>
    %c0_115 = arith.constant 0 : index
    %c0_116 = arith.constant 0 : index
    %207 = vector.load %arg14[%c0_115, %c0_116] : memref<64x256xf32, #tpu.memory_space<vmem>>, vector<8x256xf32>
    %c56_117 = arith.constant 56 : index
    %c0_118 = arith.constant 0 : index
    %208 = vector.load %arg15[%c56_117, %c0_118] : memref<64x256xf32, #tpu.memory_space<vmem>>, vector<8x256xf32>
    %209 = arith.addf %207, %208 : vector<8x256xf32>
    %cst_119 = arith.constant dense<0.000000e+00> : vector<8x256xf32>
    %210 = tpu.matmul %205, %204, %cst_119 {dimension_numbers = #tpu.dot_dimension_numbers<[1], [0], [0], [1], [0, 0, 1, 1], [], []>} : vector<8x256xf32>, vector<256x256xf32>, vector<8x256xf32> -> vector<8x256xf32>
    %211 = arith.addf %209, %210 : vector<8x256xf32>
    %212 = arith.mulf %211, %2 : vector<8x256xf32>
    %213 = arith.negf %212 : vector<8x256xf32>
    %214 = math.exp %213 : vector<8x256xf32>
    %cst_120 = arith.constant 1.000000e+00 : f32
    %215 = vector.broadcast %cst_120 : f32 to vector<8x256xf32>
    %216 = arith.addf %215, %214 : vector<8x256xf32>
    %217 = arith.divf %215, %216 : vector<8x256xf32>
    %218 = arith.mulf %217, %2 : vector<8x256xf32>
    %219 = arith.addf %218, %4 : vector<8x256xf32>
    %c192_i32_121 = arith.constant 192 : i32
    %220 = tpu.dynamic_rotate %219 by %c192_i32_121 dim 1 : vector<8x256xf32>, i32 -> vector<8x256xf32>
    %c128_i32_122 = arith.constant 128 : i32
    %221 = tpu.dynamic_rotate %219 by %c128_i32_122 dim 1 : vector<8x256xf32>, i32 -> vector<8x256xf32>
    %c64_i32_123 = arith.constant 64 : i32
    %222 = tpu.dynamic_rotate %219 by %c64_i32_123 dim 1 : vector<8x256xf32>, i32 -> vector<8x256xf32>
    %223 = arith.mulf %220, %206 : vector<8x256xf32>
    %224 = arith.mulf %219, %221 : vector<8x256xf32>
    %225 = arith.addf %223, %224 : vector<8x256xf32>
    %226 = math.tanh %225 : vector<8x256xf32>
    %227 = arith.mulf %222, %226 : vector<8x256xf32>
    %c8_124 = arith.constant 8 : index
    %c0_125 = arith.constant 0 : index
    %228 = vector.load %arg14[%c8_124, %c0_125] : memref<64x256xf32, #tpu.memory_space<vmem>>, vector<8x256xf32>
    %c48_126 = arith.constant 48 : index
    %c0_127 = arith.constant 0 : index
    %229 = vector.load %arg15[%c48_126, %c0_127] : memref<64x256xf32, #tpu.memory_space<vmem>>, vector<8x256xf32>
    %230 = arith.addf %228, %229 : vector<8x256xf32>
    %cst_128 = arith.constant dense<0.000000e+00> : vector<8x256xf32>
    %231 = tpu.matmul %227, %204, %cst_128 {dimension_numbers = #tpu.dot_dimension_numbers<[1], [0], [0], [1], [0, 0, 1, 1], [], []>} : vector<8x256xf32>, vector<256x256xf32>, vector<8x256xf32> -> vector<8x256xf32>
    %232 = arith.addf %230, %231 : vector<8x256xf32>
    %233 = arith.mulf %232, %2 : vector<8x256xf32>
    %234 = arith.negf %233 : vector<8x256xf32>
    %235 = math.exp %234 : vector<8x256xf32>
    %cst_129 = arith.constant 1.000000e+00 : f32
    %236 = vector.broadcast %cst_129 : f32 to vector<8x256xf32>
    %237 = arith.addf %236, %235 : vector<8x256xf32>
    %238 = arith.divf %236, %237 : vector<8x256xf32>
    %239 = arith.mulf %238, %2 : vector<8x256xf32>
    %240 = arith.addf %239, %4 : vector<8x256xf32>
    %c192_i32_130 = arith.constant 192 : i32
    %241 = tpu.dynamic_rotate %240 by %c192_i32_130 dim 1 : vector<8x256xf32>, i32 -> vector<8x256xf32>
    %c128_i32_131 = arith.constant 128 : i32
    %242 = tpu.dynamic_rotate %240 by %c128_i32_131 dim 1 : vector<8x256xf32>, i32 -> vector<8x256xf32>
    %c64_i32_132 = arith.constant 64 : i32
    %243 = tpu.dynamic_rotate %240 by %c64_i32_132 dim 1 : vector<8x256xf32>, i32 -> vector<8x256xf32>
    %244 = arith.mulf %241, %225 : vector<8x256xf32>
    %245 = arith.mulf %240, %242 : vector<8x256xf32>
    %246 = arith.addf %244, %245 : vector<8x256xf32>
    %247 = math.tanh %246 : vector<8x256xf32>
    %248 = arith.mulf %243, %247 : vector<8x256xf32>
    %c16_133 = arith.constant 16 : index
    %c0_134 = arith.constant 0 : index
    %249 = vector.load %arg14[%c16_133, %c0_134] : memref<64x256xf32, #tpu.memory_space<vmem>>, vector<8x256xf32>
    %c40_135 = arith.constant 40 : index
    %c0_136 = arith.constant 0 : index
    %250 = vector.load %arg15[%c40_135, %c0_136] : memref<64x256xf32, #tpu.memory_space<vmem>>, vector<8x256xf32>
    %251 = arith.addf %249, %250 : vector<8x256xf32>
    %cst_137 = arith.constant dense<0.000000e+00> : vector<8x256xf32>
    %252 = tpu.matmul %248, %204, %cst_137 {dimension_numbers = #tpu.dot_dimension_numbers<[1], [0], [0], [1], [0, 0, 1, 1], [], []>} : vector<8x256xf32>, vector<256x256xf32>, vector<8x256xf32> -> vector<8x256xf32>
    %253 = arith.addf %251, %252 : vector<8x256xf32>
    %254 = arith.mulf %253, %2 : vector<8x256xf32>
    %255 = arith.negf %254 : vector<8x256xf32>
    %256 = math.exp %255 : vector<8x256xf32>
    %cst_138 = arith.constant 1.000000e+00 : f32
    %257 = vector.broadcast %cst_138 : f32 to vector<8x256xf32>
    %258 = arith.addf %257, %256 : vector<8x256xf32>
    %259 = arith.divf %257, %258 : vector<8x256xf32>
    %260 = arith.mulf %259, %2 : vector<8x256xf32>
    %261 = arith.addf %260, %4 : vector<8x256xf32>
    %c192_i32_139 = arith.constant 192 : i32
    %262 = tpu.dynamic_rotate %261 by %c192_i32_139 dim 1 : vector<8x256xf32>, i32 -> vector<8x256xf32>
    %c128_i32_140 = arith.constant 128 : i32
    %263 = tpu.dynamic_rotate %261 by %c128_i32_140 dim 1 : vector<8x256xf32>, i32 -> vector<8x256xf32>
    %c64_i32_141 = arith.constant 64 : i32
    %264 = tpu.dynamic_rotate %261 by %c64_i32_141 dim 1 : vector<8x256xf32>, i32 -> vector<8x256xf32>
    %265 = arith.mulf %262, %246 : vector<8x256xf32>
    %266 = arith.mulf %261, %263 : vector<8x256xf32>
    %267 = arith.addf %265, %266 : vector<8x256xf32>
    %268 = math.tanh %267 : vector<8x256xf32>
    %269 = arith.mulf %264, %268 : vector<8x256xf32>
    %c24_142 = arith.constant 24 : index
    %c0_143 = arith.constant 0 : index
    %270 = vector.load %arg14[%c24_142, %c0_143] : memref<64x256xf32, #tpu.memory_space<vmem>>, vector<8x256xf32>
    %c32_144 = arith.constant 32 : index
    %c0_145 = arith.constant 0 : index
    %271 = vector.load %arg15[%c32_144, %c0_145] : memref<64x256xf32, #tpu.memory_space<vmem>>, vector<8x256xf32>
    %272 = arith.addf %270, %271 : vector<8x256xf32>
    %cst_146 = arith.constant dense<0.000000e+00> : vector<8x256xf32>
    %273 = tpu.matmul %269, %204, %cst_146 {dimension_numbers = #tpu.dot_dimension_numbers<[1], [0], [0], [1], [0, 0, 1, 1], [], []>} : vector<8x256xf32>, vector<256x256xf32>, vector<8x256xf32> -> vector<8x256xf32>
    %274 = arith.addf %272, %273 : vector<8x256xf32>
    %275 = arith.mulf %274, %2 : vector<8x256xf32>
    %276 = arith.negf %275 : vector<8x256xf32>
    %277 = math.exp %276 : vector<8x256xf32>
    %cst_147 = arith.constant 1.000000e+00 : f32
    %278 = vector.broadcast %cst_147 : f32 to vector<8x256xf32>
    %279 = arith.addf %278, %277 : vector<8x256xf32>
    %280 = arith.divf %278, %279 : vector<8x256xf32>
    %281 = arith.mulf %280, %2 : vector<8x256xf32>
    %282 = arith.addf %281, %4 : vector<8x256xf32>
    %c192_i32_148 = arith.constant 192 : i32
    %283 = tpu.dynamic_rotate %282 by %c192_i32_148 dim 1 : vector<8x256xf32>, i32 -> vector<8x256xf32>
    %c128_i32_149 = arith.constant 128 : i32
    %284 = tpu.dynamic_rotate %282 by %c128_i32_149 dim 1 : vector<8x256xf32>, i32 -> vector<8x256xf32>
    %c64_i32_150 = arith.constant 64 : i32
    %285 = tpu.dynamic_rotate %282 by %c64_i32_150 dim 1 : vector<8x256xf32>, i32 -> vector<8x256xf32>
    %286 = arith.mulf %283, %267 : vector<8x256xf32>
    %287 = arith.mulf %282, %284 : vector<8x256xf32>
    %288 = arith.addf %286, %287 : vector<8x256xf32>
    %289 = math.tanh %288 : vector<8x256xf32>
    %290 = arith.mulf %285, %289 : vector<8x256xf32>
    %c32_151 = arith.constant 32 : index
    %c0_152 = arith.constant 0 : index
    %291 = vector.load %arg14[%c32_151, %c0_152] : memref<64x256xf32, #tpu.memory_space<vmem>>, vector<8x256xf32>
    %c24_153 = arith.constant 24 : index
    %c0_154 = arith.constant 0 : index
    %292 = vector.load %arg15[%c24_153, %c0_154] : memref<64x256xf32, #tpu.memory_space<vmem>>, vector<8x256xf32>
    %293 = arith.addf %291, %292 : vector<8x256xf32>
    %cst_155 = arith.constant dense<0.000000e+00> : vector<8x256xf32>
    %294 = tpu.matmul %290, %204, %cst_155 {dimension_numbers = #tpu.dot_dimension_numbers<[1], [0], [0], [1], [0, 0, 1, 1], [], []>} : vector<8x256xf32>, vector<256x256xf32>, vector<8x256xf32> -> vector<8x256xf32>
    %295 = arith.addf %293, %294 : vector<8x256xf32>
    %296 = arith.mulf %295, %2 : vector<8x256xf32>
    %297 = arith.negf %296 : vector<8x256xf32>
    %298 = math.exp %297 : vector<8x256xf32>
    %cst_156 = arith.constant 1.000000e+00 : f32
    %299 = vector.broadcast %cst_156 : f32 to vector<8x256xf32>
    %300 = arith.addf %299, %298 : vector<8x256xf32>
    %301 = arith.divf %299, %300 : vector<8x256xf32>
    %302 = arith.mulf %301, %2 : vector<8x256xf32>
    %303 = arith.addf %302, %4 : vector<8x256xf32>
    %c192_i32_157 = arith.constant 192 : i32
    %304 = tpu.dynamic_rotate %303 by %c192_i32_157 dim 1 : vector<8x256xf32>, i32 -> vector<8x256xf32>
    %c128_i32_158 = arith.constant 128 : i32
    %305 = tpu.dynamic_rotate %303 by %c128_i32_158 dim 1 : vector<8x256xf32>, i32 -> vector<8x256xf32>
    %c64_i32_159 = arith.constant 64 : i32
    %306 = tpu.dynamic_rotate %303 by %c64_i32_159 dim 1 : vector<8x256xf32>, i32 -> vector<8x256xf32>
    %307 = arith.mulf %304, %288 : vector<8x256xf32>
    %308 = arith.mulf %303, %305 : vector<8x256xf32>
    %309 = arith.addf %307, %308 : vector<8x256xf32>
    %310 = math.tanh %309 : vector<8x256xf32>
    %311 = arith.mulf %306, %310 : vector<8x256xf32>
    %c40_160 = arith.constant 40 : index
    %c0_161 = arith.constant 0 : index
    %312 = vector.load %arg14[%c40_160, %c0_161] : memref<64x256xf32, #tpu.memory_space<vmem>>, vector<8x256xf32>
    %c16_162 = arith.constant 16 : index
    %c0_163 = arith.constant 0 : index
    %313 = vector.load %arg15[%c16_162, %c0_163] : memref<64x256xf32, #tpu.memory_space<vmem>>, vector<8x256xf32>
    %314 = arith.addf %312, %313 : vector<8x256xf32>
    %cst_164 = arith.constant dense<0.000000e+00> : vector<8x256xf32>
    %315 = tpu.matmul %311, %204, %cst_164 {dimension_numbers = #tpu.dot_dimension_numbers<[1], [0], [0], [1], [0, 0, 1, 1], [], []>} : vector<8x256xf32>, vector<256x256xf32>, vector<8x256xf32> -> vector<8x256xf32>
    %316 = arith.addf %314, %315 : vector<8x256xf32>
    %317 = arith.mulf %316, %2 : vector<8x256xf32>
    %318 = arith.negf %317 : vector<8x256xf32>
    %319 = math.exp %318 : vector<8x256xf32>
    %cst_165 = arith.constant 1.000000e+00 : f32
    %320 = vector.broadcast %cst_165 : f32 to vector<8x256xf32>
    %321 = arith.addf %320, %319 : vector<8x256xf32>
    %322 = arith.divf %320, %321 : vector<8x256xf32>
    %323 = arith.mulf %322, %2 : vector<8x256xf32>
    %324 = arith.addf %323, %4 : vector<8x256xf32>
    %c192_i32_166 = arith.constant 192 : i32
    %325 = tpu.dynamic_rotate %324 by %c192_i32_166 dim 1 : vector<8x256xf32>, i32 -> vector<8x256xf32>
    %c128_i32_167 = arith.constant 128 : i32
    %326 = tpu.dynamic_rotate %324 by %c128_i32_167 dim 1 : vector<8x256xf32>, i32 -> vector<8x256xf32>
    %c64_i32_168 = arith.constant 64 : i32
    %327 = tpu.dynamic_rotate %324 by %c64_i32_168 dim 1 : vector<8x256xf32>, i32 -> vector<8x256xf32>
    %328 = arith.mulf %325, %309 : vector<8x256xf32>
    %329 = arith.mulf %324, %326 : vector<8x256xf32>
    %330 = arith.addf %328, %329 : vector<8x256xf32>
    %331 = math.tanh %330 : vector<8x256xf32>
    %332 = arith.mulf %327, %331 : vector<8x256xf32>
    %c48_169 = arith.constant 48 : index
    %c0_170 = arith.constant 0 : index
    %333 = vector.load %arg14[%c48_169, %c0_170] : memref<64x256xf32, #tpu.memory_space<vmem>>, vector<8x256xf32>
    %c8_171 = arith.constant 8 : index
    %c0_172 = arith.constant 0 : index
    %334 = vector.load %arg15[%c8_171, %c0_172] : memref<64x256xf32, #tpu.memory_space<vmem>>, vector<8x256xf32>
    %335 = arith.addf %333, %334 : vector<8x256xf32>
    %cst_173 = arith.constant dense<0.000000e+00> : vector<8x256xf32>
    %336 = tpu.matmul %332, %204, %cst_173 {dimension_numbers = #tpu.dot_dimension_numbers<[1], [0], [0], [1], [0, 0, 1, 1], [], []>} : vector<8x256xf32>, vector<256x256xf32>, vector<8x256xf32> -> vector<8x256xf32>
    %337 = arith.addf %335, %336 : vector<8x256xf32>
    %338 = arith.mulf %337, %2 : vector<8x256xf32>
    %339 = arith.negf %338 : vector<8x256xf32>
    %340 = math.exp %339 : vector<8x256xf32>
    %cst_174 = arith.constant 1.000000e+00 : f32
    %341 = vector.broadcast %cst_174 : f32 to vector<8x256xf32>
    %342 = arith.addf %341, %340 : vector<8x256xf32>
    %343 = arith.divf %341, %342 : vector<8x256xf32>
    %344 = arith.mulf %343, %2 : vector<8x256xf32>
    %345 = arith.addf %344, %4 : vector<8x256xf32>
    %c192_i32_175 = arith.constant 192 : i32
    %346 = tpu.dynamic_rotate %345 by %c192_i32_175 dim 1 : vector<8x256xf32>, i32 -> vector<8x256xf32>
    %c128_i32_176 = arith.constant 128 : i32
    %347 = tpu.dynamic_rotate %345 by %c128_i32_176 dim 1 : vector<8x256xf32>, i32 -> vector<8x256xf32>
    %c64_i32_177 = arith.constant 64 : i32
    %348 = tpu.dynamic_rotate %345 by %c64_i32_177 dim 1 : vector<8x256xf32>, i32 -> vector<8x256xf32>
    %349 = arith.mulf %346, %330 : vector<8x256xf32>
    %350 = arith.mulf %345, %347 : vector<8x256xf32>
    %351 = arith.addf %349, %350 : vector<8x256xf32>
    %352 = math.tanh %351 : vector<8x256xf32>
    %353 = arith.mulf %348, %352 : vector<8x256xf32>
    %c56_178 = arith.constant 56 : index
    %c0_179 = arith.constant 0 : index
    %354 = vector.load %arg14[%c56_178, %c0_179] : memref<64x256xf32, #tpu.memory_space<vmem>>, vector<8x256xf32>
    %c0_180 = arith.constant 0 : index
    %c0_181 = arith.constant 0 : index
    %355 = vector.load %arg15[%c0_180, %c0_181] : memref<64x256xf32, #tpu.memory_space<vmem>>, vector<8x256xf32>
    %356 = arith.addf %354, %355 : vector<8x256xf32>
    %cst_182 = arith.constant dense<0.000000e+00> : vector<8x256xf32>
    %357 = tpu.matmul %353, %204, %cst_182 {dimension_numbers = #tpu.dot_dimension_numbers<[1], [0], [0], [1], [0, 0, 1, 1], [], []>} : vector<8x256xf32>, vector<256x256xf32>, vector<8x256xf32> -> vector<8x256xf32>
    %358 = arith.addf %356, %357 : vector<8x256xf32>
    %359 = arith.mulf %358, %2 : vector<8x256xf32>
    %360 = arith.negf %359 : vector<8x256xf32>
    %361 = math.exp %360 : vector<8x256xf32>
    %cst_183 = arith.constant 1.000000e+00 : f32
    %362 = vector.broadcast %cst_183 : f32 to vector<8x256xf32>
    %363 = arith.addf %362, %361 : vector<8x256xf32>
    %364 = arith.divf %362, %363 : vector<8x256xf32>
    %365 = arith.mulf %364, %2 : vector<8x256xf32>
    %366 = arith.addf %365, %4 : vector<8x256xf32>
    %c192_i32_184 = arith.constant 192 : i32
    %367 = tpu.dynamic_rotate %366 by %c192_i32_184 dim 1 : vector<8x256xf32>, i32 -> vector<8x256xf32>
    %c128_i32_185 = arith.constant 128 : i32
    %368 = tpu.dynamic_rotate %366 by %c128_i32_185 dim 1 : vector<8x256xf32>, i32 -> vector<8x256xf32>
    %c64_i32_186 = arith.constant 64 : i32
    %369 = tpu.dynamic_rotate %366 by %c64_i32_186 dim 1 : vector<8x256xf32>, i32 -> vector<8x256xf32>
    %370 = arith.mulf %367, %351 : vector<8x256xf32>
    %371 = arith.mulf %366, %368 : vector<8x256xf32>
    %372 = arith.addf %370, %371 : vector<8x256xf32>
    %373 = math.tanh %372 : vector<8x256xf32>
    %374 = arith.mulf %369, %373 : vector<8x256xf32>
    %c0_187 = arith.constant 0 : index
    %c0_188 = arith.constant 0 : index
    %375 = vector.load %arg10[%c0_187, %c0_188] : memref<256x128xf32, #tpu.memory_space<vmem>>, vector<256x128xf32>
    %cst_189 = arith.constant dense<0.000000e+00> : vector<8x128xf32>
    %376 = tpu.matmul %374, %375, %cst_189 {dimension_numbers = #tpu.dot_dimension_numbers<[1], [0], [0], [1], [0, 0, 1, 1], [], []>} : vector<8x256xf32>, vector<256x128xf32>, vector<8x128xf32> -> vector<8x128xf32>
    %c0_190 = arith.constant 0 : index
    %c0_191 = arith.constant 0 : index
    %377 = vector.load %arg11[%c0_190, %c0_191] : memref<256x128xf32, #tpu.memory_space<vmem>>, vector<256x128xf32>
    %cst_192 = arith.constant dense<0.000000e+00> : vector<8x128xf32>
    %378 = tpu.matmul %227, %377, %cst_192 {dimension_numbers = #tpu.dot_dimension_numbers<[1], [0], [0], [1], [0, 0, 1, 1], [], []>} : vector<8x256xf32>, vector<256x128xf32>, vector<8x128xf32> -> vector<8x128xf32>
    %379 = arith.addf %376, %378 : vector<8x128xf32>
    %c0_193 = arith.constant 0 : index
    %c0_194 = arith.constant 0 : index
    %380 = vector.load %arg12[%c0_193, %c0_194] : memref<1x128xf32, #tpu.memory_space<vmem>>, vector<1x128xf32>
    %381 = vector.broadcast %380 : vector<1x128xf32> to vector<8x128xf32>
    %382 = arith.addf %379, %381 : vector<8x128xf32>
    %c0_195 = arith.constant 0 : index
    %c0_196 = arith.constant 0 : index
    %383 = vector.load %arg13[%c0_195, %c0_196] : memref<8x128xf32, #tpu.memory_space<vmem>>, vector<8x128xf32>
    tpu.vector_store %arg13[%c0_195, %c0_196], %382 {strides = array<i32>} : memref<8x128xf32, #tpu.memory_space<vmem>>, vector<8x128xf32>,
    return
  }
}

</mosaic_0001>

<bundles_post_ra>
// kernel: tpu_custom_call.1
= control target key start
LH: loop header
LB: loop body
LE: loop exit
PB: predicated region body
PF: predicated region fallthrough
CT: control target
= control target key end

     0   :  { %18 = vsyncpa [#allocation6], 0  ;;  %s6024_s0 = inlined_call_operand.hbm [shape: f32[64,128], index: 0, kind: input, shape index: {}]   ;;  %s6025_s1 = inlined_call_operand.hbm [shape: f32[128,256], index: 1, kind: input, shape index: {}]   ;;  %s6026_s2 = inlined_call_operand.hbm [shape: f32[128,256], index: 2, kind: input, shape index: {}]   ;;  %s6027_s3 = inlined_call_operand.vmem [shape: f32[1,256], index: 3, kind: input, shape index: {}]   ;;  %s6028_s4 = inlined_call_operand.hbm [shape: f32[256,256], index: 4, kind: input, shape index: {}]   ;;  %s6029_s5 = inlined_call_operand.hbm [shape: f32[256,256], index: 5, kind: input, shape index: {}]   ;;  %s6030_s6 = inlined_call_operand.hbm [shape: f32[256,256], index: 6, kind: input, shape index: {}]   ;;  %s6031_s7 = inlined_call_operand.vmem [shape: f32[1,256], index: 7, kind: input, shape index: {}]   ;;  %s6032_s8 = inlined_call_operand.hbm [shape: f32[256,256], index: 8, kind: input, shape index: {}]   ;;  %s6033_s9 = inlined_call_operand.vmem [shape: f32[1,256], index: 9, kind: input, shape index: {}]   ;;  %s6034_s10 = inlined_call_operand.hbm [shape: f32[256,128], index: 10, kind: input, shape index: {}]   ;;  %s6035_s11 = inlined_call_operand.hbm [shape: f32[256,128], index: 11, kind: input, shape index: {}]   ;;  %s6036_s12 = inlined_call_operand.vmem [shape: f32[1,128], index: 12, kind: input, shape index: {}]   ;;  %s6037_s13 = inlined_call_operand.hbm [shape: f32[8,128], index: 13, kind: output, shape index: {}]  }
   0x1   :  { %19 = vsyncpa [#allocation9], 0 }
   0x2   :  { %20 = vsyncpa [#allocation12], 0 }
   0x3   :  { %21 = vsyncpa [#allocation15], 0 }
   0x4   :  { %22 = vsyncpa [#allocation18], 0 }
   0x5   :  { %23 = vsyncpa [#allocation7], 0  ;;  %s3759_s25 = smov [#allocation8]  }
   0x6   :  { %s41_s26 = sshll.u32 %s3759_s25, 4  ;;  %s42_s26 = int_to_ptr.vmem [resolvable:$true] %s41_s26 }
   0x7   :  { %s3555_s27 = scalar_lea.vmem %s42_s26, 4096  ;;  %p3560_p1 = scmp.lt.s32.totalorder %s42_s26, %s42_s26 }
   0x8   :  { %p3556_p0 = scmp.ne.s32.totalorder %s42_s26, %s3555_s27  ;;  %p3561_p2 = scmp.lt.s32.totalorder %s3555_s27, %s3555_s27 }
   0xa   :  { %p3562_p3 = por %p3561_p2, %p3560_p1 }
   0xc   :  { %p3563_p4 = pnand %p3562_p3, %p3556_p0 }
   0xe   :  { %3566 = shalt.err (!%p3563_p4)
}
   0xf   :  { %s3760_s28 = smov 256   ;;  %s3761_s29 = smov 16  }
  0x10   :  { %47 = dma.hbm_to_vmem [thread:$0]  %s6025_s1, 4096, %s42_s26, [#allocation9], %s3760_s28, %s3760_s28, %s3761_s29  }
  0x11   :  { %s3762_s15 = smov [#allocation11]   ;;  %s3763_s17 = smov [#allocation14]  }
  0x12   :  { %s67_s16 = sshll.u32 %s3762_s15, 4  ;;  %s91_s18 = sshll.u32 %s3763_s17, 4  ;;  %s68_s16 = int_to_ptr.vmem [resolvable:$true] %s67_s16  ;;  %s92_s18 = int_to_ptr.vmem [resolvable:$true] %s91_s18 }
  0x13   :  { %s3575_s19 = scalar_lea.vmem %s68_s16, 8192  ;;  %p3580_p6 = scmp.lt.s32.totalorder %s68_s16, %s68_s16 }
  0x14   :  { %p3576_p5 = scmp.ne.s32.totalorder %s68_s16, %s3575_s19  ;;  %p3581_p7 = scmp.lt.s32.totalorder %s3575_s19, %s3575_s19 }
  0x16   :  { %p3582_p8 = por %p3581_p7, %p3580_p6 }
  0x18   :  { %p3583_p9 = pnand %p3582_p8, %p3576_p5 }
  0x1a   :  { %3586 = shalt.err (!%p3583_p9)
}
  0x1b   :  { %73 = dma.hbm_to_vmem [thread:$0]  %s6028_s4, 8192, %s68_s16, [#allocation12], %s3760_s28, %s3760_s28, %s3761_s29  }
  0x1c   :  { %s3595_s1 = scalar_lea.vmem %s92_s18, 8192  ;;  %p3600_p11 = scmp.lt.s32.totalorder %s92_s18, %s92_s18 }
  0x1d   :  { %p3596_p10 = scmp.ne.s32.totalorder %s92_s18, %s3595_s1  ;;  %p3601_p12 = scmp.lt.s32.totalorder %s3595_s1, %s3595_s1 }
  0x1f   :  { %p3602_p13 = por %p3601_p12, %p3600_p11 }
  0x21   :  { %p3603_p0 = pnand %p3602_p13, %p3596_p10 }
  0x23   :  { %3606 = shalt.err (!%p3603_p0)
}
  0x24   :  { %97 = dma.hbm_to_vmem [thread:$0]  %s6030_s6, 8192, %s92_s18, [#allocation15], %s3760_s28, %s3760_s28, %s3761_s29  }
  0x25   :  { %s3764_s24 = smov [#allocation17]   ;;  %s3765_s26 = smov [#allocation5]  }
  0x26   :  { %s119_s25 = sshll.u32 %s3764_s24, 4  ;;  %s29_s4 = sshll.u32 %s3765_s26, 4  ;;  %s120_s25 = int_to_ptr.vmem [resolvable:$true] %s119_s25  ;;  %s30_s4 = int_to_ptr.vmem [resolvable:$true] %s29_s4 }
  0x27   :  { %s3615_s27 = scalar_lea.vmem %s120_s25, 4096  ;;  %p3620_p2 = scmp.lt.s32.totalorder %s120_s25, %s120_s25 }
  0x28   :  { %p3616_p1 = scmp.ne.s32.totalorder %s120_s25, %s3615_s27  ;;  %p3621_p3 = scmp.lt.s32.totalorder %s3615_s27, %s3615_s27 }
  0x2a   :  { %p3622_p4 = por %p3621_p3, %p3620_p2 }
  0x2c   :  { %p3623_p5 = pnand %p3622_p4, %p3616_p1 }
  0x2e   :  { %3626 = shalt.err (!%p3623_p5)
}
  0x2f   :  { %s3766_s30 = smov 128   ;;  %s3767_s14 = smov 8  }
  0x30   :  { %125 = dma.hbm_to_vmem [thread:$0]  %s6034_s10, 4096, %s120_s25, [#allocation18], %s3766_s30, %s3766_s30, %s3767_s14  }
  0x31   :  { %s3635_s6 = scalar_lea.vmem %s30_s4, 1024  ;;  %p3640_p7 = scmp.lt.s32.totalorder %s30_s4, %s30_s4 }
  0x32   :  { %p3636_p6 = scmp.ne.s32.totalorder %s30_s4, %s3635_s6  ;;  %p3641_p8 = scmp.lt.s32.totalorder %s3635_s6, %s3635_s6 }
  0x34   :  { %p3642_p9 = por %p3641_p8, %p3640_p7 }
  0x36   :  { %p3643_p10 = pnand %p3642_p9, %p3636_p6 }
  0x38   :  { %3646 = shalt.err (!%p3643_p10)
}
  0x39   :  { %35 = dma.hbm_to_vmem [thread:$0]  %s6024_s0, 1024, %s30_s4, [#allocation6], %s3766_s30, %s3766_s30, %s3767_s14  }
  0x3a   :  { %s3768_s19 = smov [#allocation10]   ;;  %s3769_s21 = smov [#allocation13]  }
  0x3b   :  { %s53_s20 = sshll.u32 %s3768_s19, 4  ;;  %s79_s10 = sshll.u32 %s3769_s21, 4  ;;  %s54_s20 = int_to_ptr.vmem [resolvable:$true] %s53_s20  ;;  %s80_s10 = int_to_ptr.vmem [resolvable:$true] %s79_s10 }
  0x3c   :  { %s3655_s1 = scalar_lea.vmem %s54_s20, 4096  ;;  %p3660_p12 = scmp.lt.s32.totalorder %s54_s20, %s54_s20 }
  0x3d   :  { %p3656_p11 = scmp.ne.s32.totalorder %s54_s20, %s3655_s1  ;;  %p3661_p13 = scmp.lt.s32.totalorder %s3655_s1, %s3655_s1 }
  0x3f   :  { %p3662_p0 = por %p3661_p13, %p3660_p12 }
  0x41   :  { %p3663_p1 = pnand %p3662_p0, %p3656_p11 }
  0x43   :  { %3666 = shalt.err (!%p3663_p1)
}
  0x44   :  { %59 = dma.hbm_to_vmem [thread:$0]  %s6026_s2, 4096, %s54_s20, [#allocation9], %s3760_s28, %s3760_s28, %s3761_s29  }
  0x45   :  { %s3675_s0 = scalar_lea.vmem %s80_s10, 8192  ;;  %p3680_p3 = scmp.lt.s32.totalorder %s80_s10, %s80_s10 }
  0x46   :  { %p3676_p2 = scmp.ne.s32.totalorder %s80_s10, %s3675_s0  ;;  %p3681_p4 = scmp.lt.s32.totalorder %s3675_s0, %s3675_s0 }
  0x48   :  { %p3682_p5 = por %p3681_p4, %p3680_p3 }
  0x4a   :  { %p3683_p6 = pnand %p3682_p5, %p3676_p2 }
  0x4c   :  { %3686 = shalt.err (!%p3683_p6)
}
  0x4d   :  { %85 = dma.hbm_to_vmem [thread:$0]  %s6029_s5, 8192, %s80_s10, [#allocation12], %s3760_s28, %s3760_s28, %s3761_s29  }
  0x4e   :  { %s3770_s26 = smov [#allocation16]   ;;  %s3771_s27 = smov [#allocation19]  }
  0x4f   :  { %s105_s4 = sshll.u32 %s3770_s26, 4  ;;  %s131_s2 = sshll.u32 %s3771_s27, 4  ;;  %s106_s4 = int_to_ptr.vmem [resolvable:$true] %s105_s4  ;;  %s132_s2 = int_to_ptr.vmem [resolvable:$true] %s131_s2 }
  0x50   :  { %s3695_s15 = scalar_lea.vmem %s106_s4, 8192  ;;  %p3700_p8 = scmp.lt.s32.totalorder %s106_s4, %s106_s4 }
  0x51   :  { %p3696_p7 = scmp.ne.s32.totalorder %s106_s4, %s3695_s15  ;;  %p3701_p9 = scmp.lt.s32.totalorder %s3695_s15, %s3695_s15 }
  0x53   :  { %p3702_p10 = por %p3701_p9, %p3700_p8 }
  0x55   :  { %p3703_p11 = pnand %p3702_p10, %p3696_p7 }
  0x57   :  { %3706 = shalt.err (!%p3703_p11)
}
  0x58   :  { %111 = dma.hbm_to_vmem [thread:$0]  %s6032_s8, 8192, %s106_s4, [#allocation15], %s3760_s28, %s3760_s28, %s3761_s29  }
  0x59   :  { %s3715_s5 = scalar_lea.vmem %s132_s2, 4096  ;;  %p3720_p13 = scmp.lt.s32.totalorder %s132_s2, %s132_s2 }
  0x5a   :  { %p3716_p12 = scmp.ne.s32.totalorder %s132_s2, %s3715_s5  ;;  %p3721_p0 = scmp.lt.s32.totalorder %s3715_s5, %s3715_s5 }
  0x5c   :  { %p3722_p1 = por %p3721_p0, %p3720_p13 }
  0x5e   :  { %p3723_p2 = pnand %p3722_p1, %p3716_p12 }
  0x60   :  { %3726 = shalt.err (!%p3723_p2)
}
  0x61   :  { %137 = dma.hbm_to_vmem [thread:$0]  %s6035_s11, 4096, %s132_s2, [#allocation18], %s3766_s30, %s3766_s30, %s3767_s14  }
  0x62   :  { %3747 = dma.done.wait [#allocation6], 1024  }
  0x63   :  { %3748 = vsyncadd [#allocation6], 4294966272 }
  0x64   :  { %3749 = dma.done.wait [#allocation9], 8192  }
  0x65   :  { %3750 = vsyncadd [#allocation9], 4294959104 }
  0x66   :  { %3751 = dma.done.wait [#allocation12], 16384  }
  0x67   :  { %3752 = vsyncadd [#allocation12], 4294950912 }
  0x68   :  { %3753 = dma.done.wait [#allocation15], 16384  }
  0x69   :  { %3754 = vsyncadd [#allocation15], 4294950912 }
  0x6a   :  { %3755 = dma.done.wait [#allocation18], 8192  }
  0x6b   :  { %3756 = vsyncadd [#allocation18], 4294959104  ;;  %v6038_v0 = vmov 0.0   ;;  %v220_v1 = vld [vmem:[#allocation8 + $0xf8] sm:$0xff]  ;;  %v219_v3 = vld [vmem:[#allocation8 + $0xf0] sm:$0xff]  ;;  %s3774_s19 = smov [#allocation20]  }
  0x6c   :  { %297 = vmatprep.mubr.f32.mxu0 %v6038_v0  ;;  %458 = vmatprep.mubr.f32.mxu1 %v6038_v0  ;;  %v393_v2 = vld [vmem:[#allocation10 + $0xf8] sm:$0xff]  ;;  %v392_v4 = vld [vmem:[#allocation10 + $0xf0] sm:$0xff]  ;;  %v218_v5 = vld [vmem:[#allocation8 + $0xe8] sm:$0xff]  ;;  %s3095_s20 = sshll.u32 %s3774_s19, 4  ;;  %s3096_s20 = int_to_ptr.vmem [resolvable:$true] %s3095_s20 }
  0x6d   :  { %233 = vmatprep.subr.mxu0 %v220_v1  ;;  %394 = vmatprep.subr.mxu1 %v393_v2  ;;  %v391_v6 = vld [vmem:[#allocation10 + $0xe8] sm:$0xff]  ;;  %v217_v7 = vld [vmem:[#allocation8 + $0xe0] sm:$0xff]  ;;  %v216_v9 = vld [vmem:[#allocation8 + $0xd8] sm:$0xff]  ;;  %s3727_s21 = scalar_lea.vmem %s3096_s20, 128  ;;  %p3732_p4 = scmp.lt.s32.totalorder %s3096_s20, %s3096_s20 }
  0x6e   :  { %234 = vmatpush1.msra.mxu0 %v219_v3  ;;  %395 = vmatpush1.msra.mxu1 %v392_v4  ;;  %v390_v8 = vld [vmem:[#allocation10 + $0xe0] sm:$0xff]  ;;  %v389_v10 = vld [vmem:[#allocation10 + $0xd8] sm:$0xff]  ;;  %v215_v11 = vld [vmem:[#allocation8 + $0xd0] sm:$0xff]  ;;  %p3728_p3 = scmp.ne.s32.totalorder %s3096_s20, %s3727_s21  ;;  %p3733_p5 = scmp.lt.s32.totalorder %s3727_s21, %s3727_s21 }
  0x6f   :  { %235 = vmatprep.subr.mxu0 %v218_v5  ;;  %396 = vmatprep.subr.mxu1 %v391_v6  ;;  %v388_v12 = vld [vmem:[#allocation10 + $0xd0] sm:$0xff]  ;;  %v214_v13 = vld [vmem:[#allocation8 + $0xc8] sm:$0xff]  ;;  %v213_v15 = vld [vmem:[#allocation8 + $0xc0] sm:$0xff] }
  0x70   :  { %236 = vmatpush1.msra.mxu0 %v217_v7  ;;  %397 = vmatpush1.msra.mxu1 %v390_v8  ;;  %v387_v14 = vld [vmem:[#allocation10 + $0xc8] sm:$0xff]  ;;  %v386_v16 = vld [vmem:[#allocation10 + $0xc0] sm:$0xff]  ;;  %v212_v17 = vld [vmem:[#allocation8 + $0xb8] sm:$0xff]  ;;  %p3734_p6 = por %p3733_p5, %p3732_p4 }
  0x71   :  { %237 = vmatprep.subr.mxu0 %v216_v9  ;;  %398 = vmatprep.subr.mxu1 %v389_v10  ;;  %v385_v18 = vld [vmem:[#allocation10 + $0xb8] sm:$0xff]  ;;  %v211_v19 = vld [vmem:[#allocation8 + $0xb0] sm:$0xff]  ;;  %v210_v21 = vld [vmem:[#allocation8 + $0xa8] sm:$0xff] }
  0x72   :  { %238 = vmatpush1.msra.mxu0 %v215_v11  ;;  %399 = vmatpush1.msra.mxu1 %v388_v12  ;;  %v384_v20 = vld [vmem:[#allocation10 + $0xb0] sm:$0xff]  ;;  %v383_v22 = vld [vmem:[#allocation10 + $0xa8] sm:$0xff]  ;;  %v209_v23 = vld [vmem:[#allocation8 + $0xa0] sm:$0xff]  ;;  %p3735_p7 = pnand %p3734_p6, %p3728_p3 }
  0x73   :  { %239 = vmatprep.subr.mxu0 %v214_v13  ;;  %400 = vmatprep.subr.mxu1 %v387_v14  ;;  %v382_v24 = vld [vmem:[#allocation10 + $0xa0] sm:$0xff]  ;;  %v208_v25 = vld [vmem:[#allocation8 + $0x98] sm:$0xff]  ;;  %v207_v27 = vld [vmem:[#allocation8 + $0x90] sm:$0xff] }
  0x74   :  { %240 = vmatpush1.msra.mxu0 %v213_v15  ;;  %401 = vmatpush1.msra.mxu1 %v386_v16  ;;  %v381_v26 = vld [vmem:[#allocation10 + $0x98] sm:$0xff]  ;;  %v380_v28 = vld [vmem:[#allocation10 + $0x90] sm:$0xff]  ;;  %v206_v29 = vld [vmem:[#allocation8 + $0x88] sm:$0xff] }
  0x75   :  { %241 = vmatprep.subr.mxu0 %v212_v17  ;;  %402 = vmatprep.subr.mxu1 %v385_v18  ;;  %v379_v30 = vld [vmem:[#allocation10 + $0x88] sm:$0xff]  ;;  %v205_v31 = vld [vmem:[#allocation8 + $0x80] sm:$0xff]  ;;  %v204_v33 = vld [vmem:[#allocation8 + $0x78] sm:$0xff] }
  0x76   :  { %242 = vmatpush1.msra.mxu0 %v211_v19  ;;  %403 = vmatpush1.msra.mxu1 %v384_v20  ;;  %v378_v32 = vld [vmem:[#allocation10 + $0x80] sm:$0xff]  ;;  %v377_v34 = vld [vmem:[#allocation10 + $0x78] sm:$0xff]  ;;  %v203_v35 = vld [vmem:[#allocation8 + $0x70] sm:$0xff] }
  0x77   :  { %243 = vmatprep.subr.mxu0 %v210_v21  ;;  %404 = vmatprep.subr.mxu1 %v383_v22  ;;  %v376_v36 = vld [vmem:[#allocation10 + $0x70] sm:$0xff]  ;;  %v202_v37 = vld [vmem:[#allocation8 + $0x68] sm:$0xff]  ;;  %v201_v39 = vld [vmem:[#allocation8 + $0x60] sm:$0xff] }
  0x78   :  { %244 = vmatpush1.msra.mxu0 %v209_v23  ;;  %405 = vmatpush1.msra.mxu1 %v382_v24  ;;  %v375_v38 = vld [vmem:[#allocation10 + $0x68] sm:$0xff]  ;;  %v374_v40 = vld [vmem:[#allocation10 + $0x60] sm:$0xff]  ;;  %v200_v41 = vld [vmem:[#allocation8 + $0x58] sm:$0xff] }
  0x79   :  { %245 = vmatprep.subr.mxu0 %v208_v25  ;;  %406 = vmatprep.subr.mxu1 %v381_v26  ;;  %v373_v42 = vld [vmem:[#allocation10 + $0x58] sm:$0xff]  ;;  %v199_v43 = vld [vmem:[#allocation8 + $0x50] sm:$0xff]  ;;  %v198_v45 = vld [vmem:[#allocation8 + $0x48] sm:$0xff] }
  0x7a   :  { %246 = vmatpush1.msra.mxu0 %v207_v27  ;;  %407 = vmatpush1.msra.mxu1 %v380_v28  ;;  %v372_v44 = vld [vmem:[#allocation10 + $0x50] sm:$0xff]  ;;  %v371_v46 = vld [vmem:[#allocation10 + $0x48] sm:$0xff]  ;;  %v197_v47 = vld [vmem:[#allocation8 + $0x40] sm:$0xff] }
  0x7b   :  { %247 = vmatprep.subr.mxu0 %v206_v29  ;;  %408 = vmatprep.subr.mxu1 %v379_v30  ;;  %v370_v48 = vld [vmem:[#allocation10 + $0x40] sm:$0xff]  ;;  %v196_v49 = vld [vmem:[#allocation8 + $0x38] sm:$0xff]  ;;  %v195_v51 = vld [vmem:[#allocation8 + $0x30] sm:$0xff] }
  0x7c   :  { %248 = vmatpush1.msra.mxu0 %v205_v31  ;;  %409 = vmatpush1.msra.mxu1 %v378_v32  ;;  %v369_v50 = vld [vmem:[#allocation10 + $0x38] sm:$0xff]  ;;  %v368_v52 = vld [vmem:[#allocation10 + $0x30] sm:$0xff]  ;;  %v194_v53 = vld [vmem:[#allocation8 + $0x28] sm:$0xff] }
  0x7d   :  { %249 = vmatprep.subr.mxu0 %v204_v33  ;;  %410 = vmatprep.subr.mxu1 %v377_v34  ;;  %v367_v54 = vld [vmem:[#allocation10 + $0x28] sm:$0xff]  ;;  %v193_v55 = vld [vmem:[#allocation8 + $0x20] sm:$0xff]  ;;  %v192_v57 = vld [vmem:[#allocation8 + $0x18] sm:$0xff] }
  0x7e   :  { %250 = vmatpush1.msra.mxu0 %v203_v35  ;;  %411 = vmatpush1.msra.mxu1 %v376_v36  ;;  %v366_v56 = vld [vmem:[#allocation10 + $0x20] sm:$0xff]  ;;  %v365_v58 = vld [vmem:[#allocation10 + $0x18] sm:$0xff]  ;;  %v191_v59 = vld [vmem:[#allocation8 + $0x10] sm:$0xff] }
  0x7f   :  { %251 = vmatprep.subr.mxu0 %v202_v37  ;;  %412 = vmatprep.subr.mxu1 %v375_v38  ;;  %v364_v60 = vld [vmem:[#allocation10 + $0x10] sm:$0xff]  ;;  %v190_v61 = vld [vmem:[#allocation8 + $0x8] sm:$0xff]  ;;  %v189_v63 = vld [vmem:[#allocation8] sm:$0xff] }
  0x80   :  { %252 = vmatpush1.msra.mxu0 %v201_v39  ;;  %413 = vmatpush1.msra.mxu1 %v374_v40  ;;  %v363_v62 = vld [vmem:[#allocation10 + $0x8] sm:$0xff]  ;;  %v362_v1 = vld [vmem:[#allocation10] sm:$0xff]  ;;  %v3901_v3 = vld [vmem:[#allocation11 + $0xf8] sm:$0xff] }
  0x81   :  { %253 = vmatprep.subr.mxu0 %v200_v41  ;;  %414 = vmatprep.subr.mxu1 %v373_v42  ;;  %v181_v2 = vld [vmem:[#allocation5] sm:$0xff]  ;;  %6269 = vst [vmem:[#allocation27_spill] sm:$0xff] %v3901_v3  ;;  %v3903_v4 = vld [vmem:[#allocation11 + $0xf0] sm:$0xff]  ;;  %v3905_v5 = vld [vmem:[#allocation11 + $0xe8] sm:$0xff] }
  0x82   :  { %254 = vmatpush1.msra.mxu0 %v199_v43  ;;  %415 = vmatpush1.msra.mxu1 %v372_v44  ;;  %v3909_v6 = vld [vmem:[#allocation11 + $0xe0] sm:$0xff]  ;;  %v182_v7 = vld [vmem:[#allocation5 + $0x8] sm:$0xff]  ;;  %v3912_v8 = vld [vmem:[#allocation11 + $0xd8] sm:$0xff] }
  0x83   :  { %255 = vmatprep.subr.mxu0 %v198_v45  ;;  %416 = vmatprep.subr.mxu1 %v371_v46  ;;  %v3916_v9 = vld [vmem:[#allocation11 + $0xd0] sm:$0xff]  ;;  %v3920_v10 = vld [vmem:[#allocation11 + $0xc8] sm:$0xff]  ;;  %v3923_v11 = vld [vmem:[#allocation11 + $0xc0] sm:$0xff] }
  0x84   :  { %256 = vmatpush1.msra.mxu0 %v197_v47  ;;  %417 = vmatpush1.msra.mxu1 %v370_v48  ;;  %v183_v12 = vld [vmem:[#allocation5 + $0x10] sm:$0xff]  ;;  %v3927_v13 = vld [vmem:[#allocation11 + $0xb8] sm:$0xff]  ;;  %v3934_v15 = vld [vmem:[#allocation11 + $0xa8] sm:$0xff] }
  0x85   :  { %257 = vmatprep.subr.mxu0 %v196_v49  ;;  %418 = vmatprep.subr.mxu1 %v369_v50  ;;  %v3931_v14 = vld [vmem:[#allocation11 + $0xb0] sm:$0xff]  ;;  %v3937_v16 = vld [vmem:[#allocation11 + $0xa0] sm:$0xff]  ;;  %v184_v17 = vld [vmem:[#allocation5 + $0x18] sm:$0xff] }
  0x86   :  { %258 = vmatpush1.msra.mxu0 %v195_v51  ;;  %419 = vmatpush1.msra.mxu1 %v368_v52  ;;  %v3941_v18 = vld [vmem:[#allocation11 + $0x98] sm:$0xff]  ;;  %v3945_v19 = vld [vmem:[#allocation11 + $0x90] sm:$0xff]  ;;  %v3948_v20 = vld [vmem:[#allocation11 + $0x88] sm:$0xff] }
  0x87   :  { %259 = vmatprep.subr.mxu0 %v194_v53  ;;  %420 = vmatprep.subr.mxu1 %v367_v54  ;;  %v3951_v21 = vld [vmem:[#allocation11 + $0x80] sm:$0xff]  ;;  %v3955_v23 = vld [vmem:[#allocation11 + $0x78] sm:$0xff]  ;;  %v3959_v24 = vld [vmem:[#allocation11 + $0x70] sm:$0xff] }
  0x88   :  { %260 = vmatpush1.msra.mxu0 %v193_v55  ;;  %421 = vmatpush1.msra.mxu1 %v366_v56  ;;  %v185_v22 = vld [vmem:[#allocation5 + $0x20] sm:$0xff]  ;;  %v3962_v25 = vld [vmem:[#allocation11 + $0x68] sm:$0xff]  ;;  %v3969_v28 = vld [vmem:[#allocation11 + $0x58] sm:$0xff] }
  0x89   :  { %261 = vmatprep.subr.mxu0 %v192_v57  ;;  %422 = vmatprep.subr.mxu1 %v365_v58  ;;  %v3965_v26 = vld [vmem:[#allocation11 + $0x60] sm:$0xff]  ;;  %v186_v27 = vld [vmem:[#allocation5 + $0x28] sm:$0xff]  ;;  %v3973_v29 = vld [vmem:[#allocation11 + $0x50] sm:$0xff] }
  0x8a   :  { %262 = vmatpush1.msra.mxu0 %v191_v59  ;;  %423 = vmatpush1.msra.mxu1 %v364_v60  ;;  %v3976_v30 = vld [vmem:[#allocation11 + $0x48] sm:$0xff]  ;;  %v3979_v31 = vld [vmem:[#allocation11 + $0x40] sm:$0xff]  ;;  %v187_v32 = vld [vmem:[#allocation5 + $0x30] sm:$0xff] }
  0x8b   :  { %263 = vmatprep.subr.mxu0 %v190_v61  ;;  %424 = vmatprep.subr.mxu1 %v363_v62  ;;  %v3983_v33 = vld [vmem:[#allocation11 + $0x38] sm:$0xff]  ;;  %v3987_v34 = vld [vmem:[#allocation11 + $0x30] sm:$0xff]  ;;  %v3990_v35 = vld [vmem:[#allocation11 + $0x28] sm:$0xff] }
  0x8c   :  { %264 = vmatpush1.msra.mxu0 %v189_v63  ;;  %425 = vmatpush1.msra.mxu1 %v362_v1  ;;  %v3993_v36 = vld [vmem:[#allocation11 + $0x20] sm:$0xff]  ;;  %v188_v37 = vld [vmem:[#allocation5 + $0x38] sm:$0xff]  ;;  %v4001_v39 = vld [vmem:[#allocation11 + $0x10] sm:$0xff] }
  0x8d   :  { %298 = vmatmul.mubr.f32.vlgmr.msra.gmra.mxu0 %v181_v2  ;;  %459 = vmatmul.mubr.f32.vlgmr.msra.gmra.mxu1 %v181_v2  ;;  %v3997_v38 = vld [vmem:[#allocation11 + $0x18] sm:$0xff]  ;;  %6270 = vst [vmem:[#allocation28_spill] sm:$0xff] %v4001_v39  ;;  %v4004_v40 = vld [vmem:[#allocation11 + $0x8] sm:$0xff]  ;;  %v4007_v41 = vld [vmem:[#allocation11] sm:$0xff] }
  0x8e   :  { %593 = vmatprep.subr.mxu0 %v3901_v3  ;;  %464 = vmatprep.mubr.f32.mxu1 %v6038_v0  ;;  %6271 = vst [vmem:[#allocation29_spill] sm:$0xff] %v4004_v40  ;;  %6272 = vst [vmem:[#allocation30_spill] sm:$0xff] %v4007_v41  ;;  %v4010_v42 = vld [vmem:[#allocation11 + $0x1f8] sm:$0xff]  ;;  %v4014_v43 = vld [vmem:[#allocation11 + $0x1f0] sm:$0xff] }
  0x8f   :  { %594 = vmatpush1.msra.mxu0 %v3903_v4  ;;  %303 = vmatprep.mubr.f32.mxu0 %v6038_v0  ;;  %6273 = vst [vmem:[#allocation31_spill] sm:$0xff] %v4010_v42  ;;  %6274 = vst [vmem:[#allocation32_spill] sm:$0xff] %v4014_v43  ;;  %v4018_v44 = vld [vmem:[#allocation11 + $0x1e8] sm:$0xff]  ;;  %v4022_v45 = vld [vmem:[#allocation11 + $0x1e0] sm:$0xff] }
  0x90   :  { %595 = vmatprep.subr.mxu0 %v3905_v5  ;;  %710 = vmatprep.subr.mxu1 %v3901_v3  ;;  %6275 = vst [vmem:[#allocation33_spill] sm:$0xff] %v4018_v44  ;;  %6276 = vst [vmem:[#allocation34_spill] sm:$0xff] %v4022_v45  ;;  %v4026_v46 = vld [vmem:[#allocation11 + $0x1d8] sm:$0xff]  ;;  %v4030_v47 = vld [vmem:[#allocation11 + $0x1d0] sm:$0xff] }
  0x91   :  { %596 = vmatpush1.msra.mxu0 %v3909_v6  ;;  %465 = vmatmul.mubr.f32.gmra.mxu1 %v182_v7  ;;  %6277 = vst [vmem:[#allocation35_spill] sm:$0xff] %v4026_v46  ;;  %6278 = vst [vmem:[#allocation36_spill] sm:$0xff] %v4030_v47  ;;  %v4034_v48 = vld [vmem:[#allocation11 + $0x1c8] sm:$0xff]  ;;  %v4038_v49 = vld [vmem:[#allocation11 + $0x1c0] sm:$0xff] }
  0x92   :  { %597 = vmatprep.subr.mxu0 %v3912_v8  ;;  %304 = vmatmul.mubr.f32.gmra.mxu0 %v182_v7  ;;  %6279 = vst [vmem:[#allocation37_spill] sm:$0xff] %v4034_v48  ;;  %6280 = vst [vmem:[#allocation38_spill] sm:$0xff] %v4038_v49  ;;  %v4042_v50 = vld [vmem:[#allocation11 + $0x1b8] sm:$0xff]  ;;  %v4046_v51 = vld [vmem:[#allocation11 + $0x1b0] sm:$0xff] }
  0x93   :  { %598 = vmatpush1.msra.mxu0 %v3916_v9  ;;  %470 = vmatprep.mubr.f32.mxu1 %v6038_v0  ;;  %6281 = vst [vmem:[#allocation39_spill] sm:$0xff] %v4042_v50  ;;  %6282 = vst [vmem:[#allocation40_spill] sm:$0xff] %v4046_v51  ;;  %v4050_v52 = vld [vmem:[#allocation11 + $0x1a8] sm:$0xff]  ;;  %v4054_v53 = vld [vmem:[#allocation11 + $0x1a0] sm:$0xff] }
  0x94   :  { %599 = vmatprep.subr.mxu0 %v3920_v10  ;;  %309 = vmatprep.mubr.f32.mxu0 %v6038_v0  ;;  %6283 = vst [vmem:[#allocation41_spill] sm:$0xff] %v4050_v52  ;;  %6284 = vst [vmem:[#allocation42_spill] sm:$0xff] %v4054_v53  ;;  %v4058_v54 = vld [vmem:[#allocation11 + $0x198] sm:$0xff]  ;;  %v4062_v55 = vld [vmem:[#allocation11 + $0x190] sm:$0xff] }
  0x95   :  { %600 = vmatpush1.msra.mxu0 %v3923_v11  ;;  %471 = vmatmul.mubr.f32.gmra.mxu1 %v183_v12  ;;  %6285 = vst [vmem:[#allocation43_spill] sm:$0xff] %v4058_v54  ;;  %6286 = vst [vmem:[#allocation44_spill] sm:$0xff] %v4062_v55  ;;  %v4066_v56 = vld [vmem:[#allocation11 + $0x188] sm:$0xff]  ;;  %v4070_v57 = vld [vmem:[#allocation11 + $0x180] sm:$0xff] }
  0x96   :  { %601 = vmatprep.subr.mxu0 %v3927_v13  ;;  %310 = vmatmul.mubr.f32.gmra.mxu0 %v183_v12  ;;  %6287 = vst [vmem:[#allocation45_spill] sm:$0xff] %v4066_v56  ;;  %6288 = vst [vmem:[#allocation46_spill] sm:$0xff] %v4070_v57  ;;  %v4074_v58 = vld [vmem:[#allocation11 + $0x178] sm:$0xff]  ;;  %v4078_v59 = vld [vmem:[#allocation11 + $0x170] sm:$0xff] }
  0x97   :  { %602 = vmatpush1.msra.mxu0 %v3931_v14  ;;  %476 = vmatprep.mubr.f32.mxu1 %v6038_v0  ;;  %6289 = vst [vmem:[#allocation47_spill] sm:$0xff] %v4074_v58  ;;  %6290 = vst [vmem:[#allocation48_spill] sm:$0xff] %v4078_v59  ;;  %v4082_v60 = vld [vmem:[#allocation11 + $0x168] sm:$0xff]  ;;  %v4086_v61 = vld [vmem:[#allocation11 + $0x160] sm:$0xff] }
  0x98   :  { %603 = vmatprep.subr.mxu0 %v3934_v15  ;;  %315 = vmatprep.mubr.f32.mxu0 %v6038_v0  ;;  %6291 = vst [vmem:[#allocation49_spill] sm:$0xff] %v4082_v60  ;;  %6292 = vst [vmem:[#allocation50_spill] sm:$0xff] %v4086_v61  ;;  %v4090_v62 = vld [vmem:[#allocation11 + $0x158] sm:$0xff]  ;;  %v4094_v63 = vld [vmem:[#allocation11 + $0x150] sm:$0xff] }
  0x99   :  { %604 = vmatpush1.msra.mxu0 %v3937_v16  ;;  %477 = vmatmul.mubr.f32.gmra.mxu1 %v184_v17  ;;  %6293 = vst [vmem:[#allocation51_spill] sm:$0xff] %v4090_v62  ;;  %6294 = vst [vmem:[#allocation52_spill] sm:$0xff] %v4094_v63  ;;  %v4098_v1 = vld [vmem:[#allocation11 + $0x148] sm:$0xff]  ;;  %v4102_v2 = vld [vmem:[#allocation11 + $0x140] sm:$0xff] }
  0x9a   :  { %605 = vmatprep.subr.mxu0 %v3941_v18  ;;  %316 = vmatmul.mubr.f32.gmra.mxu0 %v184_v17  ;;  %6295 = vst [vmem:[#allocation53_spill] sm:$0xff] %v4098_v1  ;;  %6296 = vst [vmem:[#allocation54_spill] sm:$0xff] %v4102_v2  ;;  %v4106_v7 = vld [vmem:[#allocation11 + $0x138] sm:$0xff]  ;;  %v4110_v12 = vld [vmem:[#allocation11 + $0x130] sm:$0xff] }
  0x9b   :  { %606 = vmatpush1.msra.mxu0 %v3945_v19  ;;  %482 = vmatprep.mubr.f32.mxu1 %v6038_v0  ;;  %6297 = vst [vmem:[#allocation55_spill] sm:$0xff] %v4106_v7  ;;  %6298 = vst [vmem:[#allocation56_spill] sm:$0xff] %v4110_v12  ;;  %v4114_v17 = vld [vmem:[#allocation11 + $0x128] sm:$0xff] }
  0x9c   :  { %607 = vmatprep.subr.mxu0 %v3948_v20  ;;  %321 = vmatprep.mubr.f32.mxu0 %v6038_v0  ;;  %6299 = vst [vmem:[#allocation57_spill] sm:$0xff] %v4114_v17 }
  0x9d   :  { %608 = vmatpush1.msra.mxu0 %v3951_v21  ;;  %483 = vmatmul.mubr.f32.gmra.mxu1 %v185_v22 }
  0x9e   :  { %609 = vmatprep.subr.mxu0 %v3955_v23  ;;  %322 = vmatmul.mubr.f32.gmra.mxu0 %v185_v22  ;;  %v4118_v22 = vld [vmem:[#allocation11 + $0x120] sm:$0xff] }
  0x9f   :  { %610 = vmatpush1.msra.mxu0 %v3959_v24  ;;  %488 = vmatprep.mubr.f32.mxu1 %v6038_v0  ;;  %6300 = vst [vmem:[#allocation58_spill] sm:$0xff] %v4118_v22 }
  0xa0   :  { %611 = vmatprep.subr.mxu0 %v3962_v25  ;;  %327 = vmatprep.mubr.f32.mxu0 %v6038_v0 }
  0xa1   :  { %612 = vmatpush1.msra.mxu0 %v3965_v26  ;;  %489 = vmatmul.mubr.f32.gmra.mxu1 %v186_v27 }
  0xa2   :  { %613 = vmatprep.subr.mxu0 %v3969_v28  ;;  %328 = vmatmul.mubr.f32.gmra.mxu0 %v186_v27  ;;  %v4122_v27 = vld [vmem:[#allocation11 + $0x118] sm:$0xff] }
  0xa3   :  { %614 = vmatpush1.msra.mxu0 %v3973_v29  ;;  %494 = vmatprep.mubr.f32.mxu1 %v6038_v0  ;;  %6301 = vst [vmem:[#allocation59_spill] sm:$0xff] %v4122_v27 }
  0xa4   :  { %615 = vmatprep.subr.mxu0 %v3976_v30  ;;  %333 = vmatprep.mubr.f32.mxu0 %v6038_v0 }
  0xa5   :  { %616 = vmatpush1.msra.mxu0 %v3979_v31  ;;  %495 = vmatmul.mubr.f32.gmra.mxu1 %v187_v32 }
  0xa6   :  { %617 = vmatprep.subr.mxu0 %v3983_v33  ;;  %334 = vmatmul.mubr.f32.gmra.mxu0 %v187_v32  ;;  %v4126_v32 = vld [vmem:[#allocation11 + $0x110] sm:$0xff] }
  0xa7   :  { %618 = vmatpush1.msra.mxu0 %v3987_v34  ;;  %500 = vmatprep.mubr.f32.mxu1 %v6038_v0  ;;  %6302 = vst [vmem:[#allocation60_spill] sm:$0xff] %v4126_v32 }
  0xa8   :  { %619 = vmatprep.subr.mxu0 %v3990_v35  ;;  %339 = vmatprep.mubr.f32.mxu0 %v6038_v0 }
  0xa9   :  { %620 = vmatpush1.msra.mxu0 %v3993_v36  ;;  %501 = vmatmul.mubr.f32.gmra.mxu1 %v188_v37 }
  0xaa   :  { %621 = vmatprep.subr.mxu0 %v3997_v38  ;;  %340 = vmatmul.mubr.f32.gmra.mxu0 %v188_v37  ;;  %v4130_v37 = vld [vmem:[#allocation11 + $0x108] sm:$0xff] }
  0xab   :  { %622 = vmatpush1.msra.mxu0 %v4001_v39  ;;  %657 = vmatprep.mubr.f32.mxu0 %v6038_v0  ;;  %6303 = vst [vmem:[#allocation61_spill] sm:$0xff] %v4130_v37  ;;  %v4134_v0 = vld [vmem:[#allocation11 + $0x100] sm:$0xff] }
  0xac   :  { %623 = vmatprep.subr.mxu0 %v4004_v40  ;;  %711 = vmatpush1.msra.mxu1 %v3903_v4  ;;  %6304 = vst [vmem:[#allocation62_spill] sm:$0xff] %v4134_v0 }
  0xad   :  { %624 = vmatpush1.msra.mxu0 %v4007_v41  ;;  %712 = vmatprep.subr.mxu1 %v3905_v5 }
  0xae   :  { %625 = vmatprep.subr.mxu0 %v4010_v42  ;;  %713 = vmatpush1.msra.mxu1 %v3909_v6 }
  0xaf   :  { %626 = vmatpush2.msra.mxu0 %v4014_v43  ;;  %714 = vmatprep.subr.mxu1 %v3912_v8 }
  0xb0   :  { %627 = vmatprep.subr.mxu0 %v4018_v44  ;;  %715 = vmatpush1.msra.mxu1 %v3916_v9 }
  0xb1   :  { %628 = vmatpush2.msra.mxu0 %v4022_v45  ;;  %716 = vmatprep.subr.mxu1 %v3920_v10 }
  0xb2   :  { %629 = vmatprep.subr.mxu0 %v4026_v46  ;;  %717 = vmatpush1.msra.mxu1 %v3923_v11 }
  0xb3   :  { %630 = vmatpush2.msra.mxu0 %v4030_v47  ;;  %718 = vmatprep.subr.mxu1 %v3927_v13 }
  0xb4   :  { %631 = vmatprep.subr.mxu0 %v4034_v48  ;;  %719 = vmatpush1.msra.mxu1 %v3931_v14 }
  0xb5   :  { %632 = vmatpush2.msra.mxu0 %v4038_v49  ;;  %720 = vmatprep.subr.mxu1 %v3934_v15 }
  0xb6   :  { %633 = vmatprep.subr.mxu0 %v4042_v50  ;;  %721 = vmatpush1.msra.mxu1 %v3937_v16 }
  0xb7   :  { %634 = vmatpush2.msra.mxu0 %v4046_v51  ;;  %722 = vmatprep.subr.mxu1 %v3941_v18 }
  0xb8   :  { %635 = vmatprep.subr.mxu0 %v4050_v52  ;;  %723 = vmatpush1.msra.mxu1 %v3945_v19 }
  0xb9   :  { %636 = vmatpush2.msra.mxu0 %v4054_v53  ;;  %724 = vmatprep.subr.mxu1 %v3948_v20 }
  0xba   :  { %637 = vmatprep.subr.mxu0 %v4058_v54  ;;  %725 = vmatpush1.msra.mxu1 %v3951_v21 }
  0xbb   :  { %638 = vmatpush2.msra.mxu0 %v4062_v55  ;;  %726 = vmatprep.subr.mxu1 %v3955_v23 }
  0xbc   :  { %639 = vmatprep.subr.mxu0 %v4066_v56  ;;  %727 = vmatpush1.msra.mxu1 %v3959_v24 }
  0xbd   :  { %640 = vmatpush2.msra.mxu0 %v4070_v57  ;;  %728 = vmatprep.subr.mxu1 %v3962_v25 }
  0xbe   :  { %641 = vmatprep.subr.mxu0 %v4074_v58  ;;  %729 = vmatpush1.msra.mxu1 %v3965_v26 }
  0xbf   :  { %642 = vmatpush2.msra.mxu0 %v4078_v59  ;;  %730 = vmatprep.subr.mxu1 %v3969_v28 }
  0xc0   :  { %643 = vmatprep.subr.mxu0 %v4082_v60  ;;  %731 = vmatpush1.msra.mxu1 %v3973_v29 }
  0xc1   :  { %644 = vmatpush2.msra.mxu0 %v4086_v61  ;;  %732 = vmatprep.subr.mxu1 %v3976_v30 }
  0xc2   :  { %645 = vmatprep.subr.mxu0 %v4090_v62  ;;  %733 = vmatpush1.msra.mxu1 %v3979_v31 }
  0xc3   :  { %646 = vmatpush2.msra.mxu0 %v4094_v63  ;;  %734 = vmatprep.subr.mxu1 %v3983_v33 }
  0xc4   :  { %647 = vmatprep.subr.mxu0 %v4098_v1  ;;  %735 = vmatpush1.msra.mxu1 %v3987_v34 }
  0xc5   :  { %648 = vmatpush2.msra.mxu0 %v4102_v2  ;;  %736 = vmatprep.subr.mxu1 %v3990_v35 }
  0xc6   :  { %649 = vmatprep.subr.mxu0 %v4106_v7  ;;  %737 = vmatpush1.msra.mxu1 %v3993_v36 }
  0xc7   :  { %650 = vmatpush2.msra.mxu0 %v4110_v12  ;;  %738 = vmatprep.subr.mxu1 %v3997_v38 }
  0xc8   :  { %651 = vmatprep.subr.mxu0 %v4114_v17  ;;  %739 = vmatpush1.msra.mxu1 %v4001_v39  ;;  %v6305_v39 = vmov 0.0  }
  0xc9   :  { %652 = vmatpush2.msra.mxu0 %v4118_v22  ;;  %740 = vmatprep.subr.mxu1 %v4004_v40 }
  0xca   :  { %653 = vmatprep.subr.mxu0 %v4122_v27  ;;  %741 = vmatpush1.msra.mxu1 %v4007_v41 }
  0xcb   :  { %654 = vmatpush2.msra.mxu0 %v4126_v32  ;;  %742 = vmatprep.subr.mxu1 %v4010_v42 }
  0xcc   :  { %655 = vmatprep.subr.mxu0 %v4130_v37  ;;  %743 = vmatpush2.msra.mxu1 %v4014_v43 }
  0xcd   :  { %656 = vmatpush2.msra.mxu0 %v4134_v0  ;;  %744 = vmatprep.subr.mxu1 %v4018_v44 }
  0xce   :  { %658 = vmatmul.mubr.f32.vlgmr.msra.gmra.mxu0 %v6305_v39  ;;  %745 = vmatpush2.msra.mxu1 %v4022_v45  ;;  %v6306_v39 = vld [vmem:[#allocation28_spill] sm:$0xff] }
  0xcf   :  { %746 = vmatprep.subr.mxu1 %v4026_v46  ;;  %824 = vmatprep.subr.mxu0 %v3901_v3 }
  0xd0   :  { %747 = vmatpush2.msra.mxu1 %v4030_v47  ;;  %825 = vmatpush1.msra.mxu0 %v3903_v4 }
  0xd1   :  { %748 = vmatprep.subr.mxu1 %v4034_v48  ;;  %826 = vmatprep.subr.mxu0 %v3905_v5 }
  0xd2   :  { %749 = vmatpush2.msra.mxu1 %v4038_v49  ;;  %827 = vmatpush1.msra.mxu0 %v3909_v6 }
  0xd3   :  { %750 = vmatprep.subr.mxu1 %v4042_v50  ;;  %828 = vmatprep.subr.mxu0 %v3912_v8 }
  0xd4   :  { %751 = vmatpush2.msra.mxu1 %v4046_v51  ;;  %829 = vmatpush1.msra.mxu0 %v3916_v9 }
  0xd5   :  { %752 = vmatprep.subr.mxu1 %v4050_v52  ;;  %830 = vmatprep.subr.mxu0 %v3920_v10 }
  0xd6   :  { %753 = vmatpush2.msra.mxu1 %v4054_v53  ;;  %831 = vmatpush1.msra.mxu0 %v3923_v11 }
  0xd7   :  { %754 = vmatprep.subr.mxu1 %v4058_v54  ;;  %832 = vmatprep.subr.mxu0 %v3927_v13 }
  0xd8   :  { %755 = vmatpush2.msra.mxu1 %v4062_v55  ;;  %833 = vmatpush1.msra.mxu0 %v3931_v14 }
  0xd9   :  { %756 = vmatprep.subr.mxu1 %v4066_v56  ;;  %834 = vmatprep.subr.mxu0 %v3934_v15 }
  0xda   :  { %757 = vmatpush2.msra.mxu1 %v4070_v57  ;;  %835 = vmatpush1.msra.mxu0 %v3937_v16 }
  0xdb   :  { %758 = vmatprep.subr.mxu1 %v4074_v58  ;;  %836 = vmatprep.subr.mxu0 %v3941_v18 }
  0xdc   :  { %759 = vmatpush2.msra.mxu1 %v4078_v59  ;;  %837 = vmatpush1.msra.mxu0 %v3945_v19 }
  0xdd   :  { %760 = vmatprep.subr.mxu1 %v4082_v60  ;;  %838 = vmatprep.subr.mxu0 %v3948_v20 }
  0xde   :  { %761 = vmatpush2.msra.mxu1 %v4086_v61  ;;  %839 = vmatpush1.msra.mxu0 %v3951_v21 }
  0xdf   :  { %762 = vmatprep.subr.mxu1 %v4090_v62  ;;  %840 = vmatprep.subr.mxu0 %v3955_v23 }
  0xe0   :  { %763 = vmatpush2.msra.mxu1 %v4094_v63  ;;  %841 = vmatpush1.msra.mxu0 %v3959_v24 }
  0xe1   :  { %764 = vmatprep.subr.mxu1 %v4098_v1  ;;  %842 = vmatprep.subr.mxu0 %v3962_v25 }
  0xe2   :  { %765 = vmatpush2.msra.mxu1 %v4102_v2  ;;  %843 = vmatpush1.msra.mxu0 %v3965_v26 }
  0xe3   :  { %766 = vmatprep.subr.mxu1 %v4106_v7  ;;  %844 = vmatprep.subr.mxu0 %v3969_v28 }
  0xe4   :  { %767 = vmatpush2.msra.mxu1 %v4110_v12  ;;  %845 = vmatpush1.msra.mxu0 %v3973_v29 }
  0xe5   :  { %768 = vmatprep.subr.mxu1 %v4114_v17  ;;  %846 = vmatprep.subr.mxu0 %v3976_v30 }
  0xe6   :  { %769 = vmatpush2.msra.mxu1 %v4118_v22  ;;  %847 = vmatpush1.msra.mxu0 %v3979_v31 }
  0xe7   :  { %770 = vmatprep.subr.mxu1 %v4122_v27  ;;  %848 = vmatprep.subr.mxu0 %v3983_v33 }
  0xe8   :  { %771 = vmatpush2.msra.mxu1 %v4126_v32  ;;  %849 = vmatpush1.msra.mxu0 %v3987_v34 }
  0xe9   :  { %772 = vmatprep.subr.mxu1 %v4130_v37  ;;  %850 = vmatprep.subr.mxu0 %v3990_v35 }
  0xea   :  { %773 = vmatpush2.msra.mxu1 %v4134_v0  ;;  %851 = vmatpush1.msra.mxu0 %v3993_v36 }
  0xeb   :  { %852 = vmatprep.subr.mxu0 %v3997_v38  ;;  %938 = vmatprep.subr.mxu1 %v3901_v3 }
  0xec   :  { %853 = vmatpush1.msra.mxu0 %v6306_v39 }
  0xed   :  { %854 = vmatprep.subr.mxu0 %v4004_v40 }
  0xee   :  { %855 = vmatpush1.msra.mxu0 %v4007_v41 }
  0xef   :  { %856 = vmatprep.subr.mxu0 %v4010_v42 }
  0xf0   :  { %857 = vmatpush2.msra.mxu0 %v4014_v43 }
  0xf1   :  { %858 = vmatprep.subr.mxu0 %v4018_v44 }
  0xf2   :  { %859 = vmatpush2.msra.mxu0 %v4022_v45 }
  0xf3   :  { %860 = vmatprep.subr.mxu0 %v4026_v46 }
  0xf4   :  { %861 = vmatpush2.msra.mxu0 %v4030_v47 }
  0xf5   :  { %862 = vmatprep.subr.mxu0 %v4034_v48 }
  0xf6   :  { %863 = vmatpush2.msra.mxu0 %v4038_v49 }
  0xf7   :  { %864 = vmatprep.subr.mxu0 %v4042_v50 }
  0xf8   :  { %865 = vmatpush2.msra.mxu0 %v4046_v51 }
  0xf9   :  { %866 = vmatprep.subr.mxu0 %v4050_v52 }
  0xfa   :  { %867 = vmatpush2.msra.mxu0 %v4054_v53 }
  0xfb   :  { %868 = vmatprep.subr.mxu0 %v4058_v54 }
  0xfc   :  { %869 = vmatpush2.msra.mxu0 %v4062_v55 }
  0xfd   :  { %870 = vmatprep.subr.mxu0 %v4066_v56 }
  0xfe   :  { %871 = vmatpush2.msra.mxu0 %v4070_v57 }
  0xff   :  { %872 = vmatprep.subr.mxu0 %v4074_v58 }
 0x100   :  { %873 = vmatpush2.msra.mxu0 %v4078_v59 }
 0x101   :  { %874 = vmatprep.subr.mxu0 %v4082_v60 }
 0x102   :  { %875 = vmatpush2.msra.mxu0 %v4086_v61 }
 0x103   :  { %876 = vmatprep.subr.mxu0 %v4090_v62 }
 0x104   :  { %877 = vmatpush2.msra.mxu0 %v4094_v63 }
 0x105   :  { %878 = vmatprep.subr.mxu0 %v4098_v1  ;;  %v6067_v1 = vlaneseq }
 0x106   :  { %879 = vmatpush2.msra.mxu0 %v4102_v2 }
 0x107   :  { %880 = vmatprep.subr.mxu0 %v4106_v7  ;;  %v170_v2 = vshrl.u32 %v6067_v1, 7 }
 0x108   :  { %881 = vmatpush2.msra.mxu0 %v4110_v12 }
 0x109   :  { %882 = vmatprep.subr.mxu0 %v4114_v17  ;;  %v4240_v7 = vsub.s32 0, %v170_v2 }
 0x10a   :  { %883 = vmatpush2.msra.mxu0 %v4118_v22  ;;  %v4247_v22 = vsub.s32 1, %v170_v2 }
 0x10b   :  { %884 = vmatprep.subr.mxu0 %v4122_v27  ;;  %6307 = vst [vmem:[#allocation63_spill] sm:$0xff] %v4240_v7  ;;  %v221_v27 = vld [vmem:[%s6027_s3] sm:$0x3] }
 0x10c   :  { %885 = vmatpush2.msra.mxu0 %v4126_v32  ;;  %6308 = vst [vmem:[#allocation64_spill] sm:$0xff] %v4247_v22  ;;  %v230_v62 = vrot.slane %v221_v27, %v4247_v22 }
 0x10d   :  { %886 = vmatprep.subr.mxu0 %v4130_v37 }
 0x10e   :  { %887 = vmatpush2.msra.mxu0 %v4134_v0  ;;  %v226_v0 = vrot.slane %v221_v27, %v4240_v7 }
 0x10f   :  { %1052 = vmatprep.subr.mxu0 %v3901_v3 }
 0x14d   :  { %v4242_v12 = vpop.f32.mrf.mxu0  ;;  %v460_v17 = vpop.f32.mrf.mxu1 }
 0x14f   :  { %v462_v32 = vpop.f32.mrf.mxu1  ;;  %v301_v37 = vpop.f32.mrf.mxu0 }
 0x151   :  { %v466_v63 = vpop.f32.mrf.mxu1 }
 0x152   :  { %v305_v3 = vpop.f32.mrf.mxu0 }
 0x153   :  { %v306_v1 = vadd.f32 %v305_v3, %v226_v0  ;;  %v468_v61 = vpop.f32.mrf.mxu1 }
 0x154   :  { %v307_v60 = vpop.f32.mrf.mxu0 }
 0x155   :  { %v308_v59 = vadd.f32 %v307_v60, %v230_v62  ;;  %v472_v58 = vpop.f32.mrf.mxu1 }
 0x156   :  { %v311_v57 = vpop.f32.mrf.mxu0 }
 0x157   :  { %v312_v56 = vadd.f32 %v311_v57, %v226_v0  ;;  %v474_v55 = vpop.f32.mrf.mxu1 }
 0x158   :  { %v313_v54 = vpop.f32.mrf.mxu0 }
 0x159   :  { %v314_v53 = vadd.f32 %v313_v54, %v230_v62  ;;  %v478_v2 = vpop.f32.mrf.mxu1 }
 0x15a   :  { %v317_v52 = vpop.f32.mrf.mxu0 }
 0x15b   :  { %v318_v51 = vadd.f32 %v317_v52, %v226_v0  ;;  %v480_v50 = vpop.f32.mrf.mxu1 }
 0x15c   :  { %v319_v49 = vpop.f32.mrf.mxu0 }
 0x15d   :  { %v320_v48 = vadd.f32 %v319_v49, %v230_v62  ;;  %v484_v47 = vpop.f32.mrf.mxu1 }
 0x15e   :  { %v4251_v46 = vadd.f32 %v484_v47, %v318_v51  ;;  %v323_v27 = vpop.f32.mrf.mxu0 }
 0x15f   :  { %v324_v3 = vadd.f32 %v323_v27, %v226_v0  ;;  %v486_v45 = vpop.f32.mrf.mxu1 }
 0x160   :  { %6309 = vst [vmem:[#allocation65_spill] sm:$0xff] %v4251_v46  ;;  %v4253_v44 = vadd.f32 %v486_v45, %v320_v48  ;;  %v325_v60 = vpop.f32.mrf.mxu0 }
 0x161   :  { %v326_v43 = vadd.f32 %v325_v60, %v230_v62  ;;  %v490_v57 = vpop.f32.mrf.mxu1  ;;  %v4255_v42 = vadd.f32 %v478_v2, %v324_v3 }
 0x162   :  { %6310 = vst [vmem:[#allocation66_spill] sm:$0xff] %v4253_v44  ;;  %v4257_v54 = vadd.f32 %v490_v57, %v312_v56  ;;  %v329_v41 = vpop.f32.mrf.mxu0  ;;  %v6357_v44 = vld [vmem:[#allocation57_spill] sm:$0xff] }
 0x163   :  { %6311 = vst [vmem:[#allocation67_spill] sm:$0xff] %v4255_v42  ;;  %v330_v52 = vadd.f32 %v329_v41, %v226_v0  ;;  %v492_v40 = vpop.f32.mrf.mxu1  ;;  %v4259_v39 = vadd.f32 %v480_v50, %v326_v43  ;;  %v6356_v42 = vld [vmem:[#allocation56_spill] sm:$0xff] }
 0x164   :  { %6312 = vst [vmem:[#allocation68_spill] sm:$0xff] %v4257_v54  ;;  %v4261_v49 = vadd.f32 %v492_v40, %v314_v53  ;;  %v331_v47 = vpop.f32.mrf.mxu0  ;;  %v6359_v54 = vld [vmem:[#allocation59_spill] sm:$0xff] }
 0x165   :  { %6313 = vst [vmem:[#allocation69_spill] sm:$0xff] %v4259_v39  ;;  %v332_v51 = vadd.f32 %v331_v47, %v230_v62  ;;  %v496_v27 = vpop.f32.mrf.mxu1  ;;  %v4263_v46 = vadd.f32 %v472_v58, %v330_v52  ;;  %v6355_v39 = vld [vmem:[#allocation55_spill] sm:$0xff] }
 0x166   :  { %6314 = vst [vmem:[#allocation70_spill] sm:$0xff] %v4261_v49  ;;  %v4265_v45 = vadd.f32 %v496_v27, %v306_v1  ;;  %v335_v48 = vpop.f32.mrf.mxu0  ;;  %v6358_v49 = vld [vmem:[#allocation58_spill] sm:$0xff] }
 0x167   :  { %6315 = vst [vmem:[#allocation71_spill] sm:$0xff] %v4263_v46  ;;  %v336_v60 = vadd.f32 %v335_v48, %v226_v0  ;;  %v498_v2 = vpop.f32.mrf.mxu1  ;;  %v4267_v3 = vadd.f32 %v474_v55, %v332_v51  ;;  %v167_v55 = vld [vmem:[%s6033_s9] sm:$0x3]  ;;  %v302_v48 = vadd.f32 %v301_v37, %v230_v62  ;;  %s3773_s9 = smov 64  }
 0x168   :  { %v4269_v56 = vadd.f32 %v498_v2, %v308_v59  ;;  %v337_v41 = vpop.f32.mrf.mxu0  ;;  %v300_v59 = vadd.f32 %v4242_v12, %v226_v0  ;;  %v4287_v2 = vrot.slane %v167_v55, %v4247_v22  ;;  %v6345_v22 = vld [vmem:[#allocation45_spill] sm:$0xff]  ;;  %v6354_v46 = vld [vmem:[#allocation54_spill] sm:$0xff] }
 0x169   :  { %6316 = vst [vmem:[#allocation72_spill] sm:$0xff] %v4267_v3  ;;  %v338_v57 = vadd.f32 %v337_v41, %v230_v62  ;;  %v4271_v43 = vadd.f32 %v466_v63, %v336_v60  ;;  %v502_v27 = vpop.f32.mrf.mxu1  ;;  %v4284_v63 = vrot.slane %v167_v55, %v4240_v7  ;;  %v6346_v7 = vld [vmem:[#allocation46_spill] sm:$0xff]  ;;  %v6353_v3 = vld [vmem:[#allocation53_spill] sm:$0xff] }
 0x16a   :  { %v341_v40 = vpop.f32.mrf.mxu0  ;;  %6322 = vst [vmem:[#allocation78_spill] sm:$0xff] %v4287_v2 }
 0x16b   :  { %6317 = vst [vmem:[#allocation73_spill] sm:$0xff] %v4271_v43  ;;  %v342_v50 = vadd.f32 %v341_v40, %v226_v0  ;;  %v4273_v53 = vadd.f32 %v468_v61, %v338_v57  ;;  %v504_v51 = vpop.f32.mrf.mxu1  ;;  %6321 = vst [vmem:[#allocation77_spill] sm:$0xff] %v4284_v63  ;;  %v591_v61 = vadd.f32 %v502_v27, %v300_v59  ;;  %v4292_v27 = vsub.f32 1.0, %v4284_v63  ;;  %v6350_v43 = vld [vmem:[#allocation50_spill] sm:$0xff] }
 0x16c   :  { %v343_v47 = vpop.f32.mrf.mxu0  ;;  %v4295_v59 = vsub.f32 1.0, %v4287_v2 }
 0x16d   :  { %6318 = vst [vmem:[#allocation74_spill] sm:$0xff] %v4273_v53  ;;  %v344_v58 = vadd.f32 %v343_v47, %v230_v62  ;;  %v4275_v52 = vadd.f32 %v460_v17, %v342_v50  ;;  %v592_v17 = vadd.f32 %v504_v51, %v302_v48  ;;  %6323 = vst [vmem:[#allocation79_spill] sm:$0xff] %v4292_v27  ;;  %v6349_v53 = vld [vmem:[#allocation49_spill] sm:$0xff] }
 0x16e   :  { %6324 = vst [vmem:[#allocation80_spill] sm:$0xff] %v4295_v59 }
 0x16f   :  { %6319 = vst [vmem:[#allocation75_spill] sm:$0xff] %v4275_v52  ;;  %v4277_v1 = vadd.f32 %v462_v32, %v344_v58  ;;  %v6348_v52 = vld [vmem:[#allocation48_spill] sm:$0xff] }
 0x171   :  { %6320 = vst [vmem:[#allocation76_spill] sm:$0xff] %v4277_v1  ;;  %v6347_v1 = vld [vmem:[#allocation47_spill] sm:$0xff] }
 0x18e   :  { %v659_v60 = vpop.f32.mrf.mxu0 }
 0x18f   :  { %v664_v32 = vadd.f32 %v659_v60, %v591_v61 }
 0x190   :  { %v661_v41 = vpop.f32.mrf.mxu0 }
 0x191   :  { %v666_v57 = vmul.f32 %v664_v32, %v4284_v63  ;;  %v665_v40 = vadd.f32 %v661_v41, %v592_v17  ;;  %v6325_v41 = vlaneseq }
 0x193   :  { %v3108_v50 = vmul.f32 -1.442695, %v666_v57  ;;  %v667_v47 = vmul.f32 %v665_v40, %v4287_v2  ;;  %v4304_v57 = vand.u32 127, %v6325_v41  ;;  %v6336_v41 = vld [vmem:[#allocation36_spill] sm:$0xff] }
 0x195   :  { %3227 = vpow2.f32 %v3108_v50  ;;  %v3109_v0 = vmul.f32 -1.442695, %v667_v47  ;;  %vm690_vm0 = vcmp.lt.s32.totalorder %v4304_v57, 64 }
 0x197   :  { %3229 = vpow2.f32 %v3109_v0 }
 0x1a2   :  { %v3228_v12 = vpop.eup %3227 }
 0x1a3   :  { %v674_v58 = vadd.f32 1.0, %v3228_v12 }
 0x1a4   :  { %v3230_v62 = vpop.eup %3229 }
 0x1a5   :  { %3231 = vrcp.f32 %v674_v58  ;;  %v675_v37 = vadd.f32 1.0, %v3230_v62 }
 0x1a7   :  { %3233 = vrcp.f32 %v675_v37 }
 0x1b2   :  { %v3232_v55 = vpop.eup %3231 }
 0x1b3   :  { %v680_v51 = vmul.f32 %v3232_v55, %v4284_v63 }
 0x1b4   :  { %v3234_v48 = vpop.eup %3233 }
 0x1b5   :  { %v681_v61 = vmul.f32 %v3234_v48, %v4287_v2  ;;  %v682_v60 = vadd.f32 %v680_v51, %v4292_v27 }
 0x1b7   :  { %v683_v17 = vadd.f32 %v681_v61, %v4295_v59  ;;  %684 = vrot.lane.b32.xlu0 %v682_v60, %s3773_s9 }
 0x1b9   :  { %v695_v32 = vmul.f32 %v683_v17, %v682_v60  ;;  %v6333_v60 = vld [vmem:[#allocation33_spill] sm:$0xff] }
 0x1bb   :  { %686 = vrot.lane.b32.xlu0 %v683_v17, %s3773_s9  ;;  %v6334_v17 = vld [vmem:[#allocation34_spill] sm:$0xff] }
 0x229   :  { %v685_v40 = vpop.permute.xlu0 %684 }
 0x22d   :  { %v687_v50 = vpop.permute.xlu0 %686 }
 0x22e   :  { %v691_v47 = vsel %vm690_vm0, %v685_v40, %v687_v50  ;;  %v692_v0 = vsel %vm690_vm0, %v687_v50, %v685_v40  ;;  %v6337_v40 = vld [vmem:[#allocation37_spill] sm:$0xff]  ;;  %v6338_v50 = vld [vmem:[#allocation38_spill] sm:$0xff] }
 0x22f   :  { %v693_v12 = vmul.f32 0.0, %v691_v47  ;;  %v694_v58 = vmul.f32 0.0, %v692_v0 }
 0x231   :  { %v4311_v62 = vadd.f32 %v695_v32, %v693_v12  ;;  %v4313_v37 = vadd.f32 %v695_v32, %v694_v58  ;;  %v6335_v32 = vld [vmem:[#allocation35_spill] sm:$0xff]  ;;  %v6341_v12 = vld [vmem:[#allocation41_spill] sm:$0xff]  ;;  %v6342_v58 = vld [vmem:[#allocation42_spill] sm:$0xff] }
 0x233   :  { %3235 = vtanh.f32 %v4311_v62 }
 0x234   :  { %3237 = vtanh.f32 %v4313_v37 }
 0x240   :  { %v3236_v55 = vpop.eup %3235 }
 0x241   :  { %v3238_v51 = vpop.eup %3237  ;;  %v4317_v48 = vmul.f32 %v3236_v55, %v692_v0  ;;  %v6340_v0 = vld [vmem:[#allocation40_spill] sm:$0xff]  ;;  %v6343_v55 = vld [vmem:[#allocation43_spill] sm:$0xff] }
 0x242   :  { %v4319_v61 = vmul.f32 %v3238_v51, %v691_v47  ;;  %v6339_v47 = vld [vmem:[#allocation39_spill] sm:$0xff]  ;;  %v6344_v51 = vld [vmem:[#allocation44_spill] sm:$0xff] }
 0x243   :  { %6326 = vst [vmem:[#allocation81_spill] sm:$0xff] %v4317_v48 }
 0x244   :  { %6327 = vst [vmem:[#allocation82_spill] sm:$0xff] %v4319_v61  ;;  %774 = vmatprep.mubr.f32.mxu1 %v4319_v61  ;;  %v6352_v61 = vld [vmem:[#allocation52_spill] sm:$0xff] }
 0x245   :  { %775 = vmatmul.mubr.f32.vlgmr.msra.gmra.mxu1 %v4317_v48  ;;  %v6351_v48 = vld [vmem:[#allocation51_spill] sm:$0xff] }
 0x246   :  { %939 = vmatpush1.msra.mxu1 %v3903_v4  ;;  %v6328_v4 = vld [vmem:[#allocation28_spill] sm:$0xff] }
 0x247   :  { %940 = vmatprep.subr.mxu1 %v3905_v5  ;;  %v6329_v5 = vld [vmem:[#allocation29_spill] sm:$0xff] }
 0x248   :  { %941 = vmatpush1.msra.mxu1 %v3909_v6  ;;  %v6330_v6 = vld [vmem:[#allocation30_spill] sm:$0xff] }
 0x249   :  { %942 = vmatprep.subr.mxu1 %v3912_v8  ;;  %v6331_v8 = vld [vmem:[#allocation31_spill] sm:$0xff] }
 0x24a   :  { %943 = vmatpush1.msra.mxu1 %v3916_v9  ;;  %v6332_v9 = vld [vmem:[#allocation32_spill] sm:$0xff] }
 0x24b   :  { %944 = vmatprep.subr.mxu1 %v3920_v10 }
 0x24c   :  { %945 = vmatpush1.msra.mxu1 %v3923_v11 }
 0x24d   :  { %946 = vmatprep.subr.mxu1 %v3927_v13 }
 0x24e   :  { %947 = vmatpush1.msra.mxu1 %v3931_v14 }
 0x24f   :  { %948 = vmatprep.subr.mxu1 %v3934_v15 }
 0x250   :  { %949 = vmatpush1.msra.mxu1 %v3937_v16 }
 0x251   :  { %950 = vmatprep.subr.mxu1 %v3941_v18 }
 0x252   :  { %951 = vmatpush1.msra.mxu1 %v3945_v19 }
 0x253   :  { %952 = vmatprep.subr.mxu1 %v3948_v20 }
 0x254   :  { %953 = vmatpush1.msra.mxu1 %v3951_v21 }
 0x255   :  { %954 = vmatprep.subr.mxu1 %v3955_v23 }
 0x256   :  { %955 = vmatpush1.msra.mxu1 %v3959_v24 }
 0x257   :  { %956 = vmatprep.subr.mxu1 %v3962_v25 }
 0x258   :  { %957 = vmatpush1.msra.mxu1 %v3965_v26 }
 0x259   :  { %958 = vmatprep.subr.mxu1 %v3969_v28 }
 0x25a   :  { %959 = vmatpush1.msra.mxu1 %v3973_v29 }
 0x25b   :  { %960 = vmatprep.subr.mxu1 %v3976_v30 }
 0x25c   :  { %961 = vmatpush1.msra.mxu1 %v3979_v31 }
 0x25d   :  { %962 = vmatprep.subr.mxu1 %v3983_v33 }
 0x25e   :  { %963 = vmatpush1.msra.mxu1 %v3987_v34 }
 0x25f   :  { %964 = vmatprep.subr.mxu1 %v3990_v35 }
 0x260   :  { %965 = vmatpush1.msra.mxu1 %v3993_v36 }
 0x261   :  { %966 = vmatprep.subr.mxu1 %v3997_v38 }
 0x262   :  { %967 = vmatpush1.msra.mxu1 %v6328_v4 }
 0x263   :  { %968 = vmatprep.subr.mxu1 %v6329_v5 }
 0x264   :  { %969 = vmatpush1.msra.mxu1 %v6330_v6 }
 0x265   :  { %970 = vmatprep.subr.mxu1 %v6331_v8 }
 0x266   :  { %971 = vmatpush2.msra.mxu1 %v6332_v9 }
 0x267   :  { %972 = vmatprep.subr.mxu1 %v6333_v60 }
 0x268   :  { %973 = vmatpush2.msra.mxu1 %v6334_v17 }
 0x269   :  { %974 = vmatprep.subr.mxu1 %v6335_v32 }
 0x26a   :  { %975 = vmatpush2.msra.mxu1 %v6336_v41 }
 0x26b   :  { %976 = vmatprep.subr.mxu1 %v6337_v40 }
 0x26c   :  { %977 = vmatpush2.msra.mxu1 %v6338_v50 }
 0x26d   :  { %978 = vmatprep.subr.mxu1 %v6339_v47 }
 0x26e   :  { %979 = vmatpush2.msra.mxu1 %v6340_v0 }
 0x26f   :  { %980 = vmatprep.subr.mxu1 %v6341_v12 }
 0x270   :  { %981 = vmatpush2.msra.mxu1 %v6342_v58 }
 0x271   :  { %982 = vmatprep.subr.mxu1 %v6343_v55 }
 0x272   :  { %983 = vmatpush2.msra.mxu1 %v6344_v51 }
 0x273   :  { %984 = vmatprep.subr.mxu1 %v6345_v22 }
 0x274   :  { %985 = vmatpush2.msra.mxu1 %v6346_v7 }
 0x275   :  { %986 = vmatprep.subr.mxu1 %v6347_v1 }
 0x276   :  { %987 = vmatpush2.msra.mxu1 %v6348_v52 }
 0x277   :  { %988 = vmatprep.subr.mxu1 %v6349_v53  ;;  %v6360_v53 = vld [vmem:[#allocation60_spill] sm:$0xff] }
 0x278   :  { %989 = vmatpush2.msra.mxu1 %v6350_v43  ;;  %v6361_v43 = vld [vmem:[#allocation61_spill] sm:$0xff] }
 0x279   :  { %990 = vmatprep.subr.mxu1 %v6351_v48  ;;  %v6362_v48 = vld [vmem:[#allocation62_spill] sm:$0xff] }
 0x27a   :  { %991 = vmatpush2.msra.mxu1 %v6352_v61  ;;  %v6363_v61 = vld [vmem:[#allocation27_spill] sm:$0xff] }
 0x27b   :  { %992 = vmatprep.subr.mxu1 %v6353_v3 }
 0x27c   :  { %993 = vmatpush2.msra.mxu1 %v6354_v46 }
 0x27d   :  { %994 = vmatprep.subr.mxu1 %v6355_v39 }
 0x27e   :  { %995 = vmatpush2.msra.mxu1 %v6356_v42 }
 0x27f   :  { %996 = vmatprep.subr.mxu1 %v6357_v44 }
 0x280   :  { %997 = vmatpush2.msra.mxu1 %v6358_v49 }
 0x281   :  { %998 = vmatprep.subr.mxu1 %v6359_v54 }
 0x282   :  { %999 = vmatpush2.msra.mxu1 %v6360_v53 }
 0x283   :  { %1000 = vmatprep.subr.mxu1 %v6361_v43 }
 0x284   :  { %1001 = vmatpush2.msra.mxu1 %v6362_v48 }
 0x285   :  { %1166 = vmatprep.subr.mxu1 %v6363_v61 }
 0x305   :  { %v776_v3 = vpop.f32.mrf.mxu1 }
 0x306   :  { %v781_v46 = vadd.f32 %v776_v3, %v4265_v45 }
 0x307   :  { %v778_v39 = vpop.f32.mrf.mxu1 }
 0x308   :  { %v783_v42 = vmul.f32 %v781_v46, %v4284_v63  ;;  %v782_v44 = vadd.f32 %v778_v39, %v4269_v56 }
 0x30a   :  { %v3110_v52 = vmul.f32 -1.442695, %v783_v42  ;;  %v784_v49 = vmul.f32 %v782_v44, %v4287_v2 }
 0x30c   :  { %3239 = vpow2.f32 %v3110_v52  ;;  %v3111_v54 = vmul.f32 -1.442695, %v784_v49 }
 0x30e   :  { %3241 = vpow2.f32 %v3111_v54 }
 0x319   :  { %v3240_v53 = vpop.eup %3239 }
 0x31a   :  { %v791_v43 = vadd.f32 1.0, %v3240_v53 }
 0x31b   :  { %v3242_v1 = vpop.eup %3241 }
 0x31c   :  { %3243 = vrcp.f32 %v791_v43  ;;  %v792_v48 = vadd.f32 1.0, %v3242_v1 }
 0x31e   :  { %3245 = vrcp.f32 %v792_v48 }
 0x329   :  { %v3244_v61 = vpop.eup %3243 }
 0x32a   :  { %v797_v45 = vmul.f32 %v3244_v61, %v4284_v63 }
 0x32b   :  { %v3246_v3 = vpop.eup %3245 }
 0x32c   :  { %v799_v46 = vadd.f32 %v797_v45, %v4292_v27  ;;  %v798_v39 = vmul.f32 %v3246_v3, %v4287_v2 }
 0x32e   :  { %801 = vrot.lane.b32.xlu1 %v799_v46, %s3773_s9  ;;  %v800_v42 = vadd.f32 %v798_v39, %v4295_v59  ;;  %v4421_v39 = vld [vmem:[#allocation11 + $0xe0] sm:$0xff] }
 0x330   :  { %v809_v44 = vmul.f32 %v800_v42, %v799_v46 }
 0x332   :  { %803 = vrot.lane.b32.xlu1 %v800_v42, %s3773_s9  ;;  %v4424_v42 = vld [vmem:[#allocation11 + $0xd8] sm:$0xff] }
 0x3a0   :  { %v802_v54 = vpop.permute.xlu1 %801 }
 0x3a4   :  { %v804_v49 = vpop.permute.xlu1 %803 }
 0x3a5   :  { %v805_v56 = vsel %vm690_vm0, %v802_v54, %v804_v49  ;;  %v806_v43 = vsel %vm690_vm0, %v804_v49, %v802_v54 }
 0x3a6   :  { %v807_v53 = vmul.f32 %v805_v56, %v4311_v62  ;;  %v808_v52 = vmul.f32 %v806_v43, %v4313_v37  ;;  %v4415_v62 = vld [vmem:[#allocation11 + $0xf0] sm:$0xff]  ;;  %v4418_v37 = vld [vmem:[#allocation11 + $0xe8] sm:$0xff] }
 0x3a8   :  { %v4403_v1 = vadd.f32 %v809_v44, %v807_v53  ;;  %v4405_v48 = vadd.f32 %v809_v44, %v808_v52  ;;  %v4427_v44 = vld [vmem:[#allocation11 + $0xd0] sm:$0xff] }
 0x3aa   :  { %3247 = vtanh.f32 %v4403_v1 }
 0x3ab   :  { %3249 = vtanh.f32 %v4405_v48 }
 0x3b7   :  { %v3248_v61 = vpop.eup %3247 }
 0x3b8   :  { %v3250_v45 = vpop.eup %3249  ;;  %v4409_v3 = vmul.f32 %v3248_v61, %v806_v43 }
 0x3b9   :  { %v4411_v46 = vmul.f32 %v3250_v45, %v805_v56 }
 0x3ba   :  { %6364 = vst [vmem:[#allocation28_spill] sm:$0xff] %v4409_v3 }
 0x3bb   :  { %6365 = vst [vmem:[#allocation29_spill] sm:$0xff] %v4411_v46  ;;  %888 = vmatprep.mubr.f32.mxu0 %v4411_v46  ;;  %v4650_v46 = vld [vmem:[#allocation11 + $0x178] sm:$0xff] }
 0x3bc   :  { %889 = vmatmul.mubr.f32.vlgmr.msra.gmra.mxu0 %v4409_v3  ;;  %v4647_v3 = vld [vmem:[#allocation11 + $0x180] sm:$0xff]  ;;  %6391 = vst [vmem:[#allocation37_spill] sm:$0xff] %v4650_v46 }
 0x3bd   :  { %1053 = vmatpush1.msra.mxu0 %v4415_v62  ;;  %6390 = vst [vmem:[#allocation36_spill] sm:$0xff] %v4647_v3 }
 0x3be   :  { %1054 = vmatprep.subr.mxu0 %v4418_v37 }
 0x3bf   :  { %1055 = vmatpush1.msra.mxu0 %v4421_v39 }
 0x3c0   :  { %1056 = vmatprep.subr.mxu0 %v4424_v42 }
 0x3c1   :  { %1057 = vmatpush1.msra.mxu0 %v4427_v44 }
 0x3c2   :  { %1058 = vmatprep.subr.mxu0 %v3920_v10  ;;  %v6366_v10 = vld [vmem:[#allocation47_spill] sm:$0xff] }
 0x3c3   :  { %1059 = vmatpush1.msra.mxu0 %v3923_v11  ;;  %v6367_v11 = vld [vmem:[#allocation48_spill] sm:$0xff] }
 0x3c4   :  { %1060 = vmatprep.subr.mxu0 %v3927_v13  ;;  %v6368_v13 = vld [vmem:[#allocation49_spill] sm:$0xff] }
 0x3c5   :  { %1061 = vmatpush1.msra.mxu0 %v3931_v14  ;;  %v6369_v14 = vld [vmem:[#allocation50_spill] sm:$0xff] }
 0x3c6   :  { %1062 = vmatprep.subr.mxu0 %v3934_v15  ;;  %v6370_v15 = vld [vmem:[#allocation51_spill] sm:$0xff] }
 0x3c7   :  { %1063 = vmatpush1.msra.mxu0 %v3937_v16  ;;  %v6371_v16 = vld [vmem:[#allocation52_spill] sm:$0xff] }
 0x3c8   :  { %1064 = vmatprep.subr.mxu0 %v3941_v18  ;;  %v6372_v18 = vld [vmem:[#allocation53_spill] sm:$0xff] }
 0x3c9   :  { %1065 = vmatpush1.msra.mxu0 %v3945_v19  ;;  %v6373_v19 = vld [vmem:[#allocation54_spill] sm:$0xff] }
 0x3ca   :  { %1066 = vmatprep.subr.mxu0 %v3948_v20  ;;  %v6374_v20 = vld [vmem:[#allocation55_spill] sm:$0xff] }
 0x3cb   :  { %1067 = vmatpush1.msra.mxu0 %v3951_v21  ;;  %v6375_v21 = vld [vmem:[#allocation56_spill] sm:$0xff] }
 0x3cc   :  { %1068 = vmatprep.subr.mxu0 %v3955_v23  ;;  %v6376_v23 = vld [vmem:[#allocation57_spill] sm:$0xff] }
 0x3cd   :  { %1069 = vmatpush1.msra.mxu0 %v3959_v24  ;;  %v6377_v24 = vld [vmem:[#allocation58_spill] sm:$0xff] }
 0x3ce   :  { %1070 = vmatprep.subr.mxu0 %v3962_v25  ;;  %v6378_v25 = vld [vmem:[#allocation59_spill] sm:$0xff] }
 0x3cf   :  { %1071 = vmatpush1.msra.mxu0 %v3965_v26  ;;  %v6379_v26 = vld [vmem:[#allocation60_spill] sm:$0xff] }
 0x3d0   :  { %1072 = vmatprep.subr.mxu0 %v3969_v28  ;;  %v6380_v28 = vld [vmem:[#allocation61_spill] sm:$0xff] }
 0x3d1   :  { %1073 = vmatpush1.msra.mxu0 %v3973_v29  ;;  %v6381_v29 = vld [vmem:[#allocation62_spill] sm:$0xff] }
 0x3d2   :  { %1074 = vmatprep.subr.mxu0 %v3976_v30  ;;  %v4488_v30 = vld [vmem:[#allocation11 + $0xf8] sm:$0xff] }
 0x3d3   :  { %1075 = vmatpush1.msra.mxu0 %v3979_v31 }
 0x3d4   :  { %1076 = vmatprep.subr.mxu0 %v3983_v33  ;;  %v6382_v33 = vld [vmem:[#allocation68_spill] sm:$0xff] }
 0x3d5   :  { %1077 = vmatpush1.msra.mxu0 %v3987_v34 }
 0x3d6   :  { %1078 = vmatprep.subr.mxu0 %v3990_v35 }
 0x3d7   :  { %1079 = vmatpush1.msra.mxu0 %v3993_v36 }
 0x3d8   :  { %1080 = vmatprep.subr.mxu0 %v3997_v38  ;;  %v6383_v38 = vld [vmem:[#allocation70_spill] sm:$0xff] }
 0x3d9   :  { %1081 = vmatpush1.msra.mxu0 %v6328_v4 }
 0x3da   :  { %1082 = vmatprep.subr.mxu0 %v6329_v5 }
 0x3db   :  { %1083 = vmatpush1.msra.mxu0 %v6330_v6 }
 0x3dc   :  { %1084 = vmatprep.subr.mxu0 %v6331_v8 }
 0x3dd   :  { %1085 = vmatpush2.msra.mxu0 %v6332_v9 }
 0x3de   :  { %1086 = vmatprep.subr.mxu0 %v6333_v60 }
 0x3df   :  { %1087 = vmatpush2.msra.mxu0 %v6334_v17 }
 0x3e0   :  { %1088 = vmatprep.subr.mxu0 %v6335_v32 }
 0x3e1   :  { %1089 = vmatpush2.msra.mxu0 %v6336_v41 }
 0x3e2   :  { %1090 = vmatprep.subr.mxu0 %v6337_v40 }
 0x3e3   :  { %1091 = vmatpush2.msra.mxu0 %v6338_v50 }
 0x3e4   :  { %1092 = vmatprep.subr.mxu0 %v6339_v47 }
 0x3e5   :  { %1093 = vmatpush2.msra.mxu0 %v6340_v0 }
 0x3e6   :  { %1094 = vmatprep.subr.mxu0 %v6341_v12 }
 0x3e7   :  { %1095 = vmatpush2.msra.mxu0 %v6342_v58 }
 0x3e8   :  { %1096 = vmatprep.subr.mxu0 %v6343_v55 }
 0x3e9   :  { %1097 = vmatpush2.msra.mxu0 %v6344_v51 }
 0x3ea   :  { %1098 = vmatprep.subr.mxu0 %v6345_v22 }
 0x3eb   :  { %1099 = vmatpush2.msra.mxu0 %v6346_v7 }
 0x3ec   :  { %1100 = vmatprep.subr.mxu0 %v6366_v10  ;;  %v4530_v10 = vld [vmem:[#allocation11 + $0xb8] sm:$0xff] }
 0x3ed   :  { %1101 = vmatpush2.msra.mxu0 %v6367_v11  ;;  %v4533_v11 = vld [vmem:[#allocation11 + $0xb0] sm:$0xff] }
 0x3ee   :  { %1102 = vmatprep.subr.mxu0 %v6368_v13  ;;  %v4536_v13 = vld [vmem:[#allocation11 + $0xa8] sm:$0xff] }
 0x3ef   :  { %1103 = vmatpush2.msra.mxu0 %v6369_v14  ;;  %v4539_v14 = vld [vmem:[#allocation11 + $0xa0] sm:$0xff] }
 0x3f0   :  { %1104 = vmatprep.subr.mxu0 %v6370_v15  ;;  %v4542_v15 = vld [vmem:[#allocation11 + $0x98] sm:$0xff] }
 0x3f1   :  { %1105 = vmatpush2.msra.mxu0 %v6371_v16  ;;  %v4545_v16 = vld [vmem:[#allocation11 + $0x90] sm:$0xff] }
 0x3f2   :  { %1106 = vmatprep.subr.mxu0 %v6372_v18  ;;  %v4548_v18 = vld [vmem:[#allocation11 + $0x88] sm:$0xff] }
 0x3f3   :  { %1107 = vmatpush2.msra.mxu0 %v6373_v19  ;;  %v4551_v19 = vld [vmem:[#allocation11 + $0x80] sm:$0xff] }
 0x3f4   :  { %1108 = vmatprep.subr.mxu0 %v6374_v20 }
 0x3f5   :  { %1109 = vmatpush2.msra.mxu0 %v6375_v21 }
 0x3f6   :  { %1110 = vmatprep.subr.mxu0 %v6376_v23 }
 0x3f7   :  { %1111 = vmatpush2.msra.mxu0 %v6377_v24 }
 0x3f8   :  { %1112 = vmatprep.subr.mxu0 %v6378_v25 }
 0x3f9   :  { %1113 = vmatpush2.msra.mxu0 %v6379_v26 }
 0x3fa   :  { %1114 = vmatprep.subr.mxu0 %v6380_v28 }
 0x3fb   :  { %1115 = vmatpush2.msra.mxu0 %v6381_v29 }
 0x3fc   :  { %1280 = vmatprep.subr.mxu0 %v4488_v30 }
 0x47c   :  { %v890_v31 = vpop.f32.mrf.mxu0 }
 0x47d   :  { %v895_v34 = vadd.f32 %v890_v31, %v6382_v33  ;;  %v4554_v31 = vld [vmem:[#allocation11 + $0x78] sm:$0xff]  ;;  %v4557_v33 = vld [vmem:[#allocation11 + $0x70] sm:$0xff] }
 0x47e   :  { %v892_v35 = vpop.f32.mrf.mxu0 }
 0x47f   :  { %v897_v36 = vmul.f32 %v895_v34, %v4284_v63  ;;  %v896_v7 = vadd.f32 %v892_v35, %v6383_v38  ;;  %v4560_v34 = vld [vmem:[#allocation11 + $0x68] sm:$0xff]  ;;  %v4563_v35 = vld [vmem:[#allocation11 + $0x60] sm:$0xff]  ;;  %v4569_v38 = vld [vmem:[#allocation11 + $0x50] sm:$0xff] }
 0x481   :  { %v3112_v22 = vmul.f32 -1.442695, %v897_v36  ;;  %v898_v4 = vmul.f32 %v896_v7, %v4287_v2  ;;  %v4566_v36 = vld [vmem:[#allocation11 + $0x58] sm:$0xff]  ;;  %v4572_v7 = vld [vmem:[#allocation11 + $0x48] sm:$0xff] }
 0x483   :  { %3251 = vpow2.f32 %v3112_v22  ;;  %v3113_v5 = vmul.f32 -1.442695, %v898_v4  ;;  %v4575_v22 = vld [vmem:[#allocation11 + $0x40] sm:$0xff]  ;;  %v4578_v4 = vld [vmem:[#allocation11 + $0x38] sm:$0xff] }
 0x485   :  { %3253 = vpow2.f32 %v3113_v5  ;;  %v4581_v5 = vld [vmem:[#allocation11 + $0x30] sm:$0xff] }
 0x490   :  { %v3252_v6 = vpop.eup %3251 }
 0x491   :  { %v905_v8 = vadd.f32 1.0, %v3252_v6  ;;  %v4584_v6 = vld [vmem:[#allocation11 + $0x28] sm:$0xff] }
 0x492   :  { %v3254_v9 = vpop.eup %3253 }
 0x493   :  { %3255 = vrcp.f32 %v905_v8  ;;  %v906_v60 = vadd.f32 1.0, %v3254_v9  ;;  %v4587_v8 = vld [vmem:[#allocation11 + $0x20] sm:$0xff]  ;;  %v4590_v9 = vld [vmem:[#allocation11 + $0x18] sm:$0xff] }
 0x495   :  { %3257 = vrcp.f32 %v906_v60  ;;  %v4593_v60 = vld [vmem:[#allocation11 + $0x10] sm:$0xff] }
 0x4a0   :  { %v3256_v17 = vpop.eup %3255 }
 0x4a1   :  { %v911_v32 = vmul.f32 %v3256_v17, %v4284_v63  ;;  %v4596_v17 = vld [vmem:[#allocation11 + $0x8] sm:$0xff] }
 0x4a2   :  { %v3258_v41 = vpop.eup %3257 }
 0x4a3   :  { %v913_v40 = vadd.f32 %v911_v32, %v4292_v27  ;;  %v912_v50 = vmul.f32 %v3258_v41, %v4287_v2  ;;  %v4599_v32 = vld [vmem:[#allocation11] sm:$0xff]  ;;  %v4602_v41 = vld [vmem:[#allocation11 + $0x1f8] sm:$0xff] }
 0x4a5   :  { %915 = vrot.lane.b32.xlu0 %v913_v40, %s3773_s9  ;;  %v914_v47 = vadd.f32 %v912_v50, %v4295_v59  ;;  %v4608_v50 = vld [vmem:[#allocation11 + $0x1e8] sm:$0xff] }
 0x4a7   :  { %917 = vrot.lane.b32.xlu1 %v914_v47, %s3773_s9  ;;  %v923_v0 = vmul.f32 %v914_v47, %v913_v40  ;;  %v4605_v40 = vld [vmem:[#allocation11 + $0x1f0] sm:$0xff]  ;;  %v4611_v47 = vld [vmem:[#allocation11 + $0x1e0] sm:$0xff] }
 0x517   :  { %v916_v12 = vpop.permute.xlu0 %915 }
 0x519   :  { %v918_v58 = vpop.permute.xlu1 %917 }
 0x51a   :  { %v919_v55 = vsel %vm690_vm0, %v916_v12, %v918_v58  ;;  %v920_v51 = vsel %vm690_vm0, %v918_v58, %v916_v12  ;;  %v4617_v12 = vld [vmem:[#allocation11 + $0x1d0] sm:$0xff]  ;;  %v4620_v58 = vld [vmem:[#allocation11 + $0x1c8] sm:$0xff] }
 0x51b   :  { %v921_v54 = vmul.f32 %v919_v55, %v4403_v1  ;;  %v922_v49 = vmul.f32 %v920_v51, %v4405_v48  ;;  %v4524_v1 = vld [vmem:[#allocation11 + $0xc8] sm:$0xff]  ;;  %v4527_v48 = vld [vmem:[#allocation11 + $0xc0] sm:$0xff] }
 0x51d   :  { %v4507_v56 = vadd.f32 %v923_v0, %v921_v54  ;;  %v4509_v43 = vadd.f32 %v923_v0, %v922_v49  ;;  %v4614_v0 = vld [vmem:[#allocation11 + $0x1d8] sm:$0xff]  ;;  %v4629_v54 = vld [vmem:[#allocation11 + $0x1b0] sm:$0xff]  ;;  %v4632_v49 = vld [vmem:[#allocation11 + $0x1a8] sm:$0xff] }
 0x51f   :  { %3259 = vtanh.f32 %v4507_v56 }
 0x520   :  { %3261 = vtanh.f32 %v4509_v43 }
 0x52c   :  { %v3260_v53 = vpop.eup %3259 }
 0x52d   :  { %v3262_v52 = vpop.eup %3261  ;;  %v4513_v61 = vmul.f32 %v3260_v53, %v920_v51  ;;  %v4626_v51 = vld [vmem:[#allocation11 + $0x1b8] sm:$0xff]  ;;  %v4635_v53 = vld [vmem:[#allocation11 + $0x1a0] sm:$0xff] }
 0x52e   :  { %v4515_v45 = vmul.f32 %v3262_v52, %v919_v55  ;;  %v4623_v55 = vld [vmem:[#allocation11 + $0x1c0] sm:$0xff]  ;;  %6386 = vst [vmem:[#allocation32_spill] sm:$0xff] %v4635_v53  ;;  %v4638_v52 = vld [vmem:[#allocation11 + $0x198] sm:$0xff] }
 0x52f   :  { %6384 = vst [vmem:[#allocation30_spill] sm:$0xff] %v4513_v61  ;;  %6387 = vst [vmem:[#allocation33_spill] sm:$0xff] %v4638_v52 }
 0x530   :  { %6385 = vst [vmem:[#allocation31_spill] sm:$0xff] %v4515_v45  ;;  %1002 = vmatprep.mubr.f32.mxu1 %v4515_v45  ;;  %v4644_v45 = vld [vmem:[#allocation11 + $0x188] sm:$0xff] }
 0x531   :  { %1003 = vmatmul.mubr.f32.vlgmr.msra.gmra.mxu1 %v4513_v61  ;;  %v4641_v61 = vld [vmem:[#allocation11 + $0x190] sm:$0xff]  ;;  %6389 = vst [vmem:[#allocation35_spill] sm:$0xff] %v4644_v45 }
 0x532   :  { %1167 = vmatpush1.msra.mxu1 %v4415_v62  ;;  %6388 = vst [vmem:[#allocation34_spill] sm:$0xff] %v4641_v61 }
 0x533   :  { %1168 = vmatprep.subr.mxu1 %v4418_v37 }
 0x534   :  { %1169 = vmatpush1.msra.mxu1 %v4421_v39 }
 0x535   :  { %1170 = vmatprep.subr.mxu1 %v4424_v42 }
 0x536   :  { %1171 = vmatpush1.msra.mxu1 %v4427_v44 }
 0x537   :  { %1172 = vmatprep.subr.mxu1 %v4524_v1 }
 0x538   :  { %1173 = vmatpush1.msra.mxu1 %v4527_v48 }
 0x539   :  { %1174 = vmatprep.subr.mxu1 %v4530_v10 }
 0x53a   :  { %1175 = vmatpush1.msra.mxu1 %v4533_v11 }
 0x53b   :  { %1176 = vmatprep.subr.mxu1 %v4536_v13 }
 0x53c   :  { %1177 = vmatpush1.msra.mxu1 %v4539_v14 }
 0x53d   :  { %1178 = vmatprep.subr.mxu1 %v4542_v15 }
 0x53e   :  { %1179 = vmatpush1.msra.mxu1 %v4545_v16 }
 0x53f   :  { %1180 = vmatprep.subr.mxu1 %v4548_v18 }
 0x540   :  { %1181 = vmatpush1.msra.mxu1 %v4551_v19 }
 0x541   :  { %1182 = vmatprep.subr.mxu1 %v4554_v31 }
 0x542   :  { %1183 = vmatpush1.msra.mxu1 %v4557_v33 }
 0x543   :  { %1184 = vmatprep.subr.mxu1 %v4560_v34 }
 0x544   :  { %1185 = vmatpush1.msra.mxu1 %v4563_v35 }
 0x545   :  { %1186 = vmatprep.subr.mxu1 %v4566_v36 }
 0x546   :  { %1187 = vmatpush1.msra.mxu1 %v4569_v38 }
 0x547   :  { %1188 = vmatprep.subr.mxu1 %v4572_v7 }
 0x548   :  { %1189 = vmatpush1.msra.mxu1 %v4575_v22 }
 0x549   :  { %1190 = vmatprep.subr.mxu1 %v4578_v4 }
 0x54a   :  { %1191 = vmatpush1.msra.mxu1 %v4581_v5 }
 0x54b   :  { %1192 = vmatprep.subr.mxu1 %v4584_v6 }
 0x54c   :  { %1193 = vmatpush1.msra.mxu1 %v4587_v8 }
 0x54d   :  { %1194 = vmatprep.subr.mxu1 %v4590_v9 }
 0x54e   :  { %1195 = vmatpush1.msra.mxu1 %v4593_v60 }
 0x54f   :  { %1196 = vmatprep.subr.mxu1 %v4596_v17 }
 0x550   :  { %1197 = vmatpush1.msra.mxu1 %v4599_v32 }
 0x551   :  { %1198 = vmatprep.subr.mxu1 %v4602_v41 }
 0x552   :  { %1199 = vmatpush2.msra.mxu1 %v4605_v40 }
 0x553   :  { %1200 = vmatprep.subr.mxu1 %v4608_v50 }
 0x554   :  { %1201 = vmatpush2.msra.mxu1 %v4611_v47 }
 0x555   :  { %1202 = vmatprep.subr.mxu1 %v4614_v0 }
 0x556   :  { %1203 = vmatpush2.msra.mxu1 %v4617_v12 }
 0x557   :  { %1204 = vmatprep.subr.mxu1 %v4620_v58 }
 0x558   :  { %1205 = vmatpush2.msra.mxu1 %v4623_v55 }
 0x559   :  { %1206 = vmatprep.subr.mxu1 %v4626_v51 }
 0x55a   :  { %1207 = vmatpush2.msra.mxu1 %v4629_v54 }
 0x55b   :  { %1208 = vmatprep.subr.mxu1 %v4632_v49 }
 0x55c   :  { %1209 = vmatpush2.msra.mxu1 %v4635_v53  ;;  %v4653_v53 = vld [vmem:[#allocation11 + $0x170] sm:$0xff] }
 0x55d   :  { %1210 = vmatprep.subr.mxu1 %v4638_v52  ;;  %6392 = vst [vmem:[#allocation38_spill] sm:$0xff] %v4653_v53  ;;  %v4656_v52 = vld [vmem:[#allocation11 + $0x168] sm:$0xff] }
 0x55e   :  { %1211 = vmatpush2.msra.mxu1 %v4641_v61  ;;  %6393 = vst [vmem:[#allocation39_spill] sm:$0xff] %v4656_v52  ;;  %v4659_v61 = vld [vmem:[#allocation11 + $0x160] sm:$0xff] }
 0x55f   :  { %1212 = vmatprep.subr.mxu1 %v4644_v45  ;;  %6394 = vst [vmem:[#allocation40_spill] sm:$0xff] %v4659_v61  ;;  %v4662_v45 = vld [vmem:[#allocation11 + $0x158] sm:$0xff] }
 0x560   :  { %1213 = vmatpush2.msra.mxu1 %v4647_v3  ;;  %6395 = vst [vmem:[#allocation41_spill] sm:$0xff] %v4662_v45  ;;  %v4665_v3 = vld [vmem:[#allocation11 + $0x150] sm:$0xff] }
 0x561   :  { %1214 = vmatprep.subr.mxu1 %v4650_v46  ;;  %6396 = vst [vmem:[#allocation42_spill] sm:$0xff] %v4665_v3  ;;  %v4668_v46 = vld [vmem:[#allocation11 + $0x148] sm:$0xff] }
 0x562   :  { %1215 = vmatpush2.msra.mxu1 %v4653_v53  ;;  %6397 = vst [vmem:[#allocation43_spill] sm:$0xff] %v4668_v46  ;;  %v4671_v53 = vld [vmem:[#allocation11 + $0x140] sm:$0xff] }
 0x563   :  { %1216 = vmatprep.subr.mxu1 %v4656_v52  ;;  %6398 = vst [vmem:[#allocation44_spill] sm:$0xff] %v4671_v53 }
 0x564   :  { %1217 = vmatpush2.msra.mxu1 %v4659_v61 }
 0x565   :  { %1218 = vmatprep.subr.mxu1 %v4662_v45  ;;  %v6400_v45 = vld [vmem:[#allocation66_spill] sm:$0xff] }
 0x566   :  { %1219 = vmatpush2.msra.mxu1 %v4665_v3 }
 0x567   :  { %1220 = vmatprep.subr.mxu1 %v4668_v46 }
 0x568   :  { %1221 = vmatpush2.msra.mxu1 %v4671_v53  ;;  %v6399_v53 = vld [vmem:[#allocation65_spill] sm:$0xff] }
 0x569   :  { %1222 = vmatprep.subr.mxu1 %v6374_v20 }
 0x56a   :  { %1223 = vmatpush2.msra.mxu1 %v6375_v21 }
 0x56b   :  { %1224 = vmatprep.subr.mxu1 %v6376_v23 }
 0x56c   :  { %1225 = vmatpush2.msra.mxu1 %v6377_v24 }
 0x56d   :  { %1226 = vmatprep.subr.mxu1 %v6378_v25 }
 0x56e   :  { %1227 = vmatpush2.msra.mxu1 %v6379_v26 }
 0x56f   :  { %1228 = vmatprep.subr.mxu1 %v6380_v28 }
 0x570   :  { %1229 = vmatpush2.msra.mxu1 %v6381_v29 }
 0x571   :  { %1394 = vmatprep.subr.mxu1 %v4488_v30 }
 0x5f1   :  { %v1004_v46 = vpop.f32.mrf.mxu1 }
 0x5f2   :  { %v1009_v3 = vadd.f32 %v1004_v46, %v6399_v53 }
 0x5f3   :  { %v1006_v20 = vpop.f32.mrf.mxu1 }
 0x5f4   :  { %v1011_v21 = vmul.f32 %v1009_v3, %v4284_v63  ;;  %v1010_v23 = vadd.f32 %v1006_v20, %v6400_v45 }
 0x5f6   :  { %v3114_v61 = vmul.f32 -1.442695, %v1011_v21  ;;  %v1012_v24 = vmul.f32 %v1010_v23, %v4287_v2 }
 0x5f8   :  { %3263 = vpow2.f32 %v3114_v61  ;;  %v3115_v25 = vmul.f32 -1.442695, %v1012_v24 }
 0x5fa   :  { %3265 = vpow2.f32 %v3115_v25 }
 0x605   :  { %v3264_v26 = vpop.eup %3263 }
 0x606   :  { %v1019_v28 = vadd.f32 1.0, %v3264_v26 }
 0x607   :  { %v3266_v52 = vpop.eup %3265 }
 0x608   :  { %3267 = vrcp.f32 %v1019_v28  ;;  %v1020_v29 = vadd.f32 1.0, %v3266_v52 }
 0x60a   :  { %3269 = vrcp.f32 %v1020_v29 }
 0x615   :  { %v3268_v30 = vpop.eup %3267 }
 0x616   :  { %v1025_v46 = vmul.f32 %v3268_v30, %v4284_v63 }
 0x617   :  { %v3270_v53 = vpop.eup %3269 }
 0x618   :  { %v1027_v3 = vadd.f32 %v1025_v46, %v4292_v27  ;;  %v1026_v45 = vmul.f32 %v3270_v53, %v4287_v2 }
 0x61a   :  { %1029 = vrot.lane.b32.xlu0 %v1027_v3, %s3773_s9  ;;  %v1028_v61 = vadd.f32 %v1026_v45, %v4295_v59  ;;  %v6405_v45 = vld [vmem:[#allocation34_spill] sm:$0xff] }
 0x61c   :  { %1031 = vrot.lane.b32.xlu1 %v1028_v61, %s3773_s9  ;;  %v1037_v20 = vmul.f32 %v1028_v61, %v1027_v3  ;;  %v6406_v61 = vld [vmem:[#allocation35_spill] sm:$0xff] }
 0x68c   :  { %v1030_v21 = vpop.permute.xlu0 %1029 }
 0x68e   :  { %v1032_v23 = vpop.permute.xlu1 %1031 }
 0x68f   :  { %v1033_v52 = vsel %vm690_vm0, %v1030_v21, %v1032_v23  ;;  %v1034_v24 = vsel %vm690_vm0, %v1032_v23, %v1030_v21  ;;  %v6408_v21 = vld [vmem:[#allocation37_spill] sm:$0xff]  ;;  %v6409_v23 = vld [vmem:[#allocation38_spill] sm:$0xff] }
 0x690   :  { %v1035_v25 = vmul.f32 %v1033_v52, %v4507_v56  ;;  %v1036_v26 = vmul.f32 %v1034_v24, %v4509_v43  ;;  %v6403_v56 = vld [vmem:[#allocation32_spill] sm:$0xff]  ;;  %v6404_v43 = vld [vmem:[#allocation33_spill] sm:$0xff] }
 0x692   :  { %v4699_v28 = vadd.f32 %v1037_v20, %v1035_v25  ;;  %v4701_v29 = vadd.f32 %v1037_v20, %v1036_v26  ;;  %v6407_v20 = vld [vmem:[#allocation36_spill] sm:$0xff]  ;;  %v6412_v25 = vld [vmem:[#allocation41_spill] sm:$0xff]  ;;  %v6413_v26 = vld [vmem:[#allocation42_spill] sm:$0xff] }
 0x694   :  { %3271 = vtanh.f32 %v4699_v28 }
 0x695   :  { %3273 = vtanh.f32 %v4701_v29 }
 0x6a1   :  { %v3272_v30 = vpop.eup %3271 }
 0x6a2   :  { %v3274_v46 = vpop.eup %3273  ;;  %v4705_v53 = vmul.f32 %v3272_v30, %v1034_v24  ;;  %v6411_v24 = vld [vmem:[#allocation40_spill] sm:$0xff]  ;;  %v6414_v30 = vld [vmem:[#allocation43_spill] sm:$0xff] }
 0x6a3   :  { %v4707_v3 = vmul.f32 %v3274_v46, %v1033_v52  ;;  %v6410_v52 = vld [vmem:[#allocation39_spill] sm:$0xff]  ;;  %v6415_v46 = vld [vmem:[#allocation44_spill] sm:$0xff] }
 0x6a4   :  { %6401 = vst [vmem:[#allocation45_spill] sm:$0xff] %v4705_v53 }
 0x6a5   :  { %6402 = vst [vmem:[#allocation46_spill] sm:$0xff] %v4707_v3  ;;  %1116 = vmatprep.mubr.f32.mxu0 %v4707_v3  ;;  %v4769_v3 = vld [vmem:[#allocation11 + $0x130] sm:$0xff] }
 0x6a6   :  { %1117 = vmatmul.mubr.f32.vlgmr.msra.gmra.mxu0 %v4705_v53  ;;  %v4766_v53 = vld [vmem:[#allocation11 + $0x138] sm:$0xff]  ;;  %6417 = vst [vmem:[#allocation47_spill] sm:$0xff] %v4769_v3 }
 0x6a7   :  { %1281 = vmatpush1.msra.mxu0 %v4415_v62  ;;  %6416 = vst [vmem:[#allocation27_spill] sm:$0xff] %v4766_v53 }
 0x6a8   :  { %1282 = vmatprep.subr.mxu0 %v4418_v37 }
 0x6a9   :  { %1283 = vmatpush1.msra.mxu0 %v4421_v39 }
 0x6aa   :  { %1284 = vmatprep.subr.mxu0 %v4424_v42 }
 0x6ab   :  { %1285 = vmatpush1.msra.mxu0 %v4427_v44 }
 0x6ac   :  { %1286 = vmatprep.subr.mxu0 %v4524_v1 }
 0x6ad   :  { %1287 = vmatpush1.msra.mxu0 %v4527_v48 }
 0x6ae   :  { %1288 = vmatprep.subr.mxu0 %v4530_v10 }
 0x6af   :  { %1289 = vmatpush1.msra.mxu0 %v4533_v11 }
 0x6b0   :  { %1290 = vmatprep.subr.mxu0 %v4536_v13 }
 0x6b1   :  { %1291 = vmatpush1.msra.mxu0 %v4539_v14 }
 0x6b2   :  { %1292 = vmatprep.subr.mxu0 %v4542_v15 }
 0x6b3   :  { %1293 = vmatpush1.msra.mxu0 %v4545_v16 }
 0x6b4   :  { %1294 = vmatprep.subr.mxu0 %v4548_v18 }
 0x6b5   :  { %1295 = vmatpush1.msra.mxu0 %v4551_v19 }
 0x6b6   :  { %1296 = vmatprep.subr.mxu0 %v4554_v31 }
 0x6b7   :  { %1297 = vmatpush1.msra.mxu0 %v4557_v33 }
 0x6b8   :  { %1298 = vmatprep.subr.mxu0 %v4560_v34 }
 0x6b9   :  { %1299 = vmatpush1.msra.mxu0 %v4563_v35 }
 0x6ba   :  { %1300 = vmatprep.subr.mxu0 %v4566_v36 }
 0x6bb   :  { %1301 = vmatpush1.msra.mxu0 %v4569_v38 }
 0x6bc   :  { %1302 = vmatprep.subr.mxu0 %v4572_v7 }
 0x6bd   :  { %1303 = vmatpush1.msra.mxu0 %v4575_v22 }
 0x6be   :  { %1304 = vmatprep.subr.mxu0 %v4578_v4 }
 0x6bf   :  { %1305 = vmatpush1.msra.mxu0 %v4581_v5 }
 0x6c0   :  { %1306 = vmatprep.subr.mxu0 %v4584_v6 }
 0x6c1   :  { %1307 = vmatpush1.msra.mxu0 %v4587_v8 }
 0x6c2   :  { %1308 = vmatprep.subr.mxu0 %v4590_v9 }
 0x6c3   :  { %1309 = vmatpush1.msra.mxu0 %v4593_v60 }
 0x6c4   :  { %1310 = vmatprep.subr.mxu0 %v4596_v17 }
 0x6c5   :  { %1311 = vmatpush1.msra.mxu0 %v4599_v32 }
 0x6c6   :  { %1312 = vmatprep.subr.mxu0 %v4602_v41 }
 0x6c7   :  { %1313 = vmatpush2.msra.mxu0 %v4605_v40 }
 0x6c8   :  { %1314 = vmatprep.subr.mxu0 %v4608_v50 }
 0x6c9   :  { %1315 = vmatpush2.msra.mxu0 %v4611_v47 }
 0x6ca   :  { %1316 = vmatprep.subr.mxu0 %v4614_v0 }
 0x6cb   :  { %1317 = vmatpush2.msra.mxu0 %v4617_v12 }
 0x6cc   :  { %1318 = vmatprep.subr.mxu0 %v4620_v58 }
 0x6cd   :  { %1319 = vmatpush2.msra.mxu0 %v4623_v55 }
 0x6ce   :  { %1320 = vmatprep.subr.mxu0 %v4626_v51 }
 0x6cf   :  { %1321 = vmatpush2.msra.mxu0 %v4629_v54 }
 0x6d0   :  { %1322 = vmatprep.subr.mxu0 %v4632_v49 }
 0x6d1   :  { %1323 = vmatpush2.msra.mxu0 %v6403_v56 }
 0x6d2   :  { %1324 = vmatprep.subr.mxu0 %v6404_v43 }
 0x6d3   :  { %1325 = vmatpush2.msra.mxu0 %v6405_v45 }
 0x6d4   :  { %1326 = vmatprep.subr.mxu0 %v6406_v61 }
 0x6d5   :  { %1327 = vmatpush2.msra.mxu0 %v6407_v20 }
 0x6d6   :  { %1328 = vmatprep.subr.mxu0 %v6408_v21  ;;  %v6425_v21 = vld [vmem:[#allocation69_spill] sm:$0xff] }
 0x6d7   :  { %1329 = vmatpush2.msra.mxu0 %v6409_v23  ;;  %v4772_v23 = vld [vmem:[#allocation11 + $0x128] sm:$0xff] }
 0x6d8   :  { %1330 = vmatprep.subr.mxu0 %v6410_v52  ;;  %6418 = vst [vmem:[#allocation48_spill] sm:$0xff] %v4772_v23 }
 0x6d9   :  { %1331 = vmatpush2.msra.mxu0 %v6411_v24  ;;  %v4775_v24 = vld [vmem:[#allocation11 + $0x120] sm:$0xff] }
 0x6da   :  { %1332 = vmatprep.subr.mxu0 %v6412_v25  ;;  %6419 = vst [vmem:[#allocation49_spill] sm:$0xff] %v4775_v24 }
 0x6db   :  { %1333 = vmatpush2.msra.mxu0 %v6413_v26  ;;  %v4778_v26 = vld [vmem:[#allocation11 + $0x118] sm:$0xff] }
 0x6dc   :  { %1334 = vmatprep.subr.mxu0 %v6414_v30  ;;  %6420 = vst [vmem:[#allocation50_spill] sm:$0xff] %v4778_v26  ;;  %v6424_v30 = vld [vmem:[#allocation67_spill] sm:$0xff] }
 0x6dd   :  { %1335 = vmatpush2.msra.mxu0 %v6415_v46  ;;  %v4781_v46 = vld [vmem:[#allocation11 + $0x110] sm:$0xff] }
 0x6de   :  { %1336 = vmatprep.subr.mxu0 %v4766_v53  ;;  %6421 = vst [vmem:[#allocation51_spill] sm:$0xff] %v4781_v46  ;;  %v4784_v53 = vld [vmem:[#allocation11 + $0x108] sm:$0xff] }
 0x6df   :  { %1337 = vmatpush2.msra.mxu0 %v4769_v3  ;;  %6422 = vst [vmem:[#allocation52_spill] sm:$0xff] %v4784_v53  ;;  %v4787_v3 = vld [vmem:[#allocation11 + $0x100] sm:$0xff] }
 0x6e0   :  { %1338 = vmatprep.subr.mxu0 %v4772_v23  ;;  %6423 = vst [vmem:[#allocation53_spill] sm:$0xff] %v4787_v3 }
 0x6e1   :  { %1339 = vmatpush2.msra.mxu0 %v4775_v24 }
 0x6e2   :  { %1340 = vmatprep.subr.mxu0 %v4778_v26 }
 0x6e3   :  { %1341 = vmatpush2.msra.mxu0 %v4781_v46 }
 0x6e4   :  { %1342 = vmatprep.subr.mxu0 %v4784_v53 }
 0x6e5   :  { %1343 = vmatpush2.msra.mxu0 %v4787_v3 }
 0x766   :  { %v1118_v23 = vpop.f32.mrf.mxu0 }
 0x767   :  { %v1123_v25 = vadd.f32 %v1118_v23, %v6424_v30 }
 0x768   :  { %v1120_v24 = vpop.f32.mrf.mxu0 }
 0x769   :  { %v1125_v52 = vmul.f32 %v1123_v25, %v4284_v63  ;;  %v1124_v26 = vadd.f32 %v1120_v24, %v6425_v21 }
 0x76b   :  { %v3116_v20 = vmul.f32 -1.442695, %v1125_v52  ;;  %v1126_v61 = vmul.f32 %v1124_v26, %v4287_v2 }
 0x76d   :  { %3275 = vpow2.f32 %v3116_v20  ;;  %v3117_v46 = vmul.f32 -1.442695, %v1126_v61 }
 0x76f   :  { %3277 = vpow2.f32 %v3117_v46 }
 0x77a   :  { %v3276_v45 = vpop.eup %3275 }
 0x77b   :  { %v1133_v53 = vadd.f32 1.0, %v3276_v45 }
 0x77c   :  { %v3278_v43 = vpop.eup %3277 }
 0x77d   :  { %3279 = vrcp.f32 %v1133_v53  ;;  %v1134_v56 = vadd.f32 1.0, %v3278_v43 }
 0x77f   :  { %3281 = vrcp.f32 %v1134_v56 }
 0x78a   :  { %v3280_v3 = vpop.eup %3279 }
 0x78b   :  { %v1139_v23 = vmul.f32 %v3280_v3, %v4284_v63 }
 0x78c   :  { %v3282_v30 = vpop.eup %3281 }
 0x78d   :  { %v1141_v25 = vadd.f32 %v1139_v23, %v4292_v27  ;;  %v1140_v21 = vmul.f32 %v3282_v30, %v4287_v2 }
 0x78f   :  { %1143 = vrot.lane.b32.xlu0 %v1141_v25, %s3773_s9  ;;  %v1142_v20 = vadd.f32 %v1140_v21, %v4295_v59 }
 0x791   :  { %1145 = vrot.lane.b32.xlu1 %v1142_v20, %s3773_s9  ;;  %v1151_v61 = vmul.f32 %v1142_v20, %v1141_v25 }
 0x801   :  { %v1144_v45 = vpop.permute.xlu0 %1143 }
 0x803   :  { %v1146_v52 = vpop.permute.xlu1 %1145 }
 0x804   :  { %v1147_v53 = vsel %vm690_vm0, %v1144_v45, %v1146_v52  ;;  %v1148_v3 = vsel %vm690_vm0, %v1146_v52, %v1144_v45 }
 0x805   :  { %v1149_v56 = vmul.f32 %v1147_v53, %v4699_v28  ;;  %v1150_v43 = vmul.f32 %v1148_v3, %v4701_v29  ;;  %v1549_v28 = vld [vmem:[#allocation13 + $0xf8] sm:$0xff] }
 0x806   :  { %1594 = vmatprep.subr.mxu0 %v1549_v28  ;;  %v1569_v28 = vld [vmem:[#allocation13 + $0x198] sm:$0xff] }
 0x807   :  { %v4806_v24 = vadd.f32 %v1151_v61, %v1149_v56  ;;  %v4808_v26 = vadd.f32 %v1151_v61, %v1150_v43 }
 0x809   :  { %3283 = vtanh.f32 %v4806_v24 }
 0x80a   :  { %3285 = vtanh.f32 %v4808_v26 }
 0x816   :  { %v3284_v46 = vpop.eup %3283 }
 0x817   :  { %v3286_v23 = vpop.eup %3285  ;;  %v4812_v30 = vmul.f32 %v3284_v46, %v1148_v3 }
 0x818   :  { %v4814_v25 = vmul.f32 %v3286_v23, %v1147_v53 }
 0x81a   :  { %1230 = vmatprep.mubr.f32.mxu1 %v4814_v25 }
 0x81b   :  { %1231 = vmatmul.mubr.f32.vlgmr.msra.gmra.mxu1 %v4812_v30 }
 0x81c   :  { %1395 = vmatpush1.msra.mxu1 %v4415_v62  ;;  %v6426_v62 = vld [vmem:[#allocation32_spill] sm:$0xff] }
 0x81d   :  { %1396 = vmatprep.subr.mxu1 %v4418_v37  ;;  %v6427_v37 = vld [vmem:[#allocation33_spill] sm:$0xff] }
 0x81e   :  { %1397 = vmatpush1.msra.mxu1 %v4421_v39  ;;  %v6428_v39 = vld [vmem:[#allocation34_spill] sm:$0xff] }
 0x81f   :  { %1398 = vmatprep.subr.mxu1 %v4424_v42  ;;  %v6429_v42 = vld [vmem:[#allocation35_spill] sm:$0xff] }
 0x820   :  { %1399 = vmatpush1.msra.mxu1 %v4427_v44  ;;  %v6430_v44 = vld [vmem:[#allocation36_spill] sm:$0xff] }
 0x821   :  { %1400 = vmatprep.subr.mxu1 %v4524_v1  ;;  %v6431_v1 = vld [vmem:[#allocation37_spill] sm:$0xff] }
 0x822   :  { %1401 = vmatpush1.msra.mxu1 %v4527_v48  ;;  %v6432_v48 = vld [vmem:[#allocation38_spill] sm:$0xff] }
 0x823   :  { %1402 = vmatprep.subr.mxu1 %v4530_v10  ;;  %v6433_v10 = vld [vmem:[#allocation39_spill] sm:$0xff] }
 0x824   :  { %1403 = vmatpush1.msra.mxu1 %v4533_v11  ;;  %v6434_v11 = vld [vmem:[#allocation40_spill] sm:$0xff] }
 0x825   :  { %1404 = vmatprep.subr.mxu1 %v4536_v13  ;;  %v6435_v13 = vld [vmem:[#allocation41_spill] sm:$0xff] }
 0x826   :  { %1405 = vmatpush1.msra.mxu1 %v4539_v14  ;;  %v6436_v14 = vld [vmem:[#allocation42_spill] sm:$0xff] }
 0x827   :  { %1406 = vmatprep.subr.mxu1 %v4542_v15  ;;  %v6437_v15 = vld [vmem:[#allocation43_spill] sm:$0xff] }
 0x828   :  { %1407 = vmatpush1.msra.mxu1 %v4545_v16  ;;  %v6438_v16 = vld [vmem:[#allocation44_spill] sm:$0xff] }
 0x829   :  { %1408 = vmatprep.subr.mxu1 %v4548_v18  ;;  %v6439_v18 = vld [vmem:[#allocation27_spill] sm:$0xff] }
 0x82a   :  { %1409 = vmatpush1.msra.mxu1 %v4551_v19  ;;  %v6440_v19 = vld [vmem:[#allocation47_spill] sm:$0xff] }
 0x82b   :  { %1410 = vmatprep.subr.mxu1 %v4554_v31  ;;  %v6441_v31 = vld [vmem:[#allocation48_spill] sm:$0xff] }
 0x82c   :  { %1411 = vmatpush1.msra.mxu1 %v4557_v33  ;;  %v6442_v33 = vld [vmem:[#allocation49_spill] sm:$0xff] }
 0x82d   :  { %1412 = vmatprep.subr.mxu1 %v4560_v34  ;;  %v6443_v34 = vld [vmem:[#allocation50_spill] sm:$0xff] }
 0x82e   :  { %1413 = vmatpush1.msra.mxu1 %v4563_v35  ;;  %v6444_v35 = vld [vmem:[#allocation51_spill] sm:$0xff] }
 0x82f   :  { %1414 = vmatprep.subr.mxu1 %v4566_v36  ;;  %v6445_v36 = vld [vmem:[#allocation52_spill] sm:$0xff] }
 0x830   :  { %1415 = vmatpush1.msra.mxu1 %v4569_v38  ;;  %v6446_v38 = vld [vmem:[#allocation53_spill] sm:$0xff] }
 0x831   :  { %1416 = vmatprep.subr.mxu1 %v4572_v7 }
 0x832   :  { %1417 = vmatpush1.msra.mxu1 %v4575_v22  ;;  %v6447_v22 = vld [vmem:[#allocation71_spill] sm:$0xff] }
 0x833   :  { %1418 = vmatprep.subr.mxu1 %v4578_v4 }
 0x834   :  { %1419 = vmatpush1.msra.mxu1 %v4581_v5 }
 0x835   :  { %1420 = vmatprep.subr.mxu1 %v4584_v6 }
 0x836   :  { %1421 = vmatpush1.msra.mxu1 %v4587_v8  ;;  %v6448_v8 = vld [vmem:[#allocation72_spill] sm:$0xff] }
 0x837   :  { %1422 = vmatprep.subr.mxu1 %v4590_v9 }
 0x838   :  { %1423 = vmatpush1.msra.mxu1 %v4593_v60 }
 0x839   :  { %1424 = vmatprep.subr.mxu1 %v4596_v17 }
 0x83a   :  { %1425 = vmatpush1.msra.mxu1 %v4599_v32 }
 0x83b   :  { %1426 = vmatprep.subr.mxu1 %v4602_v41 }
 0x83c   :  { %1427 = vmatpush2.msra.mxu1 %v4605_v40 }
 0x83d   :  { %1428 = vmatprep.subr.mxu1 %v4608_v50 }
 0x83e   :  { %1429 = vmatpush2.msra.mxu1 %v4611_v47 }
 0x83f   :  { %1430 = vmatprep.subr.mxu1 %v4614_v0 }
 0x840   :  { %1431 = vmatpush2.msra.mxu1 %v4617_v12 }
 0x841   :  { %1432 = vmatprep.subr.mxu1 %v4620_v58 }
 0x842   :  { %1433 = vmatpush2.msra.mxu1 %v4623_v55 }
 0x843   :  { %1434 = vmatprep.subr.mxu1 %v4626_v51 }
 0x844   :  { %1435 = vmatpush2.msra.mxu1 %v4629_v54 }
 0x845   :  { %1436 = vmatprep.subr.mxu1 %v4632_v49 }
 0x846   :  { %1437 = vmatpush2.msra.mxu1 %v6426_v62  ;;  %v1548_v62 = vld [vmem:[#allocation13 + $0xf0] sm:$0xff] }
 0x847   :  { %1438 = vmatprep.subr.mxu1 %v6427_v37  ;;  %v6449_v37 = vld [vmem:[#allocation82_spill] sm:$0xff] }
 0x848   :  { %1439 = vmatpush2.msra.mxu1 %v6428_v39  ;;  %v1545_v39 = vld [vmem:[#allocation13 + $0xd8] sm:$0xff] }
 0x849   :  { %1440 = vmatprep.subr.mxu1 %v6429_v42  ;;  %v1544_v42 = vld [vmem:[#allocation13 + $0xd0] sm:$0xff] }
 0x84a   :  { %1441 = vmatpush2.msra.mxu1 %v6430_v44  ;;  %v1543_v44 = vld [vmem:[#allocation13 + $0xc8] sm:$0xff] }
 0x84b   :  { %1442 = vmatprep.subr.mxu1 %v6431_v1  ;;  %v1542_v1 = vld [vmem:[#allocation13 + $0xc0] sm:$0xff] }
 0x84c   :  { %1443 = vmatpush2.msra.mxu1 %v6432_v48  ;;  %v1541_v48 = vld [vmem:[#allocation13 + $0xb8] sm:$0xff] }
 0x84d   :  { %1444 = vmatprep.subr.mxu1 %v6433_v10  ;;  %v1540_v10 = vld [vmem:[#allocation13 + $0xb0] sm:$0xff] }
 0x84e   :  { %1445 = vmatpush2.msra.mxu1 %v6434_v11  ;;  %v1539_v11 = vld [vmem:[#allocation13 + $0xa8] sm:$0xff] }
 0x84f   :  { %1446 = vmatprep.subr.mxu1 %v6435_v13  ;;  %v1538_v13 = vld [vmem:[#allocation13 + $0xa0] sm:$0xff] }
 0x850   :  { %1447 = vmatpush2.msra.mxu1 %v6436_v14  ;;  %v1537_v14 = vld [vmem:[#allocation13 + $0x98] sm:$0xff] }
 0x851   :  { %1448 = vmatprep.subr.mxu1 %v6437_v15  ;;  %v1536_v15 = vld [vmem:[#allocation13 + $0x90] sm:$0xff] }
 0x852   :  { %1449 = vmatpush2.msra.mxu1 %v6438_v16  ;;  %v1535_v16 = vld [vmem:[#allocation13 + $0x88] sm:$0xff] }
 0x853   :  { %1450 = vmatprep.subr.mxu1 %v6439_v18  ;;  %v1534_v18 = vld [vmem:[#allocation13 + $0x80] sm:$0xff] }
 0x854   :  { %1451 = vmatpush2.msra.mxu1 %v6440_v19  ;;  %v1533_v19 = vld [vmem:[#allocation13 + $0x78] sm:$0xff] }
 0x855   :  { %1452 = vmatprep.subr.mxu1 %v6441_v31  ;;  %v1532_v31 = vld [vmem:[#allocation13 + $0x70] sm:$0xff] }
 0x856   :  { %1453 = vmatpush2.msra.mxu1 %v6442_v33  ;;  %v1531_v33 = vld [vmem:[#allocation13 + $0x68] sm:$0xff] }
 0x857   :  { %1454 = vmatprep.subr.mxu1 %v6443_v34  ;;  %v1530_v34 = vld [vmem:[#allocation13 + $0x60] sm:$0xff] }
 0x858   :  { %1455 = vmatpush2.msra.mxu1 %v6444_v35  ;;  %v1529_v35 = vld [vmem:[#allocation13 + $0x58] sm:$0xff] }
 0x859   :  { %1456 = vmatprep.subr.mxu1 %v6445_v36  ;;  %v1528_v36 = vld [vmem:[#allocation13 + $0x50] sm:$0xff] }
 0x85a   :  { %1457 = vmatpush2.msra.mxu1 %v6446_v38  ;;  %v1527_v38 = vld [vmem:[#allocation13 + $0x48] sm:$0xff] }
 0x8db   :  { %v1232_v7 = vpop.f32.mrf.mxu1 }
 0x8dc   :  { %v1237_v4 = vadd.f32 %v1232_v7, %v6447_v22  ;;  %v1526_v7 = vld [vmem:[#allocation13 + $0x40] sm:$0xff]  ;;  %v1525_v22 = vld [vmem:[#allocation13 + $0x38] sm:$0xff] }
 0x8dd   :  { %v1234_v5 = vpop.f32.mrf.mxu1 }
 0x8de   :  { %v1239_v6 = vmul.f32 %v1237_v4, %v4284_v63  ;;  %v1238_v9 = vadd.f32 %v1234_v5, %v6448_v8  ;;  %v1524_v4 = vld [vmem:[#allocation13 + $0x30] sm:$0xff]  ;;  %v1523_v5 = vld [vmem:[#allocation13 + $0x28] sm:$0xff]  ;;  %v1521_v8 = vld [vmem:[#allocation13 + $0x18] sm:$0xff] }
 0x8e0   :  { %v3118_v60 = vmul.f32 -1.442695, %v1239_v6  ;;  %v1240_v17 = vmul.f32 %v1238_v9, %v4287_v2  ;;  %v1522_v6 = vld [vmem:[#allocation13 + $0x20] sm:$0xff]  ;;  %v1520_v9 = vld [vmem:[#allocation13 + $0x10] sm:$0xff] }
 0x8e2   :  { %3287 = vpow2.f32 %v3118_v60  ;;  %v3119_v32 = vmul.f32 -1.442695, %v1240_v17  ;;  %v1519_v60 = vld [vmem:[#allocation13 + $0x8] sm:$0xff]  ;;  %v1518_v17 = vld [vmem:[#allocation13] sm:$0xff] }
 0x8e4   :  { %3289 = vpow2.f32 %v3119_v32  ;;  %v1581_v32 = vld [vmem:[#allocation13 + $0x1f8] sm:$0xff] }
 0x8ef   :  { %v3288_v41 = vpop.eup %3287 }
 0x8f0   :  { %v1247_v40 = vadd.f32 1.0, %v3288_v41  ;;  %v1580_v41 = vld [vmem:[#allocation13 + $0x1f0] sm:$0xff] }
 0x8f1   :  { %v3290_v50 = vpop.eup %3289 }
 0x8f2   :  { %3291 = vrcp.f32 %v1247_v40  ;;  %v1248_v47 = vadd.f32 1.0, %v3290_v50  ;;  %v1579_v40 = vld [vmem:[#allocation13 + $0x1e8] sm:$0xff]  ;;  %v1578_v50 = vld [vmem:[#allocation13 + $0x1e0] sm:$0xff] }
 0x8f4   :  { %3293 = vrcp.f32 %v1248_v47  ;;  %v1577_v47 = vld [vmem:[#allocation13 + $0x1d8] sm:$0xff] }
 0x8ff   :  { %v3292_v0 = vpop.eup %3291 }
 0x900   :  { %v1253_v12 = vmul.f32 %v3292_v0, %v4284_v63  ;;  %v1576_v0 = vld [vmem:[#allocation13 + $0x1d0] sm:$0xff] }
 0x901   :  { %v3294_v58 = vpop.eup %3293 }
 0x902   :  { %v1255_v55 = vadd.f32 %v1253_v12, %v4292_v27  ;;  %v1254_v51 = vmul.f32 %v3294_v58, %v4287_v2  ;;  %v1575_v12 = vld [vmem:[#allocation13 + $0x1c8] sm:$0xff]  ;;  %v1574_v58 = vld [vmem:[#allocation13 + $0x1c0] sm:$0xff] }
 0x904   :  { %1257 = vrot.lane.b32.xlu0 %v1255_v55, %s3773_s9  ;;  %v1256_v54 = vadd.f32 %v1254_v51, %v4295_v59  ;;  %v1572_v51 = vld [vmem:[#allocation13 + $0x1b0] sm:$0xff] }
 0x906   :  { %1259 = vrot.lane.b32.xlu1 %v1256_v54, %s3773_s9  ;;  %v1265_v49 = vmul.f32 %v1256_v54, %v1255_v55  ;;  %v1573_v55 = vld [vmem:[#allocation13 + $0x1b8] sm:$0xff]  ;;  %v1571_v54 = vld [vmem:[#allocation13 + $0x1a8] sm:$0xff] }
 0x976   :  { %v1258_v29 = vpop.permute.xlu0 %1257 }
 0x978   :  { %v1260_v21 = vpop.permute.xlu1 %1259 }
 0x979   :  { %v1261_v20 = vsel %vm690_vm0, %v1258_v29, %v1260_v21  ;;  %v1262_v61 = vsel %vm690_vm0, %v1260_v21, %v1258_v29  ;;  %v1568_v29 = vld [vmem:[#allocation13 + $0x190] sm:$0xff]  ;;  %v1567_v21 = vld [vmem:[#allocation13 + $0x188] sm:$0xff] }
 0x97a   :  { %v1263_v45 = vmul.f32 %v1261_v20, %v4806_v24  ;;  %v1264_v52 = vmul.f32 %v1262_v61, %v4808_v26  ;;  %v1547_v24 = vld [vmem:[#allocation13 + $0xe8] sm:$0xff]  ;;  %v1546_v26 = vld [vmem:[#allocation13 + $0xe0] sm:$0xff] }
 0x97c   :  { %v4897_v53 = vadd.f32 %v1265_v49, %v1263_v45  ;;  %v4899_v3 = vadd.f32 %v1265_v49, %v1264_v52  ;;  %v1570_v49 = vld [vmem:[#allocation13 + $0x1a0] sm:$0xff]  ;;  %v1564_v45 = vld [vmem:[#allocation13 + $0x170] sm:$0xff]  ;;  %v1563_v52 = vld [vmem:[#allocation13 + $0x168] sm:$0xff] }
 0x97e   :  { %3295 = vtanh.f32 %v4897_v53 }
 0x97f   :  { %3297 = vtanh.f32 %v4899_v3 }
 0x98b   :  { %v3296_v56 = vpop.eup %3295 }
 0x98c   :  { %v3298_v43 = vpop.eup %3297  ;;  %v4903_v46 = vmul.f32 %v3296_v56, %v1262_v61  ;;  %v1565_v61 = vld [vmem:[#allocation13 + $0x178] sm:$0xff]  ;;  %v1562_v56 = vld [vmem:[#allocation13 + $0x160] sm:$0xff] }
 0x98d   :  { %v4905_v23 = vmul.f32 %v3298_v43, %v1261_v20  ;;  %v1566_v20 = vld [vmem:[#allocation13 + $0x180] sm:$0xff]  ;;  %v1561_v43 = vld [vmem:[#allocation13 + $0x158] sm:$0xff] }
 0x98f   :  { %1344 = vmatprep.mubr.f32.mxu0 %v4905_v23 }
 0x990   :  { %1345 = vmatmul.mubr.f32.vlgmr.msra.gmra.mxu0 %v4903_v46 }
 0x991   :  { %1595 = vmatpush1.msra.mxu0 %v1548_v62  ;;  %1658 = vmatprep.mubr.f32.mxu0 %v6449_v37  ;;  %v1560_v62 = vld [vmem:[#allocation13 + $0x150] sm:$0xff] }
 0x992   :  { %1596 = vmatprep.subr.mxu0 %v1547_v24  ;;  %v1559_v24 = vld [vmem:[#allocation13 + $0x148] sm:$0xff] }
 0x993   :  { %1597 = vmatpush1.msra.mxu0 %v1546_v26  ;;  %v1558_v26 = vld [vmem:[#allocation13 + $0x140] sm:$0xff] }
 0x994   :  { %1598 = vmatprep.subr.mxu0 %v1545_v39  ;;  %v1557_v39 = vld [vmem:[#allocation13 + $0x138] sm:$0xff] }
 0x995   :  { %1599 = vmatpush1.msra.mxu0 %v1544_v42  ;;  %v1556_v42 = vld [vmem:[#allocation13 + $0x130] sm:$0xff] }
 0x996   :  { %1600 = vmatprep.subr.mxu0 %v1543_v44  ;;  %v1555_v44 = vld [vmem:[#allocation13 + $0x128] sm:$0xff] }
 0x997   :  { %1601 = vmatpush1.msra.mxu0 %v1542_v1  ;;  %v1554_v1 = vld [vmem:[#allocation13 + $0x120] sm:$0xff] }
 0x998   :  { %1602 = vmatprep.subr.mxu0 %v1541_v48  ;;  %v1553_v48 = vld [vmem:[#allocation13 + $0x118] sm:$0xff] }
 0x999   :  { %1603 = vmatpush1.msra.mxu0 %v1540_v10  ;;  %v1552_v10 = vld [vmem:[#allocation13 + $0x110] sm:$0xff] }
 0x99a   :  { %1604 = vmatprep.subr.mxu0 %v1539_v11  ;;  %v1551_v11 = vld [vmem:[#allocation13 + $0x108] sm:$0xff] }
 0x99b   :  { %1605 = vmatpush1.msra.mxu0 %v1538_v13  ;;  %v1550_v13 = vld [vmem:[#allocation13 + $0x100] sm:$0xff] }
 0x99c   :  { %1606 = vmatprep.subr.mxu0 %v1537_v14  ;;  %v6450_v14 = vld [vmem:[#allocation81_spill] sm:$0xff] }
 0x99d   :  { %1607 = vmatpush1.msra.mxu0 %v1536_v15  ;;  %v6451_v15 = vld [vmem:[#allocation29_spill] sm:$0xff] }
 0x99e   :  { %1608 = vmatprep.subr.mxu0 %v1535_v16  ;;  %v6452_v16 = vld [vmem:[#allocation28_spill] sm:$0xff] }
 0x99f   :  { %1609 = vmatpush1.msra.mxu0 %v1534_v18  ;;  %v6453_v18 = vld [vmem:[#allocation31_spill] sm:$0xff] }
 0x9a0   :  { %1610 = vmatprep.subr.mxu0 %v1533_v19  ;;  %v6454_v19 = vld [vmem:[#allocation30_spill] sm:$0xff] }
 0x9a1   :  { %1611 = vmatpush1.msra.mxu0 %v1532_v31  ;;  %v6455_v31 = vld [vmem:[#allocation46_spill] sm:$0xff] }
 0x9a2   :  { %1612 = vmatprep.subr.mxu0 %v1531_v33  ;;  %v6456_v33 = vld [vmem:[#allocation45_spill] sm:$0xff] }
 0x9a3   :  { %1613 = vmatpush1.msra.mxu0 %v1530_v34 }
 0x9a4   :  { %1614 = vmatprep.subr.mxu0 %v1529_v35  ;;  %v6457_v35 = vld [vmem:[#allocation73_spill] sm:$0xff] }
 0x9a5   :  { %1615 = vmatpush1.msra.mxu0 %v1528_v36 }
 0x9a6   :  { %1616 = vmatprep.subr.mxu0 %v1527_v38 }
 0x9a7   :  { %1617 = vmatpush1.msra.mxu0 %v1526_v7 }
 0x9a8   :  { %1618 = vmatprep.subr.mxu0 %v1525_v22  ;;  %v6458_v22 = vld [vmem:[#allocation74_spill] sm:$0xff] }
 0x9a9   :  { %1619 = vmatpush1.msra.mxu0 %v1524_v4 }
 0x9aa   :  { %1620 = vmatprep.subr.mxu0 %v1523_v5 }
 0x9ab   :  { %1621 = vmatpush1.msra.mxu0 %v1522_v6 }
 0x9ac   :  { %1622 = vmatprep.subr.mxu0 %v1521_v8 }
 0x9ad   :  { %1623 = vmatpush1.msra.mxu0 %v1520_v9 }
 0x9ae   :  { %1624 = vmatprep.subr.mxu0 %v1519_v60 }
 0x9af   :  { %1625 = vmatpush1.msra.mxu0 %v1518_v17 }
 0x9b0   :  { %1626 = vmatprep.subr.mxu0 %v1581_v32 }
 0x9b1   :  { %1627 = vmatpush2.msra.mxu0 %v1580_v41 }
 0x9b2   :  { %1628 = vmatprep.subr.mxu0 %v1579_v40 }
 0x9b3   :  { %1629 = vmatpush2.msra.mxu0 %v1578_v50 }
 0x9b4   :  { %1630 = vmatprep.subr.mxu0 %v1577_v47 }
 0x9b5   :  { %1631 = vmatpush2.msra.mxu0 %v1576_v0 }
 0x9b6   :  { %1632 = vmatprep.subr.mxu0 %v1575_v12 }
 0x9b7   :  { %1633 = vmatpush2.msra.mxu0 %v1574_v58 }
 0x9b8   :  { %1634 = vmatprep.subr.mxu0 %v1573_v55  ;;  %v1754_v55 = vld [vmem:[#allocation14 + $0xf8] sm:$0xff] }
 0x9b9   :  { %1635 = vmatpush2.msra.mxu0 %v1572_v51  ;;  %1787 = vmatprep.subr.mxu1 %v1754_v55  ;;  %v1782_v55 = vld [vmem:[#allocation14 + $0x1d8] sm:$0xff] }
 0x9ba   :  { %1636 = vmatprep.subr.mxu0 %v1571_v54 }
 0x9bb   :  { %1637 = vmatpush2.msra.mxu0 %v1570_v49 }
 0x9bc   :  { %1638 = vmatprep.subr.mxu0 %v1569_v28 }
 0x9bd   :  { %1639 = vmatpush2.msra.mxu0 %v1568_v29 }
 0x9be   :  { %1640 = vmatprep.subr.mxu0 %v1567_v21 }
 0x9bf   :  { %1641 = vmatpush2.msra.mxu0 %v1566_v20 }
 0x9c0   :  { %1642 = vmatprep.subr.mxu0 %v1565_v61 }
 0x9c1   :  { %1643 = vmatpush2.msra.mxu0 %v1564_v45 }
 0x9c2   :  { %1644 = vmatprep.subr.mxu0 %v1563_v52 }
 0x9c3   :  { %1645 = vmatpush2.msra.mxu0 %v1562_v56 }
 0x9c4   :  { %1646 = vmatprep.subr.mxu0 %v1561_v43 }
 0x9c5   :  { %1647 = vmatpush2.msra.mxu0 %v1560_v62  ;;  %v1753_v62 = vld [vmem:[#allocation14 + $0xf0] sm:$0xff] }
 0x9c6   :  { %1648 = vmatprep.subr.mxu0 %v1559_v24  ;;  %v1750_v24 = vld [vmem:[#allocation14 + $0xd8] sm:$0xff] }
 0x9c7   :  { %1649 = vmatpush2.msra.mxu0 %v1558_v26  ;;  %v1749_v26 = vld [vmem:[#allocation14 + $0xd0] sm:$0xff] }
 0x9c8   :  { %1650 = vmatprep.subr.mxu0 %v1557_v39  ;;  %v1748_v39 = vld [vmem:[#allocation14 + $0xc8] sm:$0xff] }
 0x9c9   :  { %1651 = vmatpush2.msra.mxu0 %v1556_v42  ;;  %v1747_v42 = vld [vmem:[#allocation14 + $0xc0] sm:$0xff] }
 0x9ca   :  { %1652 = vmatprep.subr.mxu0 %v1555_v44  ;;  %v1746_v44 = vld [vmem:[#allocation14 + $0xb8] sm:$0xff] }
 0x9cb   :  { %1653 = vmatpush2.msra.mxu0 %v1554_v1  ;;  %v1745_v1 = vld [vmem:[#allocation14 + $0xb0] sm:$0xff] }
 0x9cc   :  { %1654 = vmatprep.subr.mxu0 %v1553_v48  ;;  %v1744_v48 = vld [vmem:[#allocation14 + $0xa8] sm:$0xff] }
 0x9cd   :  { %1655 = vmatpush2.msra.mxu0 %v1552_v10  ;;  %v1743_v10 = vld [vmem:[#allocation14 + $0xa0] sm:$0xff] }
 0x9ce   :  { %1656 = vmatprep.subr.mxu0 %v1551_v11  ;;  %v1742_v11 = vld [vmem:[#allocation14 + $0x98] sm:$0xff] }
 0x9cf   :  { %1657 = vmatpush2.msra.mxu0 %v1550_v13  ;;  %v1741_v13 = vld [vmem:[#allocation14 + $0x90] sm:$0xff] }
 0x9d0   :  { %1659 = vmatmul.mubr.f32.vlgmr.msra.gmra.mxu0 %v6450_v14 }
 0x9d1   :  { %1664 = vmatprep.mubr.f32.mxu0 %v6451_v15 }
 0x9d4   :  { %1665 = vmatmul.mubr.f32.gmra.mxu0 %v6452_v16 }
 0x9d5   :  { %1670 = vmatprep.mubr.f32.mxu0 %v6453_v18 }
 0x9d8   :  { %1671 = vmatmul.mubr.f32.gmra.mxu0 %v6454_v19 }
 0x9d9   :  { %1676 = vmatprep.mubr.f32.mxu0 %v6455_v31 }
 0x9dc   :  { %1677 = vmatmul.mubr.f32.gmra.mxu0 %v6456_v33 }
 0x9dd   :  { %1682 = vmatprep.mubr.f32.mxu0 %v4814_v25 }
 0x9e0   :  { %1683 = vmatmul.mubr.f32.gmra.mxu0 %v4812_v30 }
 0x9e1   :  { %1688 = vmatprep.mubr.f32.mxu0 %v4905_v23 }
 0x9e4   :  { %1689 = vmatmul.mubr.f32.gmra.mxu0 %v4903_v46 }
 0xa50   :  { %v1346_v34 = vpop.f32.mrf.mxu0 }
 0xa51   :  { %v1351_v36 = vadd.f32 %v1346_v34, %v6457_v35  ;;  %v1739_v34 = vld [vmem:[#allocation14 + $0x80] sm:$0xff]  ;;  %v1738_v35 = vld [vmem:[#allocation14 + $0x78] sm:$0xff] }
 0xa52   :  { %v1348_v38 = vpop.f32.mrf.mxu0 }
 0xa53   :  { %v1353_v7 = vmul.f32 %v1351_v36, %v4284_v63  ;;  %v1352_v4 = vadd.f32 %v1348_v38, %v6458_v22  ;;  %v1737_v36 = vld [vmem:[#allocation14 + $0x70] sm:$0xff]  ;;  %v1736_v38 = vld [vmem:[#allocation14 + $0x68] sm:$0xff]  ;;  %v1734_v22 = vld [vmem:[#allocation14 + $0x58] sm:$0xff] }
 0xa55   :  { %v3120_v5 = vmul.f32 -1.442695, %v1353_v7  ;;  %v1354_v6 = vmul.f32 %v1352_v4, %v4287_v2  ;;  %v1735_v7 = vld [vmem:[#allocation14 + $0x60] sm:$0xff]  ;;  %v1733_v4 = vld [vmem:[#allocation14 + $0x50] sm:$0xff] }
 0xa57   :  { %3299 = vpow2.f32 %v3120_v5  ;;  %v3121_v8 = vmul.f32 -1.442695, %v1354_v6  ;;  %v1732_v5 = vld [vmem:[#allocation14 + $0x48] sm:$0xff]  ;;  %v1731_v6 = vld [vmem:[#allocation14 + $0x40] sm:$0xff] }
 0xa59   :  { %3301 = vpow2.f32 %v3121_v8  ;;  %v1730_v8 = vld [vmem:[#allocation14 + $0x38] sm:$0xff] }
 0xa64   :  { %v3300_v9 = vpop.eup %3299 }
 0xa65   :  { %v1361_v60 = vadd.f32 1.0, %v3300_v9  ;;  %v1729_v9 = vld [vmem:[#allocation14 + $0x30] sm:$0xff] }
 0xa66   :  { %v3302_v17 = vpop.eup %3301 }
 0xa67   :  { %3303 = vrcp.f32 %v1361_v60  ;;  %v1362_v32 = vadd.f32 1.0, %v3302_v17  ;;  %v1728_v60 = vld [vmem:[#allocation14 + $0x28] sm:$0xff]  ;;  %v1727_v17 = vld [vmem:[#allocation14 + $0x20] sm:$0xff] }
 0xa69   :  { %3305 = vrcp.f32 %v1362_v32  ;;  %v1726_v32 = vld [vmem:[#allocation14 + $0x18] sm:$0xff] }
 0xa74   :  { %v3304_v41 = vpop.eup %3303 }
 0xa75   :  { %v1367_v40 = vmul.f32 %v3304_v41, %v4284_v63  ;;  %v1725_v41 = vld [vmem:[#allocation14 + $0x10] sm:$0xff] }
 0xa76   :  { %v3306_v50 = vpop.eup %3305 }
 0xa77   :  { %v1369_v47 = vadd.f32 %v1367_v40, %v4292_v27  ;;  %v1368_v0 = vmul.f32 %v3306_v50, %v4287_v2  ;;  %v1724_v40 = vld [vmem:[#allocation14 + $0x8] sm:$0xff]  ;;  %v1723_v50 = vld [vmem:[#allocation14] sm:$0xff] }
 0xa79   :  { %1371 = vrot.lane.b32.xlu0 %v1369_v47, %s3773_s9  ;;  %v1370_v12 = vadd.f32 %v1368_v0, %v4295_v59  ;;  %v1785_v0 = vld [vmem:[#allocation14 + $0x1f0] sm:$0xff] }
 0xa7b   :  { %1373 = vrot.lane.b32.xlu1 %v1370_v12, %s3773_s9  ;;  %v1379_v58 = vmul.f32 %v1370_v12, %v1369_v47  ;;  %v1786_v47 = vld [vmem:[#allocation14 + $0x1f8] sm:$0xff]  ;;  %v1784_v12 = vld [vmem:[#allocation14 + $0x1e8] sm:$0xff] }
 0xaeb   :  { %v1372_v51 = vpop.permute.xlu0 %1371 }
 0xaed   :  { %v1374_v54 = vpop.permute.xlu1 %1373 }
 0xaee   :  { %v1375_v49 = vsel %vm690_vm0, %v1372_v51, %v1374_v54  ;;  %v1376_v28 = vsel %vm690_vm0, %v1374_v54, %v1372_v51  ;;  %v1781_v51 = vld [vmem:[#allocation14 + $0x1d0] sm:$0xff]  ;;  %v1780_v54 = vld [vmem:[#allocation14 + $0x1c8] sm:$0xff] }
 0xaef   :  { %v1377_v29 = vmul.f32 %v1375_v49, %v4897_v53  ;;  %v1378_v21 = vmul.f32 %v1376_v28, %v4899_v3  ;;  %v1752_v53 = vld [vmem:[#allocation14 + $0xe8] sm:$0xff]  ;;  %v1751_v3 = vld [vmem:[#allocation14 + $0xe0] sm:$0xff] }
 0xaf1   :  { %v4937_v20 = vadd.f32 %v1379_v58, %v1377_v29  ;;  %v4939_v61 = vadd.f32 %v1379_v58, %v1378_v21  ;;  %v1783_v58 = vld [vmem:[#allocation14 + $0x1e0] sm:$0xff]  ;;  %v1777_v29 = vld [vmem:[#allocation14 + $0x1b0] sm:$0xff]  ;;  %v1776_v21 = vld [vmem:[#allocation14 + $0x1a8] sm:$0xff] }
 0xaf3   :  { %3307 = vtanh.f32 %v4937_v20 }
 0xaf4   :  { %3309 = vtanh.f32 %v4939_v61 }
 0xb00   :  { %v3308_v45 = vpop.eup %3307 }
 0xb01   :  { %v3310_v52 = vpop.eup %3309  ;;  %v4943_v56 = vmul.f32 %v3308_v45, %v1376_v28  ;;  %v1778_v28 = vld [vmem:[#allocation14 + $0x1b8] sm:$0xff]  ;;  %v1775_v45 = vld [vmem:[#allocation14 + $0x1a0] sm:$0xff] }
 0xb02   :  { %v4945_v43 = vmul.f32 %v3310_v52, %v1375_v49  ;;  %v1779_v49 = vld [vmem:[#allocation14 + $0x1c0] sm:$0xff]  ;;  %v1774_v52 = vld [vmem:[#allocation14 + $0x198] sm:$0xff] }
 0xb04   :  { %1458 = vmatprep.mubr.f32.mxu1 %v4945_v43  ;;  %1694 = vmatprep.mubr.f32.mxu0 %v4945_v43 }
 0xb05   :  { %1459 = vmatmul.mubr.f32.vlgmr.msra.gmra.mxu1 %v4943_v56  ;;  %1695 = vmatmul.mubr.f32.gmra.mxu0 %v4943_v56 }
 0xb06   :  { %1788 = vmatpush1.msra.mxu1 %v1753_v62  ;;  %1851 = vmatprep.mubr.f32.mxu1 %v6449_v37  ;;  %v1740_v37 = vld [vmem:[#allocation14 + $0x88] sm:$0xff]  ;;  %v1773_v62 = vld [vmem:[#allocation14 + $0x190] sm:$0xff] }
 0xb07   :  { %1789 = vmatprep.subr.mxu1 %v1752_v53  ;;  %v1772_v53 = vld [vmem:[#allocation14 + $0x188] sm:$0xff] }
 0xb08   :  { %1790 = vmatpush1.msra.mxu1 %v1751_v3  ;;  %v1771_v3 = vld [vmem:[#allocation14 + $0x180] sm:$0xff] }
 0xb09   :  { %1791 = vmatprep.subr.mxu1 %v1750_v24  ;;  %v1770_v24 = vld [vmem:[#allocation14 + $0x178] sm:$0xff] }
 0xb0a   :  { %1792 = vmatpush1.msra.mxu1 %v1749_v26  ;;  %v1769_v26 = vld [vmem:[#allocation14 + $0x170] sm:$0xff] }
 0xb0b   :  { %1793 = vmatprep.subr.mxu1 %v1748_v39  ;;  %v1768_v39 = vld [vmem:[#allocation14 + $0x168] sm:$0xff] }
 0xb0c   :  { %1794 = vmatpush1.msra.mxu1 %v1747_v42  ;;  %v1767_v42 = vld [vmem:[#allocation14 + $0x160] sm:$0xff] }
 0xb0d   :  { %1795 = vmatprep.subr.mxu1 %v1746_v44  ;;  %v1766_v44 = vld [vmem:[#allocation14 + $0x158] sm:$0xff] }
 0xb0e   :  { %1796 = vmatpush1.msra.mxu1 %v1745_v1  ;;  %v1765_v1 = vld [vmem:[#allocation14 + $0x150] sm:$0xff] }
 0xb0f   :  { %1797 = vmatprep.subr.mxu1 %v1744_v48  ;;  %v1764_v48 = vld [vmem:[#allocation14 + $0x148] sm:$0xff] }
 0xb10   :  { %1798 = vmatpush1.msra.mxu1 %v1743_v10  ;;  %v1763_v10 = vld [vmem:[#allocation14 + $0x140] sm:$0xff] }
 0xb11   :  { %1799 = vmatprep.subr.mxu1 %v1742_v11  ;;  %v1762_v11 = vld [vmem:[#allocation14 + $0x138] sm:$0xff] }
 0xb12   :  { %1800 = vmatpush1.msra.mxu1 %v1741_v13  ;;  %v1761_v13 = vld [vmem:[#allocation14 + $0x130] sm:$0xff] }
 0xb13   :  { %1801 = vmatprep.subr.mxu1 %v1740_v37  ;;  %v1760_v37 = vld [vmem:[#allocation14 + $0x128] sm:$0xff] }
 0xb14   :  { %1802 = vmatpush1.msra.mxu1 %v1739_v34  ;;  %v1759_v34 = vld [vmem:[#allocation14 + $0x120] sm:$0xff] }
 0xb15   :  { %1803 = vmatprep.subr.mxu1 %v1738_v35  ;;  %v1758_v35 = vld [vmem:[#allocation14 + $0x118] sm:$0xff] }
 0xb16   :  { %1804 = vmatpush1.msra.mxu1 %v1737_v36  ;;  %v1757_v36 = vld [vmem:[#allocation14 + $0x110] sm:$0xff] }
 0xb17   :  { %1805 = vmatprep.subr.mxu1 %v1736_v38  ;;  %v1756_v38 = vld [vmem:[#allocation14 + $0x108] sm:$0xff] }
 0xb18   :  { %1806 = vmatpush1.msra.mxu1 %v1735_v7  ;;  %v1755_v7 = vld [vmem:[#allocation14 + $0x100] sm:$0xff] }
 0xb19   :  { %1807 = vmatprep.subr.mxu1 %v1734_v22  ;;  %v5012_v22 = vld [vmem:[#allocation16 + $0x90] sm:$0xff] }
 0xb1a   :  { %1808 = vmatpush1.msra.mxu1 %v1733_v4  ;;  %v5016_v4 = vld [vmem:[#allocation16 + $0x88] sm:$0xff] }
 0xb1b   :  { %1809 = vmatprep.subr.mxu1 %v1732_v5  ;;  %v5020_v5 = vld [vmem:[#allocation16 + $0x80] sm:$0xff] }
 0xb1c   :  { %1810 = vmatpush1.msra.mxu1 %v1731_v6  ;;  %v5024_v6 = vld [vmem:[#allocation16 + $0x78] sm:$0xff] }
 0xb1d   :  { %1811 = vmatprep.subr.mxu1 %v1730_v8  ;;  %v5028_v8 = vld [vmem:[#allocation16 + $0x70] sm:$0xff] }
 0xb1e   :  { %1812 = vmatpush1.msra.mxu1 %v1729_v9  ;;  %v5032_v9 = vld [vmem:[#allocation16 + $0x68] sm:$0xff] }
 0xb1f   :  { %1813 = vmatprep.subr.mxu1 %v1728_v60  ;;  %v5036_v60 = vld [vmem:[#allocation16 + $0x60] sm:$0xff] }
 0xb20   :  { %1814 = vmatpush1.msra.mxu1 %v1727_v17  ;;  %v5040_v17 = vld [vmem:[#allocation16 + $0x58] sm:$0xff] }
 0xb21   :  { %1815 = vmatprep.subr.mxu1 %v1726_v32  ;;  %v5044_v32 = vld [vmem:[#allocation16 + $0x50] sm:$0xff] }
 0xb22   :  { %1816 = vmatpush1.msra.mxu1 %v1725_v41  ;;  %v5048_v41 = vld [vmem:[#allocation16 + $0x48] sm:$0xff] }
 0xb23   :  { %1817 = vmatprep.subr.mxu1 %v1724_v40  ;;  %v5052_v40 = vld [vmem:[#allocation16 + $0x40] sm:$0xff] }
 0xb24   :  { %1818 = vmatpush1.msra.mxu1 %v1723_v50  ;;  %v5056_v50 = vld [vmem:[#allocation16 + $0x38] sm:$0xff] }
 0xb25   :  { %1819 = vmatprep.subr.mxu1 %v1786_v47  ;;  %v5060_v47 = vld [vmem:[#allocation16 + $0x30] sm:$0xff] }
 0xb26   :  { %1820 = vmatpush2.msra.mxu1 %v1785_v0  ;;  %v5064_v0 = vld [vmem:[#allocation16 + $0x28] sm:$0xff] }
 0xb27   :  { %1821 = vmatprep.subr.mxu1 %v1784_v12  ;;  %v5068_v12 = vld [vmem:[#allocation16 + $0x20] sm:$0xff] }
 0xb28   :  { %1822 = vmatpush2.msra.mxu1 %v1783_v58  ;;  %v5072_v58 = vld [vmem:[#allocation16 + $0x18] sm:$0xff] }
 0xb29   :  { %1823 = vmatprep.subr.mxu1 %v1782_v55  ;;  %v5076_v55 = vld [vmem:[#allocation16 + $0x10] sm:$0xff] }
 0xb2a   :  { %1824 = vmatpush2.msra.mxu1 %v1781_v51  ;;  %v5080_v51 = vld [vmem:[#allocation16 + $0x8] sm:$0xff] }
 0xb2b   :  { %1825 = vmatprep.subr.mxu1 %v1780_v54  ;;  %v5084_v54 = vld [vmem:[#allocation16] sm:$0xff] }
 0xb2c   :  { %1826 = vmatpush2.msra.mxu1 %v1779_v49  ;;  %v5088_v49 = vld [vmem:[#allocation16 + $0x1f8] sm:$0xff] }
 0xb2d   :  { %1827 = vmatprep.subr.mxu1 %v1778_v28  ;;  %v5092_v28 = vld [vmem:[#allocation16 + $0x1f0] sm:$0xff] }
 0xb2e   :  { %1828 = vmatpush2.msra.mxu1 %v1777_v29  ;;  %v5096_v29 = vld [vmem:[#allocation16 + $0x1e8] sm:$0xff] }
 0xb2f   :  { %1829 = vmatprep.subr.mxu1 %v1776_v21  ;;  %v5100_v21 = vld [vmem:[#allocation16 + $0x1e0] sm:$0xff] }
 0xb30   :  { %1830 = vmatpush2.msra.mxu1 %v1775_v45 }
 0xb31   :  { %1831 = vmatprep.subr.mxu1 %v1774_v52  ;;  %v6460_v52 = vld [vmem:[#allocation75_spill] sm:$0xff] }
 0xb32   :  { %1832 = vmatpush2.msra.mxu1 %v1773_v62 }
 0xb33   :  { %1833 = vmatprep.subr.mxu1 %v1772_v53 }
 0xb34   :  { %1834 = vmatpush2.msra.mxu1 %v1771_v3 }
 0xb35   :  { %1835 = vmatprep.subr.mxu1 %v1770_v24  ;;  %v6461_v24 = vld [vmem:[#allocation76_spill] sm:$0xff] }
 0xb36   :  { %1836 = vmatpush2.msra.mxu1 %v1769_v26 }
 0xb37   :  { %1837 = vmatprep.subr.mxu1 %v1768_v39 }
 0xb38   :  { %1838 = vmatpush2.msra.mxu1 %v1767_v42 }
 0xb39   :  { %1839 = vmatprep.subr.mxu1 %v1766_v44 }
 0xb3a   :  { %1840 = vmatpush2.msra.mxu1 %v1765_v1  ;;  %v5113_v1 = vpop.f32.mrf.mxu0 }
 0xb3b   :  { %1841 = vmatprep.subr.mxu1 %v1764_v48  ;;  %6462 = vst [vmem:[#allocation55_spill] sm:$0xff] %v5113_v1  ;;  %v5193_v1 = vld [vmem:[#allocation16 + $0x160] sm:$0xff] }
 0xb3c   :  { %1842 = vmatpush2.msra.mxu1 %v1763_v10  ;;  %6479 = vst [vmem:[#allocation35_spill] sm:$0xff] %v5193_v1 }
 0xb3d   :  { %1843 = vmatprep.subr.mxu1 %v1762_v11 }
 0xb3e   :  { %1844 = vmatpush2.msra.mxu1 %v1761_v13  ;;  %v5115_v13 = vpop.f32.mrf.mxu0 }
 0xb3f   :  { %1845 = vmatprep.subr.mxu1 %v1760_v37  ;;  %6463 = vst [vmem:[#allocation56_spill] sm:$0xff] %v5115_v13 }
 0xb40   :  { %1846 = vmatpush2.msra.mxu1 %v1759_v34  ;;  %v5117_v34 = vpop.f32.mrf.mxu0 }
 0xb41   :  { %1847 = vmatprep.subr.mxu1 %v1758_v35  ;;  %v5119_v35 = vld [vmem:[#allocation16 + $0x1d8] sm:$0xff] }
 0xb42   :  { %1848 = vmatpush2.msra.mxu1 %v1757_v36  ;;  %v5121_v36 = vld [vmem:[#allocation16 + $0x1d0] sm:$0xff] }
 0xb43   :  { %1849 = vmatprep.subr.mxu1 %v1756_v38  ;;  %6464 = vst [vmem:[#allocation57_spill] sm:$0xff] %v5121_v36  ;;  %v5127_v38 = vpop.f32.mrf.mxu0 }
 0xb44   :  { %1850 = vmatpush2.msra.mxu1 %v1755_v7  ;;  %6465 = vst [vmem:[#allocation58_spill] sm:$0xff] %v5127_v38  ;;  %v5129_v7 = vld [vmem:[#allocation16 + $0x1c8] sm:$0xff] }
 0xb45   :  { %1852 = vmatmul.mubr.f32.vlgmr.msra.gmra.mxu1 %v6450_v14  ;;  %v4965_v14 = vld [vmem:[#allocation16 + $0xf8] sm:$0xff]  ;;  %6466 = vst [vmem:[#allocation59_spill] sm:$0xff] %v5129_v7 }
 0xb46   :  { %1857 = vmatprep.mubr.f32.mxu1 %v6451_v15  ;;  %6459 = vst [vmem:[#allocation54_spill] sm:$0xff] %v4965_v14  ;;  %v4967_v15 = vld [vmem:[#allocation16 + $0xf0] sm:$0xff]  ;;  %1986 = vmatprep.subr.mxu0 %v4965_v14 }
 0xb47   :  { %2098 = vmatprep.subr.mxu1 %v4965_v14  ;;  %1987 = vmatpush1.msra.mxu0 %v4967_v15 }
 0xb48   :  { %2099 = vmatpush1.msra.mxu1 %v4967_v15 }
 0xb49   :  { %1858 = vmatmul.mubr.f32.gmra.mxu1 %v6452_v16  ;;  %v4969_v16 = vld [vmem:[#allocation16 + $0xe8] sm:$0xff] }
 0xb4a   :  { %1863 = vmatprep.mubr.f32.mxu1 %v6453_v18  ;;  %v4972_v18 = vld [vmem:[#allocation16 + $0xe0] sm:$0xff]  ;;  %1988 = vmatprep.subr.mxu0 %v4969_v16 }
 0xb4b   :  { %2100 = vmatprep.subr.mxu1 %v4969_v16  ;;  %1989 = vmatpush1.msra.mxu0 %v4972_v18 }
 0xb4c   :  { %2101 = vmatpush1.msra.mxu1 %v4972_v18 }
 0xb4d   :  { %1864 = vmatmul.mubr.f32.gmra.mxu1 %v6454_v19  ;;  %v4992_v19 = vld [vmem:[#allocation16 + $0xb8] sm:$0xff] }
 0xb4e   :  { %1869 = vmatprep.mubr.f32.mxu1 %v6455_v31  ;;  %v4996_v31 = vld [vmem:[#allocation16 + $0xb0] sm:$0xff] }
 0xb51   :  { %1870 = vmatmul.mubr.f32.gmra.mxu1 %v6456_v33  ;;  %v5000_v33 = vld [vmem:[#allocation16 + $0xa8] sm:$0xff] }
 0xb52   :  { %1875 = vmatprep.mubr.f32.mxu1 %v4814_v25  ;;  %v4980_v25 = vld [vmem:[#allocation16 + $0xd0] sm:$0xff] }
 0xb55   :  { %1876 = vmatmul.mubr.f32.gmra.mxu1 %v4812_v30  ;;  %v4976_v30 = vld [vmem:[#allocation16 + $0xd8] sm:$0xff] }
 0xb56   :  { %1881 = vmatprep.mubr.f32.mxu1 %v4905_v23  ;;  %1990 = vmatprep.subr.mxu0 %v4976_v30  ;;  %v4988_v23 = vld [vmem:[#allocation16 + $0xc0] sm:$0xff] }
 0xb57   :  { %2102 = vmatprep.subr.mxu1 %v4976_v30  ;;  %1991 = vmatpush1.msra.mxu0 %v4980_v25 }
 0xb58   :  { %2103 = vmatpush1.msra.mxu1 %v4980_v25 }
 0xb59   :  { %1882 = vmatmul.mubr.f32.gmra.mxu1 %v4903_v46  ;;  %v4984_v46 = vld [vmem:[#allocation16 + $0xc8] sm:$0xff] }
 0xb5a   :  { %1887 = vmatprep.mubr.f32.mxu1 %v4945_v43  ;;  %1992 = vmatprep.subr.mxu0 %v4984_v46  ;;  %v5008_v43 = vld [vmem:[#allocation16 + $0x98] sm:$0xff] }
 0xb5b   :  { %2104 = vmatprep.subr.mxu1 %v4984_v46  ;;  %1993 = vmatpush1.msra.mxu0 %v4988_v23 }
 0xb5c   :  { %2105 = vmatpush1.msra.mxu1 %v4988_v23  ;;  %1994 = vmatprep.subr.mxu0 %v4992_v19 }
 0xb5d   :  { %1888 = vmatmul.mubr.f32.gmra.mxu1 %v4943_v56  ;;  %v5004_v56 = vld [vmem:[#allocation16 + $0xa0] sm:$0xff]  ;;  %2106 = vmatprep.subr.mxu1 %v4992_v19 }
 0xb5e   :  { %1995 = vmatpush1.msra.mxu0 %v4996_v31  ;;  %2107 = vmatpush1.msra.mxu1 %v4996_v31 }
 0xb5f   :  { %1996 = vmatprep.subr.mxu0 %v5000_v33  ;;  %2108 = vmatprep.subr.mxu1 %v5000_v33 }
 0xb60   :  { %1997 = vmatpush1.msra.mxu0 %v5004_v56  ;;  %2109 = vmatpush1.msra.mxu1 %v5004_v56 }
 0xb61   :  { %1998 = vmatprep.subr.mxu0 %v5008_v43  ;;  %2110 = vmatprep.subr.mxu1 %v5008_v43 }
 0xb62   :  { %1999 = vmatpush1.msra.mxu0 %v5012_v22  ;;  %2111 = vmatpush1.msra.mxu1 %v5012_v22 }
 0xb63   :  { %2000 = vmatprep.subr.mxu0 %v5016_v4  ;;  %2112 = vmatprep.subr.mxu1 %v5016_v4 }
 0xb64   :  { %2001 = vmatpush1.msra.mxu0 %v5020_v5  ;;  %2113 = vmatpush1.msra.mxu1 %v5020_v5 }
 0xb65   :  { %2002 = vmatprep.subr.mxu0 %v5024_v6  ;;  %2114 = vmatprep.subr.mxu1 %v5024_v6 }
 0xb66   :  { %2003 = vmatpush1.msra.mxu0 %v5028_v8  ;;  %2115 = vmatpush1.msra.mxu1 %v5028_v8 }
 0xb67   :  { %2004 = vmatprep.subr.mxu0 %v5032_v9  ;;  %2116 = vmatprep.subr.mxu1 %v5032_v9 }
 0xb68   :  { %2005 = vmatpush1.msra.mxu0 %v5036_v60  ;;  %2117 = vmatpush1.msra.mxu1 %v5036_v60 }
 0xb69   :  { %2006 = vmatprep.subr.mxu0 %v5040_v17  ;;  %2118 = vmatprep.subr.mxu1 %v5040_v17 }
 0xb6a   :  { %2007 = vmatpush1.msra.mxu0 %v5044_v32  ;;  %2119 = vmatpush1.msra.mxu1 %v5044_v32 }
 0xb6b   :  { %2008 = vmatprep.subr.mxu0 %v5048_v41  ;;  %2120 = vmatprep.subr.mxu1 %v5048_v41 }
 0xb6c   :  { %2009 = vmatpush1.msra.mxu0 %v5052_v40  ;;  %2121 = vmatpush1.msra.mxu1 %v5052_v40 }
 0xb6d   :  { %2010 = vmatprep.subr.mxu0 %v5056_v50  ;;  %2122 = vmatprep.subr.mxu1 %v5056_v50 }
 0xb6e   :  { %2011 = vmatpush1.msra.mxu0 %v5060_v47  ;;  %2123 = vmatpush1.msra.mxu1 %v5060_v47 }
 0xb6f   :  { %2012 = vmatprep.subr.mxu0 %v5064_v0  ;;  %2124 = vmatprep.subr.mxu1 %v5064_v0 }
 0xb70   :  { %2013 = vmatpush1.msra.mxu0 %v5068_v12  ;;  %2125 = vmatpush1.msra.mxu1 %v5068_v12 }
 0xb71   :  { %2014 = vmatprep.subr.mxu0 %v5072_v58  ;;  %2126 = vmatprep.subr.mxu1 %v5072_v58 }
 0xb72   :  { %2015 = vmatpush1.msra.mxu0 %v5076_v55  ;;  %2127 = vmatpush1.msra.mxu1 %v5076_v55 }
 0xb73   :  { %2016 = vmatprep.subr.mxu0 %v5080_v51  ;;  %2128 = vmatprep.subr.mxu1 %v5080_v51 }
 0xb74   :  { %2017 = vmatpush1.msra.mxu0 %v5084_v54  ;;  %2129 = vmatpush1.msra.mxu1 %v5084_v54 }
 0xb75   :  { %2018 = vmatprep.subr.mxu0 %v5088_v49  ;;  %2130 = vmatprep.subr.mxu1 %v5088_v49 }
 0xb76   :  { %2019 = vmatpush2.msra.mxu0 %v5092_v28  ;;  %2131 = vmatpush2.msra.mxu1 %v5092_v28 }
 0xb77   :  { %2020 = vmatprep.subr.mxu0 %v5096_v29  ;;  %2132 = vmatprep.subr.mxu1 %v5096_v29 }
 0xb78   :  { %2021 = vmatpush2.msra.mxu0 %v5100_v21  ;;  %2133 = vmatpush2.msra.mxu1 %v5100_v21 }
 0xb79   :  { %2022 = vmatprep.subr.mxu0 %v5119_v35  ;;  %2134 = vmatprep.subr.mxu1 %v5119_v35 }
 0xb7a   :  { %2023 = vmatpush2.msra.mxu0 %v5121_v36  ;;  %2135 = vmatpush2.msra.mxu1 %v5121_v36 }
 0xb7b   :  { %2024 = vmatprep.subr.mxu0 %v5129_v7  ;;  %2136 = vmatprep.subr.mxu1 %v5129_v7 }
 0xbc5   :  { %v1460_v45 = vpop.f32.mrf.mxu1 }
 0xbc6   :  { %v1465_v62 = vadd.f32 %v1460_v45, %v6460_v52  ;;  %v5132_v45 = vld [vmem:[#allocation16 + $0x1c0] sm:$0xff]  ;;  %v5136_v52 = vld [vmem:[#allocation16 + $0x1b8] sm:$0xff] }
 0xbc7   :  { %v1462_v53 = vpop.f32.mrf.mxu1  ;;  %6467 = vst [vmem:[#allocation60_spill] sm:$0xff] %v5132_v45  ;;  %2025 = vmatpush2.msra.mxu0 %v5132_v45  ;;  %6468 = vst [vmem:[#allocation61_spill] sm:$0xff] %v5136_v52  ;;  %2137 = vmatpush2.msra.mxu1 %v5132_v45 }
 0xbc8   :  { %v1467_v3 = vmul.f32 %v1465_v62, %v4284_v63  ;;  %v1466_v26 = vadd.f32 %v1462_v53, %v6461_v24  ;;  %2026 = vmatprep.subr.mxu0 %v5136_v52  ;;  %v5140_v62 = vld [vmem:[#allocation16 + $0x1b0] sm:$0xff]  ;;  %2138 = vmatprep.subr.mxu1 %v5136_v52  ;;  %v5143_v53 = vpop.f32.mrf.mxu0  ;;  %v5150_v24 = vld [vmem:[#allocation16 + $0x1a0] sm:$0xff] }
 0xbc9   :  { %6469 = vst [vmem:[#allocation62_spill] sm:$0xff] %v5140_v62  ;;  %2027 = vmatpush2.msra.mxu0 %v5140_v62  ;;  %2139 = vmatpush2.msra.mxu1 %v5140_v62  ;;  %6471 = vst [vmem:[#allocation70_spill] sm:$0xff] %v5150_v24 }
 0xbca   :  { %v3122_v39 = vmul.f32 -1.442695, %v1467_v3  ;;  %v1468_v42 = vmul.f32 %v1466_v26, %v4287_v2  ;;  %v5146_v3 = vld [vmem:[#allocation16 + $0x1a8] sm:$0xff] }
 0xbcb   :  { %6470 = vst [vmem:[#allocation68_spill] sm:$0xff] %v5146_v3  ;;  %2028 = vmatprep.subr.mxu0 %v5146_v3  ;;  %2140 = vmatprep.subr.mxu1 %v5146_v3 }
 0xbcc   :  { %3311 = vpow2.f32 %v3122_v39  ;;  %v3123_v44 = vmul.f32 -1.442695, %v1468_v42  ;;  %2029 = vmatpush2.msra.mxu0 %v5150_v24  ;;  %v5154_v39 = vld [vmem:[#allocation16 + $0x198] sm:$0xff]  ;;  %2141 = vmatpush2.msra.mxu1 %v5150_v24 }
 0xbcd   :  { %6472 = vst [vmem:[#allocation65_spill] sm:$0xff] %v5154_v39  ;;  %2030 = vmatprep.subr.mxu0 %v5154_v39  ;;  %2142 = vmatprep.subr.mxu1 %v5154_v39  ;;  %v6494_v39 = vld [vmem:[#allocation63_spill] sm:$0xff] }
 0xbce   :  { %3313 = vpow2.f32 %v3123_v44  ;;  %v5159_v44 = vld [vmem:[#allocation16 + $0x190] sm:$0xff] }
 0xbcf   :  { %6473 = vst [vmem:[#allocation66_spill] sm:$0xff] %v5159_v44  ;;  %2031 = vmatpush2.msra.mxu0 %v5159_v44  ;;  %2143 = vmatpush2.msra.mxu1 %v5159_v44  ;;  %v5238_v44 = vld [vmem:[#allocation16 + $0x100] sm:$0xff] }
 0xbd0   :  { %6491 = vst [vmem:[#allocation48_spill] sm:$0xff] %v5238_v44 }
 0xbd9   :  { %v3312_v48 = vpop.eup %3311 }
 0xbda   :  { %v1475_v10 = vadd.f32 1.0, %v3312_v48 }
 0xbdb   :  { %v3314_v11 = vpop.eup %3313 }
 0xbdc   :  { %3315 = vrcp.f32 %v1475_v10  ;;  %v1476_v37 = vadd.f32 1.0, %v3314_v11  ;;  %v5162_v10 = vpop.f32.mrf.mxu0  ;;  %v5165_v11 = vld [vmem:[#allocation16 + $0x188] sm:$0xff] }
 0xbdd   :  { %6474 = vst [vmem:[#allocation67_spill] sm:$0xff] %v5165_v11  ;;  %2032 = vmatprep.subr.mxu0 %v5165_v11  ;;  %2144 = vmatprep.subr.mxu1 %v5165_v11  ;;  %v5236_v11 = vld [vmem:[#allocation16 + $0x108] sm:$0xff] }
 0xbde   :  { %3317 = vrcp.f32 %v1476_v37  ;;  %6490 = vst [vmem:[#allocation47_spill] sm:$0xff] %v5236_v11 }
 0xbe9   :  { %v3316_v26 = vpop.eup %3315 }
 0xbea   :  { %v1481_v42 = vmul.f32 %v3316_v26, %v4284_v63  ;;  %v5171_v26 = vld [vmem:[#allocation16 + $0x180] sm:$0xff]  ;;  %v5175_v63 = vld [vmem:[#allocation16 + $0x178] sm:$0xff] }
 0xbeb   :  { %v3318_v48 = vpop.eup %3317  ;;  %6475 = vst [vmem:[#allocation69_spill] sm:$0xff] %v5171_v26  ;;  %2033 = vmatpush2.msra.mxu0 %v5171_v26  ;;  %6476 = vst [vmem:[#allocation32_spill] sm:$0xff] %v5175_v63  ;;  %2145 = vmatpush2.msra.mxu1 %v5171_v26 }
 0xbec   :  { %v1483_v37 = vadd.f32 %v1481_v42, %v4292_v27  ;;  %v1482_v38 = vmul.f32 %v3318_v48, %v4287_v2  ;;  %2034 = vmatprep.subr.mxu0 %v5175_v63  ;;  %v5181_v42 = vld [vmem:[#allocation16 + $0x170] sm:$0xff]  ;;  %v5183_v48 = vpop.f32.mrf.mxu0  ;;  %v5186_v27 = vld [vmem:[#allocation16 + $0x168] sm:$0xff]  ;;  %2146 = vmatprep.subr.mxu1 %v5175_v63 }
 0xbed   :  { %6477 = vst [vmem:[#allocation33_spill] sm:$0xff] %v5181_v42  ;;  %2035 = vmatpush2.msra.mxu0 %v5181_v42  ;;  %6478 = vst [vmem:[#allocation34_spill] sm:$0xff] %v5186_v27  ;;  %2147 = vmatpush2.msra.mxu1 %v5181_v42  ;;  %v5214_v42 = vld [vmem:[#allocation16 + $0x138] sm:$0xff] }
 0xbee   :  { %1485 = vrot.lane.b32.xlu0 %v1483_v37, %s3773_s9  ;;  %v1484_v13 = vadd.f32 %v1482_v38, %v4295_v59  ;;  %2036 = vmatprep.subr.mxu0 %v5186_v27  ;;  %v5196_v38 = vld [vmem:[#allocation16 + $0x158] sm:$0xff]  ;;  %v5200_v59 = vld [vmem:[#allocation16 + $0x150] sm:$0xff]  ;;  %v5203_v63 = vpop.f32.mrf.mxu0  ;;  %6484 = vst [vmem:[#allocation40_spill] sm:$0xff] %v5214_v42 }
 0xbef   :  { %2037 = vmatpush2.msra.mxu0 %v5193_v1  ;;  %6480 = vst [vmem:[#allocation36_spill] sm:$0xff] %v5196_v38  ;;  %6481 = vst [vmem:[#allocation37_spill] sm:$0xff] %v5200_v59  ;;  %2148 = vmatprep.subr.mxu1 %v5186_v27  ;;  %v5218_v27 = vld [vmem:[#allocation16 + $0x130] sm:$0xff] }
 0xbf0   :  { %1487 = vrot.lane.b32.xlu1 %v1484_v13, %s3773_s9  ;;  %v5190_v2 = vmul.f32 %v1484_v13, %v1483_v37  ;;  %2038 = vmatprep.subr.mxu0 %v5196_v38  ;;  %v5206_v13 = vld [vmem:[#allocation16 + $0x148] sm:$0xff]  ;;  %v5210_v37 = vld [vmem:[#allocation16 + $0x140] sm:$0xff]  ;;  %6485 = vst [vmem:[#allocation41_spill] sm:$0xff] %v5218_v27  ;;  %v1684_v26 = vpop.f32.mrf.mxu0 }
 0xbf1   :  { %2039 = vmatpush2.msra.mxu0 %v5200_v59  ;;  %6482 = vst [vmem:[#allocation38_spill] sm:$0xff] %v5206_v13  ;;  %2149 = vmatpush2.msra.mxu1 %v5193_v1  ;;  %6483 = vst [vmem:[#allocation39_spill] sm:$0xff] %v5210_v37  ;;  %v5222_v1 = vld [vmem:[#allocation16 + $0x128] sm:$0xff] }
 0xbf2   :  { %2040 = vmatprep.subr.mxu0 %v5206_v13  ;;  %2150 = vmatprep.subr.mxu1 %v5196_v38  ;;  %6486 = vst [vmem:[#allocation42_spill] sm:$0xff] %v5222_v1  ;;  %v5226_v38 = vld [vmem:[#allocation16 + $0x120] sm:$0xff] }
 0xbf3   :  { %2041 = vmatpush2.msra.mxu0 %v5210_v37  ;;  %2151 = vmatpush2.msra.mxu1 %v5200_v59  ;;  %6487 = vst [vmem:[#allocation43_spill] sm:$0xff] %v5226_v38  ;;  %v5230_v59 = vld [vmem:[#allocation16 + $0x118] sm:$0xff] }
 0xbf4   :  { %2042 = vmatprep.subr.mxu0 %v5214_v42  ;;  %2152 = vmatprep.subr.mxu1 %v5206_v13  ;;  %6488 = vst [vmem:[#allocation44_spill] sm:$0xff] %v5230_v59  ;;  %v5234_v13 = vld [vmem:[#allocation16 + $0x110] sm:$0xff] }
 0xbf5   :  { %2043 = vmatpush2.msra.mxu0 %v5218_v27  ;;  %2153 = vmatpush2.msra.mxu1 %v5210_v37  ;;  %6489 = vst [vmem:[#allocation27_spill] sm:$0xff] %v5234_v13  ;;  %v1686_v37 = vpop.f32.mrf.mxu0 }
 0xbf6   :  { %2044 = vmatprep.subr.mxu0 %v5222_v1  ;;  %2154 = vmatprep.subr.mxu1 %v5214_v42 }
 0xbf7   :  { %2045 = vmatpush2.msra.mxu0 %v5226_v38  ;;  %2155 = vmatpush2.msra.mxu1 %v5218_v27  ;;  %v1690_v27 = vpop.f32.mrf.mxu0 }
 0xbf8   :  { %2046 = vmatprep.subr.mxu0 %v5230_v59  ;;  %2156 = vmatprep.subr.mxu1 %v5222_v1 }
 0xbf9   :  { %2047 = vmatpush2.msra.mxu0 %v5234_v13  ;;  %2157 = vmatpush2.msra.mxu1 %v5226_v38  ;;  %v1582_v38 = vld [vmem:[%s6031_s7] sm:$0x3]  ;;  %v5254_v1 = vpop.f32.mrf.mxu0 }
 0xbfa   :  { %2048 = vmatprep.subr.mxu0 %v5236_v11  ;;  %2158 = vmatprep.subr.mxu1 %v5230_v59  ;;  %6492 = vst [vmem:[#allocation49_spill] sm:$0xff] %v5254_v1 }
 0xbfb   :  { %2049 = vmatpush2.msra.mxu0 %v5238_v44  ;;  %2159 = vmatpush2.msra.mxu1 %v5234_v13  ;;  %v1696_v59 = vpop.f32.mrf.mxu0  ;;  %v5259_v13 = vrot.slane %v1582_v38, %v6494_v39 }
 0xbfc   :  { %2160 = vmatprep.subr.mxu1 %v5236_v11  ;;  %2210 = vmatprep.subr.mxu0 %v4965_v14 }
 0xbfd   :  { %2161 = vmatpush2.msra.mxu1 %v5238_v44  ;;  %6495 = vst [vmem:[#allocation51_spill] sm:$0xff] %v5259_v13  ;;  %v1697_v24 = vadd.f32 %v1696_v59, %v5259_v13  ;;  %v1691_v62 = vadd.f32 %v1690_v27, %v5259_v13  ;;  %v1685_v39 = vadd.f32 %v1684_v26, %v5259_v13 }
 0xbfe   :  { %2322 = vmatprep.subr.mxu1 %v4965_v14  ;;  %v1673_v26 = vadd.f32 %v5143_v53, %v5259_v13 }
 0xc05   :  { %v5256_v42 = vpop.f32.mrf.mxu1 }
 0xc06   :  { %6493 = vst [vmem:[#allocation50_spill] sm:$0xff] %v5256_v42  ;;  %v6501_v42 = vld [vmem:[#allocation64_spill] sm:$0xff] }
 0xc07   :  { %v5261_v11 = vpop.f32.mrf.mxu1  ;;  %v5274_v7 = vrot.slane %v1582_v38, %v6501_v42 }
 0xc08   :  { %6496 = vst [vmem:[#allocation52_spill] sm:$0xff] %v5261_v11 }
 0xc09   :  { %v1859_v3 = vpop.f32.mrf.mxu1  ;;  %6502 = vst [vmem:[#allocation81_spill] sm:$0xff] %v5274_v7  ;;  %v1687_v59 = vadd.f32 %v1686_v37, %v5274_v7  ;;  %v1675_v37 = vadd.f32 %v5162_v10, %v5274_v7 }
 0xc0a   :  { %v5264_v44 = vadd.f32 %v1859_v3, %v1697_v24  ;;  %v1679_v24 = vadd.f32 %v5183_v48, %v5259_v13 }
 0xc0b   :  { %v5266_v14 = vpop.f32.mrf.mxu1 }
 0xc0c   :  { %6497 = vst [vmem:[#allocation53_spill] sm:$0xff] %v5264_v44  ;;  %6498 = vst [vmem:[#allocation71_spill] sm:$0xff] %v5266_v14 }
 0xc0d   :  { %v1865_v52 = vpop.f32.mrf.mxu1 }
 0xc0e   :  { %v5269_v45 = vadd.f32 %v1865_v52, %v1691_v62  ;;  %v1681_v62 = vadd.f32 %v5203_v63, %v5274_v7 }
 0xc0f   :  { %v5271_v1 = vpop.f32.mrf.mxu1 }
 0xc10   :  { %6499 = vst [vmem:[#allocation72_spill] sm:$0xff] %v5269_v45  ;;  %6500 = vst [vmem:[#allocation82_spill] sm:$0xff] %v5271_v1  ;;  %v6527_v45 = vld [vmem:[#allocation37_spill] sm:$0xff]  ;;  %v6528_v1 = vld [vmem:[#allocation38_spill] sm:$0xff] }
 0xc11   :  { %v1871_v11 = vpop.f32.mrf.mxu1 }
 0xc12   :  { %v5278_v36 = vadd.f32 %v1871_v11, %v1685_v39 }
 0xc13   :  { %v1873_v3 = vpop.f32.mrf.mxu1 }
 0xc14   :  { %6503 = vst [vmem:[#allocation29_spill] sm:$0xff] %v5278_v36  ;;  %v5282_v27 = vadd.f32 %v1873_v3, %v1687_v59  ;;  %v1667_v59 = vadd.f32 %v5117_v34, %v5259_v13  ;;  %v6530_v36 = vld [vmem:[#allocation40_spill] sm:$0xff] }
 0xc15   :  { %v1877_v52 = vpop.f32.mrf.mxu1 }
 0xc16   :  { %6504 = vst [vmem:[#allocation28_spill] sm:$0xff] %v5282_v27  ;;  %v5286_v44 = vadd.f32 %v1877_v52, %v1679_v24  ;;  %v6529_v27 = vld [vmem:[#allocation39_spill] sm:$0xff] }
 0xc17   :  { %v1879_v42 = vpop.f32.mrf.mxu1 }
 0xc18   :  { %6505 = vst [vmem:[#allocation31_spill] sm:$0xff] %v5286_v44  ;;  %v5290_v38 = vadd.f32 %v1879_v42, %v1681_v62  ;;  %v6532_v44 = vld [vmem:[#allocation42_spill] sm:$0xff] }
 0xc19   :  { %v1883_v11 = vpop.f32.mrf.mxu1 }
 0xc1a   :  { %6506 = vst [vmem:[#allocation30_spill] sm:$0xff] %v5290_v38  ;;  %v5294_v39 = vadd.f32 %v1883_v11, %v1673_v26  ;;  %v6531_v38 = vld [vmem:[#allocation41_spill] sm:$0xff] }
 0xc1b   :  { %v1885_v48 = vpop.f32.mrf.mxu1 }
 0xc1c   :  { %6507 = vst [vmem:[#allocation46_spill] sm:$0xff] %v5294_v39  ;;  %v5298_v3 = vadd.f32 %v1885_v48, %v1675_v37  ;;  %v6534_v39 = vld [vmem:[#allocation44_spill] sm:$0xff] }
 0xc1d   :  { %v1889_v63 = vpop.f32.mrf.mxu1 }
 0xc1e   :  { %6508 = vst [vmem:[#allocation45_spill] sm:$0xff] %v5298_v3  ;;  %v5300_v24 = vadd.f32 %v1889_v63, %v1667_v59  ;;  %v6510_v63 = vmov 0.0   ;;  %v6533_v3 = vld [vmem:[#allocation43_spill] sm:$0xff] }
 0xc20   :  { %6509 = vst [vmem:[#allocation73_spill] sm:$0xff] %v5300_v24  ;;  %v6535_v24 = vld [vmem:[#allocation27_spill] sm:$0xff] }
 0xc60   :  { %v1486_v52 = vpop.permute.xlu0 %1485 }
 0xc62   :  { %v1488_v14 = vpop.permute.xlu1 %1487 }
 0xc63   :  { %v1489_v53 = vsel %vm690_vm0, %v1486_v52, %v1488_v14  ;;  %v1490_v62 = vsel %vm690_vm0, %v1488_v14, %v1486_v52  ;;  %v6514_v14 = vld [vmem:[#allocation61_spill] sm:$0xff]  ;;  %v6515_v52 = vld [vmem:[#allocation62_spill] sm:$0xff] }
 0xc64   :  { %v1491_v10 = vmul.f32 %v1489_v53, %v4937_v20  ;;  %v1492_v42 = vmul.f32 %v1490_v62, %v4939_v61  ;;  %v6512_v20 = vld [vmem:[#allocation59_spill] sm:$0xff]  ;;  %v6513_v61 = vld [vmem:[#allocation60_spill] sm:$0xff] }
 0xc66   :  { %v1494_v26 = vadd.f32 %v5190_v2, %v1491_v10  ;;  %v1495_v34 = vadd.f32 %v5190_v2, %v1492_v42  ;;  %v6511_v2 = vld [vmem:[#allocation57_spill] sm:$0xff]  ;;  %v6519_v42 = vld [vmem:[#allocation66_spill] sm:$0xff] }
 0xc67   :  { %v6518_v10 = vld [vmem:[#allocation65_spill] sm:$0xff] }
 0xc68   :  { %3319 = vtanh.f32 %v1494_v26  ;;  %v6520_v26 = vld [vmem:[#allocation67_spill] sm:$0xff] }
 0xc69   :  { %3321 = vtanh.f32 %v1495_v34  ;;  %v6521_v34 = vld [vmem:[#allocation69_spill] sm:$0xff] }
 0xc75   :  { %v3320_v11 = vpop.eup %3319 }
 0xc76   :  { %v3322_v37 = vpop.eup %3321  ;;  %v1498_v48 = vmul.f32 %v3320_v11, %v1490_v62  ;;  %v6517_v62 = vld [vmem:[#allocation70_spill] sm:$0xff]  ;;  %v6522_v11 = vld [vmem:[#allocation32_spill] sm:$0xff] }
 0xc77   :  { %v1499_v59 = vmul.f32 %v3322_v37, %v1489_v53  ;;  %v6516_v53 = vld [vmem:[#allocation68_spill] sm:$0xff]  ;;  %v6523_v37 = vld [vmem:[#allocation33_spill] sm:$0xff] }
 0xc79   :  { %1700 = vmatprep.mubr.f32.mxu0 %v1499_v59  ;;  %1893 = vmatprep.mubr.f32.mxu1 %v1499_v59  ;;  %v6525_v59 = vld [vmem:[#allocation35_spill] sm:$0xff] }
 0xc7a   :  { %1701 = vmatmul.mubr.f32.gmra.mxu0 %v1498_v48  ;;  %1894 = vmatmul.mubr.f32.gmra.mxu1 %v1498_v48  ;;  %v6524_v48 = vld [vmem:[#allocation34_spill] sm:$0xff] }
 0xc7b   :  { %2050 = vmatprep.mubr.f32.mxu0 %v6510_v63 }
 0xc7e   :  { %2051 = vmatmul.mubr.f32.vlgmr.msra.gmra.mxu0 %v6510_v63  ;;  %v6526_v63 = vld [vmem:[#allocation36_spill] sm:$0xff] }
 0xc7f   :  { %2211 = vmatpush1.msra.mxu0 %v4967_v15 }
 0xc80   :  { %2212 = vmatprep.subr.mxu0 %v4969_v16 }
 0xc81   :  { %2213 = vmatpush1.msra.mxu0 %v4972_v18 }
 0xc82   :  { %2214 = vmatprep.subr.mxu0 %v4976_v30 }
 0xc83   :  { %2215 = vmatpush1.msra.mxu0 %v4980_v25 }
 0xc84   :  { %2216 = vmatprep.subr.mxu0 %v4984_v46 }
 0xc85   :  { %2217 = vmatpush1.msra.mxu0 %v4988_v23 }
 0xc86   :  { %2218 = vmatprep.subr.mxu0 %v4992_v19 }
 0xc87   :  { %2219 = vmatpush1.msra.mxu0 %v4996_v31 }
 0xc88   :  { %2220 = vmatprep.subr.mxu0 %v5000_v33 }
 0xc89   :  { %2221 = vmatpush1.msra.mxu0 %v5004_v56 }
 0xc8a   :  { %2222 = vmatprep.subr.mxu0 %v5008_v43 }
 0xc8b   :  { %2223 = vmatpush1.msra.mxu0 %v5012_v22 }
 0xc8c   :  { %2224 = vmatprep.subr.mxu0 %v5016_v4 }
 0xc8d   :  { %2225 = vmatpush1.msra.mxu0 %v5020_v5 }
 0xc8e   :  { %2226 = vmatprep.subr.mxu0 %v5024_v6 }
 0xc8f   :  { %2227 = vmatpush1.msra.mxu0 %v5028_v8 }
 0xc90   :  { %2228 = vmatprep.subr.mxu0 %v5032_v9 }
 0xc91   :  { %2229 = vmatpush1.msra.mxu0 %v5036_v60 }
 0xc92   :  { %2230 = vmatprep.subr.mxu0 %v5040_v17 }
 0xc93   :  { %2231 = vmatpush1.msra.mxu0 %v5044_v32 }
 0xc94   :  { %2232 = vmatprep.subr.mxu0 %v5048_v41 }
 0xc95   :  { %2233 = vmatpush1.msra.mxu0 %v5052_v40 }
 0xc96   :  { %2234 = vmatprep.subr.mxu0 %v5056_v50 }
 0xc97   :  { %2235 = vmatpush1.msra.mxu0 %v5060_v47 }
 0xc98   :  { %2236 = vmatprep.subr.mxu0 %v5064_v0 }
 0xc99   :  { %2237 = vmatpush1.msra.mxu0 %v5068_v12 }
 0xc9a   :  { %2238 = vmatprep.subr.mxu0 %v5072_v58 }
 0xc9b   :  { %2239 = vmatpush1.msra.mxu0 %v5076_v55 }
 0xc9c   :  { %2240 = vmatprep.subr.mxu0 %v5080_v51 }
 0xc9d   :  { %2241 = vmatpush1.msra.mxu0 %v5084_v54 }
 0xc9e   :  { %2242 = vmatprep.subr.mxu0 %v5088_v49 }
 0xc9f   :  { %2243 = vmatpush2.msra.mxu0 %v5092_v28 }
 0xca0   :  { %2244 = vmatprep.subr.mxu0 %v5096_v29 }
 0xca1   :  { %2245 = vmatpush2.msra.mxu0 %v5100_v21 }
 0xca2   :  { %2246 = vmatprep.subr.mxu0 %v5119_v35 }
 0xca3   :  { %2247 = vmatpush2.msra.mxu0 %v6511_v2 }
 0xca4   :  { %2248 = vmatprep.subr.mxu0 %v6512_v20 }
 0xca5   :  { %2249 = vmatpush2.msra.mxu0 %v6513_v61 }
 0xca6   :  { %2250 = vmatprep.subr.mxu0 %v6514_v14 }
 0xca7   :  { %2251 = vmatpush2.msra.mxu0 %v6515_v52 }
 0xca8   :  { %2252 = vmatprep.subr.mxu0 %v6516_v53 }
 0xca9   :  { %2253 = vmatpush2.msra.mxu0 %v6517_v62 }
 0xcaa   :  { %2254 = vmatprep.subr.mxu0 %v6518_v10 }
 0xcab   :  { %2255 = vmatpush2.msra.mxu0 %v6519_v42 }
 0xcac   :  { %2256 = vmatprep.subr.mxu0 %v6520_v26 }
 0xcad   :  { %2257 = vmatpush2.msra.mxu0 %v6521_v34 }
 0xcae   :  { %2258 = vmatprep.subr.mxu0 %v6522_v11 }
 0xcaf   :  { %2259 = vmatpush2.msra.mxu0 %v6523_v37 }
 0xcb0   :  { %2260 = vmatprep.subr.mxu0 %v6524_v48 }
 0xcb1   :  { %2261 = vmatpush2.msra.mxu0 %v6525_v59  ;;  %v6536_v59 = vld [vmem:[#allocation47_spill] sm:$0xff] }
 0xcb2   :  { %2262 = vmatprep.subr.mxu0 %v6526_v63  ;;  %v6537_v63 = vld [vmem:[#allocation48_spill] sm:$0xff] }
 0xcb3   :  { %2263 = vmatpush2.msra.mxu0 %v6527_v45  ;;  %v6538_v45 = vld [vmem:[#allocation54_spill] sm:$0xff] }
 0xcb4   :  { %2264 = vmatprep.subr.mxu0 %v6528_v1  ;;  %v5376_v1 = vpop.f32.mrf.mxu0 }
 0xcb5   :  { %2265 = vmatpush2.msra.mxu0 %v6529_v27  ;;  %6539 = vst [vmem:[#allocation74_spill] sm:$0xff] %v5376_v1  ;;  %v5378_v27 = vpop.f32.mrf.mxu1  ;;  %v6545_v1 = vld [vmem:[#allocation77_spill] sm:$0xff] }
 0xcb6   :  { %2266 = vmatprep.subr.mxu0 %v6530_v36  ;;  %6540 = vst [vmem:[#allocation75_spill] sm:$0xff] %v5378_v27 }
 0xcb7   :  { %2267 = vmatpush2.msra.mxu0 %v6531_v38 }
 0xcb8   :  { %2268 = vmatprep.subr.mxu0 %v6532_v44  ;;  %v6542_v44 = vld [vmem:[#allocation55_spill] sm:$0xff] }
 0xcb9   :  { %2269 = vmatpush2.msra.mxu0 %v6533_v3  ;;  %v1661_v3 = vadd.f32 %v6542_v44, %v5259_v13 }
 0xcba   :  { %2270 = vmatprep.subr.mxu0 %v6534_v39 }
 0xcbb   :  { %2271 = vmatpush2.msra.mxu0 %v6535_v24  ;;  %v6544_v24 = vld [vmem:[#allocation56_spill] sm:$0xff] }
 0xcbc   :  { %2272 = vmatprep.subr.mxu0 %v6536_v59  ;;  %v1663_v59 = vadd.f32 %v6544_v24, %v5274_v7  ;;  %v6547_v24 = vld [vmem:[#allocation79_spill] sm:$0xff] }
 0xcbd   :  { %2273 = vmatpush2.msra.mxu0 %v6537_v63 }
 0xcbe   :  { %2434 = vmatprep.subr.mxu0 %v6538_v45 }
 0xd3a   :  { %v5380_v36 = vpop.f32.mrf.mxu0  ;;  %v1895_v38 = vpop.f32.mrf.mxu1 }
 0xd3b   :  { %6541 = vst [vmem:[#allocation76_spill] sm:$0xff] %v5380_v36  ;;  %v1984_v37 = vadd.f32 %v1895_v38, %v1661_v3  ;;  %v6546_v36 = vld [vmem:[#allocation78_spill] sm:$0xff] }
 0xd3c   :  { %v5384_v48 = vpop.f32.mrf.mxu0  ;;  %v1897_v39 = vpop.f32.mrf.mxu1 }
 0xd3d   :  { %6543 = vst [vmem:[#allocation63_spill] sm:$0xff] %v5384_v48  ;;  %v1985_v11 = vadd.f32 %v1897_v39, %v1663_v59 }
 0xd3e   :  { %v2052_v63 = vpop.f32.mrf.mxu0 }
 0xd3f   :  { %v2057_v45 = vadd.f32 %v2052_v63, %v1984_v37 }
 0xd40   :  { %v2054_v34 = vpop.f32.mrf.mxu0 }
 0xd41   :  { %v2059_v26 = vmul.f32 %v2057_v45, %v6545_v1  ;;  %v2058_v27 = vadd.f32 %v2054_v34, %v1985_v11 }
 0xd43   :  { %v3124_v42 = vmul.f32 -1.442695, %v2059_v26  ;;  %v2060_v10 = vmul.f32 %v2058_v27, %v6546_v36  ;;  %v6548_v27 = vld [vmem:[#allocation80_spill] sm:$0xff] }
 0xd45   :  { %3323 = vpow2.f32 %v3124_v42  ;;  %v3125_v62 = vmul.f32 -1.442695, %v2060_v10 }
 0xd47   :  { %3325 = vpow2.f32 %v3125_v62 }
 0xd52   :  { %v3324_v44 = vpop.eup %3323 }
 0xd53   :  { %v2067_v48 = vadd.f32 1.0, %v3324_v44 }
 0xd54   :  { %v3326_v13 = vpop.eup %3325 }
 0xd55   :  { %3327 = vrcp.f32 %v2067_v48  ;;  %v2068_v53 = vadd.f32 1.0, %v3326_v13 }
 0xd57   :  { %3329 = vrcp.f32 %v2068_v53 }
 0xd62   :  { %v3328_v38 = vpop.eup %3327 }
 0xd63   :  { %v2073_v39 = vmul.f32 %v3328_v38, %v6545_v1 }
 0xd64   :  { %v3330_v3 = vpop.eup %3329 }
 0xd65   :  { %v2075_v37 = vadd.f32 %v2073_v39, %v6547_v24  ;;  %v2074_v45 = vmul.f32 %v3330_v3, %v6546_v36  ;;  %v6551_v3 = vld [vmem:[#allocation68_spill] sm:$0xff] }
 0xd67   :  { %2077 = vrot.lane.b32.xlu0 %v2075_v37, %s3773_s9  ;;  %v2076_v42 = vadd.f32 %v2074_v45, %v6548_v27  ;;  %v6553_v45 = vld [vmem:[#allocation65_spill] sm:$0xff] }
 0xd69   :  { %2079 = vrot.lane.b32.xlu1 %v2076_v42, %s3773_s9  ;;  %v2085_v62 = vmul.f32 %v2076_v42, %v2075_v37  ;;  %v6552_v37 = vld [vmem:[#allocation70_spill] sm:$0xff] }
 0xd6a   :  { %v6554_v42 = vld [vmem:[#allocation66_spill] sm:$0xff] }
 0xdd9   :  { %v2078_v10 = vpop.permute.xlu0 %2077 }
 0xddb   :  { %v2080_v26 = vpop.permute.xlu1 %2079 }
 0xddc   :  { %v2081_v13 = vsel %vm690_vm0, %v2078_v10, %v2080_v26  ;;  %v2082_v53 = vsel %vm690_vm0, %v2080_v26, %v2078_v10  ;;  %v6556_v10 = vld [vmem:[#allocation69_spill] sm:$0xff]  ;;  %v6557_v26 = vld [vmem:[#allocation32_spill] sm:$0xff] }
 0xddd   :  { %v2083_v34 = vmul.f32 0.0, %v2081_v13  ;;  %v2084_v11 = vmul.f32 0.0, %v2082_v53 }
 0xddf   :  { %v5400_v48 = vadd.f32 %v2085_v62, %v2083_v34  ;;  %v5402_v59 = vadd.f32 %v2085_v62, %v2084_v11  ;;  %v6555_v62 = vld [vmem:[#allocation67_spill] sm:$0xff]  ;;  %v6561_v11 = vld [vmem:[#allocation36_spill] sm:$0xff] }
 0xde0   :  { %v6560_v34 = vld [vmem:[#allocation35_spill] sm:$0xff] }
 0xde1   :  { %3331 = vtanh.f32 %v5400_v48 }
 0xde2   :  { %3333 = vtanh.f32 %v5402_v59 }
 0xdee   :  { %v3332_v63 = vpop.eup %3331 }
 0xdef   :  { %v3334_v44 = vpop.eup %3333  ;;  %v5406_v38 = vmul.f32 %v3332_v63, %v2082_v53  ;;  %v6559_v53 = vld [vmem:[#allocation34_spill] sm:$0xff]  ;;  %v6562_v63 = vld [vmem:[#allocation37_spill] sm:$0xff] }
 0xdf0   :  { %v5408_v39 = vmul.f32 %v3334_v44, %v2081_v13  ;;  %v6558_v13 = vld [vmem:[#allocation33_spill] sm:$0xff]  ;;  %v6563_v44 = vld [vmem:[#allocation38_spill] sm:$0xff] }
 0xdf1   :  { %6549 = vst [vmem:[#allocation64_spill] sm:$0xff] %v5406_v38 }
 0xdf2   :  { %6550 = vst [vmem:[#allocation57_spill] sm:$0xff] %v5408_v39  ;;  %2162 = vmatprep.mubr.f32.mxu1 %v5408_v39  ;;  %v6565_v39 = vld [vmem:[#allocation40_spill] sm:$0xff] }
 0xdf3   :  { %2163 = vmatmul.mubr.f32.vlgmr.msra.gmra.mxu1 %v5406_v38  ;;  %v6564_v38 = vld [vmem:[#allocation39_spill] sm:$0xff] }
 0xdf4   :  { %2323 = vmatpush1.msra.mxu1 %v4967_v15 }
 0xdf5   :  { %2324 = vmatprep.subr.mxu1 %v4969_v16 }
 0xdf6   :  { %2325 = vmatpush1.msra.mxu1 %v4972_v18 }
 0xdf7   :  { %2326 = vmatprep.subr.mxu1 %v4976_v30 }
 0xdf8   :  { %2327 = vmatpush1.msra.mxu1 %v4980_v25 }
 0xdf9   :  { %2328 = vmatprep.subr.mxu1 %v4984_v46 }
 0xdfa   :  { %2329 = vmatpush1.msra.mxu1 %v4988_v23 }
 0xdfb   :  { %2330 = vmatprep.subr.mxu1 %v4992_v19 }
 0xdfc   :  { %2331 = vmatpush1.msra.mxu1 %v4996_v31 }
 0xdfd   :  { %2332 = vmatprep.subr.mxu1 %v5000_v33 }
 0xdfe   :  { %2333 = vmatpush1.msra.mxu1 %v5004_v56 }
 0xdff   :  { %2334 = vmatprep.subr.mxu1 %v5008_v43 }
 0xe00   :  { %2335 = vmatpush1.msra.mxu1 %v5012_v22 }
 0xe01   :  { %2336 = vmatprep.subr.mxu1 %v5016_v4 }
 0xe02   :  { %2337 = vmatpush1.msra.mxu1 %v5020_v5 }
 0xe03   :  { %2338 = vmatprep.subr.mxu1 %v5024_v6 }
 0xe04   :  { %2339 = vmatpush1.msra.mxu1 %v5028_v8 }
 0xe05   :  { %2340 = vmatprep.subr.mxu1 %v5032_v9 }
 0xe06   :  { %2341 = vmatpush1.msra.mxu1 %v5036_v60 }
 0xe07   :  { %2342 = vmatprep.subr.mxu1 %v5040_v17 }
 0xe08   :  { %2343 = vmatpush1.msra.mxu1 %v5044_v32 }
 0xe09   :  { %2344 = vmatprep.subr.mxu1 %v5048_v41 }
 0xe0a   :  { %2345 = vmatpush1.msra.mxu1 %v5052_v40 }
 0xe0b   :  { %2346 = vmatprep.subr.mxu1 %v5056_v50 }
 0xe0c   :  { %2347 = vmatpush1.msra.mxu1 %v5060_v47 }
 0xe0d   :  { %2348 = vmatprep.subr.mxu1 %v5064_v0 }
 0xe0e   :  { %2349 = vmatpush1.msra.mxu1 %v5068_v12 }
 0xe0f   :  { %2350 = vmatprep.subr.mxu1 %v5072_v58 }
 0xe10   :  { %2351 = vmatpush1.msra.mxu1 %v5076_v55 }
 0xe11   :  { %2352 = vmatprep.subr.mxu1 %v5080_v51 }
 0xe12   :  { %2353 = vmatpush1.msra.mxu1 %v5084_v54 }
 0xe13   :  { %2354 = vmatprep.subr.mxu1 %v5088_v49 }
 0xe14   :  { %2355 = vmatpush2.msra.mxu1 %v5092_v28 }
 0xe15   :  { %2356 = vmatprep.subr.mxu1 %v5096_v29 }
 0xe16   :  { %2357 = vmatpush2.msra.mxu1 %v5100_v21 }
 0xe17   :  { %2358 = vmatprep.subr.mxu1 %v5119_v35 }
 0xe18   :  { %2359 = vmatpush2.msra.mxu1 %v6511_v2 }
 0xe19   :  { %2360 = vmatprep.subr.mxu1 %v6512_v20 }
 0xe1a   :  { %2361 = vmatpush2.msra.mxu1 %v6513_v61 }
 0xe1b   :  { %2362 = vmatprep.subr.mxu1 %v6514_v14 }
 0xe1c   :  { %2363 = vmatpush2.msra.mxu1 %v6515_v52 }
 0xe1d   :  { %2364 = vmatprep.subr.mxu1 %v6551_v3 }
 0xe1e   :  { %2365 = vmatpush2.msra.mxu1 %v6552_v37 }
 0xe1f   :  { %2366 = vmatprep.subr.mxu1 %v6553_v45  ;;  %v6576_v45 = vld [vmem:[#allocation73_spill] sm:$0xff] }
 0xe20   :  { %2367 = vmatpush2.msra.mxu1 %v6554_v42  ;;  %v6575_v42 = vld [vmem:[#allocation75_spill] sm:$0xff] }
 0xe21   :  { %2368 = vmatprep.subr.mxu1 %v6555_v62  ;;  %v6566_v62 = vld [vmem:[#allocation41_spill] sm:$0xff] }
 0xe22   :  { %2369 = vmatpush2.msra.mxu1 %v6556_v10  ;;  %v6567_v10 = vld [vmem:[#allocation42_spill] sm:$0xff] }
 0xe23   :  { %2370 = vmatprep.subr.mxu1 %v6557_v26  ;;  %v6568_v26 = vld [vmem:[#allocation43_spill] sm:$0xff] }
 0xe24   :  { %2371 = vmatpush2.msra.mxu1 %v6558_v13  ;;  %v6569_v13 = vld [vmem:[#allocation44_spill] sm:$0xff] }
 0xe25   :  { %2372 = vmatprep.subr.mxu1 %v6559_v53  ;;  %v6570_v53 = vld [vmem:[#allocation27_spill] sm:$0xff] }
 0xe26   :  { %2373 = vmatpush2.msra.mxu1 %v6560_v34  ;;  %v6571_v34 = vld [vmem:[#allocation47_spill] sm:$0xff] }
 0xe27   :  { %2374 = vmatprep.subr.mxu1 %v6561_v11  ;;  %v6572_v11 = vld [vmem:[#allocation48_spill] sm:$0xff] }
 0xe28   :  { %2375 = vmatpush2.msra.mxu1 %v6562_v63  ;;  %v6573_v63 = vld [vmem:[#allocation54_spill] sm:$0xff] }
 0xe29   :  { %2376 = vmatprep.subr.mxu1 %v6563_v44 }
 0xe2a   :  { %2377 = vmatpush2.msra.mxu1 %v6564_v38  ;;  %v6574_v38 = vld [vmem:[#allocation58_spill] sm:$0xff] }
 0xe2b   :  { %2378 = vmatprep.subr.mxu1 %v6565_v39  ;;  %v1669_v44 = vadd.f32 %v6574_v38, %v5274_v7 }
 0xe2c   :  { %2379 = vmatpush2.msra.mxu1 %v6566_v62 }
 0xe2d   :  { %2380 = vmatprep.subr.mxu1 %v6567_v10  ;;  %v2097_v62 = vadd.f32 %v6575_v42, %v1669_v44 }
 0xe2e   :  { %2381 = vmatpush2.msra.mxu1 %v6568_v26 }
 0xe2f   :  { %2382 = vmatprep.subr.mxu1 %v6569_v13 }
 0xe30   :  { %2383 = vmatpush2.msra.mxu1 %v6570_v53 }
 0xe31   :  { %2384 = vmatprep.subr.mxu1 %v6571_v34 }
 0xe32   :  { %2385 = vmatpush2.msra.mxu1 %v6572_v11 }
 0xe33   :  { %2546 = vmatprep.subr.mxu1 %v6573_v63 }
 0xeb3   :  { %v2164_v39 = vpop.f32.mrf.mxu1 }
 0xeb4   :  { %v2169_v10 = vadd.f32 %v2164_v39, %v6576_v45 }
 0xeb5   :  { %v2166_v37 = vpop.f32.mrf.mxu1 }
 0xeb6   :  { %v2171_v26 = vmul.f32 %v2169_v10, %v6545_v1  ;;  %v2170_v13 = vadd.f32 %v2166_v37, %v2097_v62 }
 0xeb8   :  { %v3126_v3 = vmul.f32 -1.442695, %v2171_v26  ;;  %v2172_v53 = vmul.f32 %v2170_v13, %v6546_v36 }
 0xeba   :  { %3335 = vpow2.f32 %v3126_v3  ;;  %v3127_v34 = vmul.f32 -1.442695, %v2172_v53 }
 0xebc   :  { %3337 = vpow2.f32 %v3127_v34 }
 0xec7   :  { %v3336_v11 = vpop.eup %3335 }
 0xec8   :  { %v2179_v63 = vadd.f32 1.0, %v3336_v11 }
 0xec9   :  { %v3338_v52 = vpop.eup %3337 }
 0xeca   :  { %3339 = vrcp.f32 %v2179_v63  ;;  %v2180_v38 = vadd.f32 1.0, %v3338_v52 }
 0xecc   :  { %3341 = vrcp.f32 %v2180_v38 }
 0xed7   :  { %v3340_v7 = vpop.eup %3339 }
 0xed8   :  { %v2185_v42 = vmul.f32 %v3340_v7, %v6545_v1 }
 0xed9   :  { %v3342_v39 = vpop.eup %3341 }
 0xeda   :  { %v2187_v45 = vadd.f32 %v2185_v42, %v6547_v24  ;;  %v2186_v37 = vmul.f32 %v3342_v39, %v6546_v36 }
 0xedc   :  { %2189 = vrot.lane.b32.xlu0 %v2187_v45, %s3773_s9  ;;  %v2188_v3 = vadd.f32 %v2186_v37, %v6548_v27 }
 0xede   :  { %2191 = vrot.lane.b32.xlu1 %v2188_v3, %s3773_s9  ;;  %v2197_v62 = vmul.f32 %v2188_v3, %v2187_v45 }
 0xf4e   :  { %v2190_v10 = vpop.permute.xlu0 %2189 }
 0xf50   :  { %v2192_v26 = vpop.permute.xlu1 %2191 }
 0xf51   :  { %v2193_v52 = vsel %vm690_vm0, %v2190_v10, %v2192_v26  ;;  %v2194_v7 = vsel %vm690_vm0, %v2192_v26, %v2190_v10 }
 0xf52   :  { %v2195_v13 = vmul.f32 %v2193_v52, %v5400_v48  ;;  %v2196_v53 = vmul.f32 %v2194_v7, %v5402_v59 }
 0xf54   :  { %v5494_v34 = vadd.f32 %v2197_v62, %v2195_v13  ;;  %v5496_v11 = vadd.f32 %v2197_v62, %v2196_v53 }
 0xf56   :  { %3343 = vtanh.f32 %v5494_v34 }
 0xf57   :  { %3345 = vtanh.f32 %v5496_v11 }
 0xf63   :  { %v3344_v44 = vpop.eup %3343 }
 0xf64   :  { %v3346_v63 = vpop.eup %3345  ;;  %v2202_v38 = vmul.f32 %v3344_v44, %v2194_v7 }
 0xf65   :  { %v2203_v42 = vmul.f32 %v3346_v63, %v2193_v52 }
 0xf67   :  { %2274 = vmatprep.mubr.f32.mxu0 %v2203_v42 }
 0xf68   :  { %2275 = vmatmul.mubr.f32.vlgmr.msra.gmra.mxu0 %v2202_v38 }
 0xf69   :  { %2435 = vmatpush1.msra.mxu0 %v4967_v15  ;;  %v6577_v15 = vld [vmem:[#allocation62_spill] sm:$0xff] }
 0xf6a   :  { %2436 = vmatprep.subr.mxu0 %v4969_v16  ;;  %v6578_v16 = vld [vmem:[#allocation68_spill] sm:$0xff] }
 0xf6b   :  { %2437 = vmatpush1.msra.mxu0 %v4972_v18  ;;  %v6579_v18 = vld [vmem:[#allocation70_spill] sm:$0xff] }
 0xf6c   :  { %2438 = vmatprep.subr.mxu0 %v4976_v30  ;;  %v6580_v30 = vld [vmem:[#allocation65_spill] sm:$0xff] }
 0xf6d   :  { %2439 = vmatpush1.msra.mxu0 %v4980_v25  ;;  %v6581_v25 = vld [vmem:[#allocation66_spill] sm:$0xff] }
 0xf6e   :  { %2440 = vmatprep.subr.mxu0 %v4984_v46  ;;  %v6582_v46 = vld [vmem:[#allocation67_spill] sm:$0xff] }
 0xf6f   :  { %2441 = vmatpush1.msra.mxu0 %v4988_v23  ;;  %v6583_v23 = vld [vmem:[#allocation69_spill] sm:$0xff] }
 0xf70   :  { %2442 = vmatprep.subr.mxu0 %v4992_v19  ;;  %v6584_v19 = vld [vmem:[#allocation32_spill] sm:$0xff] }
 0xf71   :  { %2443 = vmatpush1.msra.mxu0 %v4996_v31  ;;  %v6585_v31 = vld [vmem:[#allocation33_spill] sm:$0xff] }
 0xf72   :  { %2444 = vmatprep.subr.mxu0 %v5000_v33  ;;  %v6586_v33 = vld [vmem:[#allocation34_spill] sm:$0xff] }
 0xf73   :  { %2445 = vmatpush1.msra.mxu0 %v5004_v56  ;;  %v6587_v56 = vld [vmem:[#allocation35_spill] sm:$0xff] }
 0xf74   :  { %2446 = vmatprep.subr.mxu0 %v5008_v43  ;;  %v6588_v43 = vld [vmem:[#allocation36_spill] sm:$0xff] }
 0xf75   :  { %2447 = vmatpush1.msra.mxu0 %v5012_v22  ;;  %v6589_v22 = vld [vmem:[#allocation37_spill] sm:$0xff] }
 0xf76   :  { %2448 = vmatprep.subr.mxu0 %v5016_v4  ;;  %v6590_v4 = vld [vmem:[#allocation38_spill] sm:$0xff] }
 0xf77   :  { %2449 = vmatpush1.msra.mxu0 %v5020_v5  ;;  %v6591_v5 = vld [vmem:[#allocation39_spill] sm:$0xff] }
 0xf78   :  { %2450 = vmatprep.subr.mxu0 %v5024_v6  ;;  %v6592_v6 = vld [vmem:[#allocation40_spill] sm:$0xff] }
 0xf79   :  { %2451 = vmatpush1.msra.mxu0 %v5028_v8  ;;  %v6593_v8 = vld [vmem:[#allocation41_spill] sm:$0xff] }
 0xf7a   :  { %2452 = vmatprep.subr.mxu0 %v5032_v9  ;;  %v6594_v9 = vld [vmem:[#allocation42_spill] sm:$0xff] }
 0xf7b   :  { %2453 = vmatpush1.msra.mxu0 %v5036_v60  ;;  %v6595_v60 = vld [vmem:[#allocation43_spill] sm:$0xff] }
 0xf7c   :  { %2454 = vmatprep.subr.mxu0 %v5040_v17  ;;  %v6596_v17 = vld [vmem:[#allocation44_spill] sm:$0xff] }
 0xf7d   :  { %2455 = vmatpush1.msra.mxu0 %v5044_v32  ;;  %v6597_v32 = vld [vmem:[#allocation27_spill] sm:$0xff] }
 0xf7e   :  { %2456 = vmatprep.subr.mxu0 %v5048_v41  ;;  %v6598_v41 = vld [vmem:[#allocation47_spill] sm:$0xff] }
 0xf7f   :  { %2457 = vmatpush1.msra.mxu0 %v5052_v40  ;;  %v6599_v40 = vld [vmem:[#allocation48_spill] sm:$0xff] }
 0xf80   :  { %2458 = vmatprep.subr.mxu0 %v5056_v50  ;;  %v5563_v50 = vld [vmem:[#allocation16 + $0xf8] sm:$0xff] }
 0xf81   :  { %2459 = vmatpush1.msra.mxu0 %v5060_v47 }
 0xf82   :  { %2460 = vmatprep.subr.mxu0 %v5064_v0  ;;  %v6600_v0 = vld [vmem:[#allocation46_spill] sm:$0xff] }
 0xf83   :  { %2461 = vmatpush1.msra.mxu0 %v5068_v12 }
 0xf84   :  { %2462 = vmatprep.subr.mxu0 %v5072_v58 }
 0xf85   :  { %2463 = vmatpush1.msra.mxu0 %v5076_v55 }
 0xf86   :  { %2464 = vmatprep.subr.mxu0 %v5080_v51  ;;  %v6601_v51 = vld [vmem:[#allocation45_spill] sm:$0xff] }
 0xf87   :  { %2465 = vmatpush1.msra.mxu0 %v5084_v54 }
 0xf88   :  { %2466 = vmatprep.subr.mxu0 %v5088_v49 }
 0xf89   :  { %2467 = vmatpush2.msra.mxu0 %v5092_v28 }
 0xf8a   :  { %2468 = vmatprep.subr.mxu0 %v5096_v29 }
 0xf8b   :  { %2469 = vmatpush2.msra.mxu0 %v5100_v21 }
 0xf8c   :  { %2470 = vmatprep.subr.mxu0 %v5119_v35 }
 0xf8d   :  { %2471 = vmatpush2.msra.mxu0 %v6511_v2 }
 0xf8e   :  { %2472 = vmatprep.subr.mxu0 %v6512_v20 }
 0xf8f   :  { %2473 = vmatpush2.msra.mxu0 %v6513_v61 }
 0xf90   :  { %2474 = vmatprep.subr.mxu0 %v6514_v14 }
 0xf91   :  { %2475 = vmatpush2.msra.mxu0 %v6577_v15 }
 0xf92   :  { %2476 = vmatprep.subr.mxu0 %v6578_v16 }
 0xf93   :  { %2477 = vmatpush2.msra.mxu0 %v6579_v18 }
 0xf94   :  { %2478 = vmatprep.subr.mxu0 %v6580_v30 }
 0xf95   :  { %2479 = vmatpush2.msra.mxu0 %v6581_v25 }
 0xf96   :  { %2480 = vmatprep.subr.mxu0 %v6582_v46 }
 0xf97   :  { %2481 = vmatpush2.msra.mxu0 %v6583_v23 }
 0xf98   :  { %2482 = vmatprep.subr.mxu0 %v6584_v19 }
 0xf99   :  { %2483 = vmatpush2.msra.mxu0 %v6585_v31 }
 0xf9a   :  { %2484 = vmatprep.subr.mxu0 %v6586_v33 }
 0xf9b   :  { %2485 = vmatpush2.msra.mxu0 %v6587_v56 }
 0xf9c   :  { %2486 = vmatprep.subr.mxu0 %v6588_v43 }
 0xf9d   :  { %2487 = vmatpush2.msra.mxu0 %v6589_v22 }
 0xf9e   :  { %2488 = vmatprep.subr.mxu0 %v6590_v4 }
 0xf9f   :  { %2489 = vmatpush2.msra.mxu0 %v6591_v5 }
 0xfa0   :  { %2490 = vmatprep.subr.mxu0 %v6592_v6 }
 0xfa1   :  { %2491 = vmatpush2.msra.mxu0 %v6593_v8 }
 0xfa2   :  { %2492 = vmatprep.subr.mxu0 %v6594_v9 }
 0xfa3   :  { %2493 = vmatpush2.msra.mxu0 %v6595_v60 }
 0xfa4   :  { %2494 = vmatprep.subr.mxu0 %v6596_v17 }
 0xfa5   :  { %2495 = vmatpush2.msra.mxu0 %v6597_v32 }
 0xfa6   :  { %2496 = vmatprep.subr.mxu0 %v6598_v41 }
 0xfa7   :  { %2497 = vmatpush2.msra.mxu0 %v6599_v40 }
 0xfa8   :  { %2658 = vmatprep.subr.mxu0 %v5563_v50 }
0x1028   :  { %v2276_v47 = vpop.f32.mrf.mxu0 }
0x1029   :  { %v2281_v12 = vadd.f32 %v2276_v47, %v6600_v0  ;;  %v5588_v47 = vld [vmem:[#allocation16 + $0xf0] sm:$0xff]  ;;  %v5597_v0 = vld [vmem:[#allocation16 + $0xd8] sm:$0xff] }
0x102a   :  { %v2278_v58 = vpop.f32.mrf.mxu0 }
0x102b   :  { %v2283_v55 = vmul.f32 %v2281_v12, %v6545_v1  ;;  %v2282_v54 = vadd.f32 %v2278_v58, %v6601_v51  ;;  %v5600_v12 = vld [vmem:[#allocation16 + $0xd0] sm:$0xff]  ;;  %v5603_v58 = vld [vmem:[#allocation16 + $0xc8] sm:$0xff]  ;;  %v5609_v51 = vld [vmem:[#allocation16 + $0xb8] sm:$0xff] }
0x102d   :  { %v3128_v49 = vmul.f32 -1.442695, %v2283_v55  ;;  %v2284_v28 = vmul.f32 %v2282_v54, %v6546_v36  ;;  %v5606_v55 = vld [vmem:[#allocation16 + $0xc0] sm:$0xff]  ;;  %v5612_v54 = vld [vmem:[#allocation16 + $0xb0] sm:$0xff] }
0x102f   :  { %3347 = vpow2.f32 %v3128_v49  ;;  %v3129_v29 = vmul.f32 -1.442695, %v2284_v28  ;;  %v5615_v49 = vld [vmem:[#allocation16 + $0xa8] sm:$0xff]  ;;  %v5618_v28 = vld [vmem:[#allocation16 + $0xa0] sm:$0xff] }
0x1031   :  { %3349 = vpow2.f32 %v3129_v29  ;;  %v5621_v29 = vld [vmem:[#allocation16 + $0x98] sm:$0xff] }
0x103c   :  { %v3348_v21 = vpop.eup %3347 }
0x103d   :  { %v2291_v35 = vadd.f32 1.0, %v3348_v21  ;;  %v5624_v21 = vld [vmem:[#allocation16 + $0x90] sm:$0xff] }
0x103e   :  { %v3350_v2 = vpop.eup %3349 }
0x103f   :  { %3351 = vrcp.f32 %v2291_v35  ;;  %v2292_v20 = vadd.f32 1.0, %v3350_v2  ;;  %v5627_v35 = vld [vmem:[#allocation16 + $0x88] sm:$0xff]  ;;  %v5630_v2 = vld [vmem:[#allocation16 + $0x80] sm:$0xff] }
0x1041   :  { %3353 = vrcp.f32 %v2292_v20  ;;  %v5633_v20 = vld [vmem:[#allocation16 + $0x78] sm:$0xff] }
0x104c   :  { %v3352_v61 = vpop.eup %3351 }
0x104d   :  { %v2297_v14 = vmul.f32 %v3352_v61, %v6545_v1  ;;  %v5636_v61 = vld [vmem:[#allocation16 + $0x70] sm:$0xff] }
0x104e   :  { %v3354_v48 = vpop.eup %3353 }
0x104f   :  { %v2299_v59 = vadd.f32 %v2297_v14, %v6547_v24  ;;  %v2298_v39 = vmul.f32 %v3354_v48, %v6546_v36  ;;  %v5639_v14 = vld [vmem:[#allocation16 + $0x68] sm:$0xff]  ;;  %v5642_v48 = vld [vmem:[#allocation16 + $0x60] sm:$0xff] }
0x1051   :  { %2301 = vrot.lane.b32.xlu0 %v2299_v59, %s3773_s9  ;;  %v2300_v45 = vadd.f32 %v2298_v39, %v6548_v27  ;;  %v5648_v39 = vld [vmem:[#allocation16 + $0x50] sm:$0xff] }
0x1053   :  { %2303 = vrot.lane.b32.xlu1 %v2300_v45, %s3773_s9  ;;  %v2309_v37 = vmul.f32 %v2300_v45, %v2299_v59  ;;  %v5645_v59 = vld [vmem:[#allocation16 + $0x58] sm:$0xff]  ;;  %v5651_v45 = vld [vmem:[#allocation16 + $0x48] sm:$0xff] }
0x10c3   :  { %v2302_v3 = vpop.permute.xlu0 %2301 }
0x10c5   :  { %v2304_v62 = vpop.permute.xlu1 %2303 }
0x10c6   :  { %v2305_v10 = vsel %vm690_vm0, %v2302_v3, %v2304_v62  ;;  %v2306_v26 = vsel %vm690_vm0, %v2304_v62, %v2302_v3  ;;  %v5657_v3 = vld [vmem:[#allocation16 + $0x38] sm:$0xff]  ;;  %v5660_v62 = vld [vmem:[#allocation16 + $0x30] sm:$0xff] }
0x10c7   :  { %v2307_v52 = vmul.f32 %v2305_v10, %v5494_v34  ;;  %v2308_v7 = vmul.f32 %v2306_v26, %v5496_v11  ;;  %v5591_v34 = vld [vmem:[#allocation16 + $0xe8] sm:$0xff]  ;;  %v5594_v11 = vld [vmem:[#allocation16 + $0xe0] sm:$0xff] }
0x10c9   :  { %v5582_v13 = vadd.f32 %v2309_v37, %v2307_v52  ;;  %v5584_v53 = vadd.f32 %v2309_v37, %v2308_v7  ;;  %v5654_v37 = vld [vmem:[#allocation16 + $0x40] sm:$0xff]  ;;  %v5669_v52 = vld [vmem:[#allocation16 + $0x18] sm:$0xff]  ;;  %v5672_v7 = vld [vmem:[#allocation16 + $0x10] sm:$0xff] }
0x10ca   :  { %6602 = vst [vmem:[#allocation59_spill] sm:$0xff] %v5669_v52  ;;  %6603 = vst [vmem:[#allocation60_spill] sm:$0xff] %v5672_v7 }
0x10cb   :  { %3355 = vtanh.f32 %v5582_v13 }
0x10cc   :  { %3357 = vtanh.f32 %v5584_v53 }
0x10d8   :  { %v3356_v44 = vpop.eup %3355 }
0x10d9   :  { %v3358_v63 = vpop.eup %3357  ;;  %v2314_v38 = vmul.f32 %v3356_v44, %v2306_v26  ;;  %v5666_v26 = vld [vmem:[#allocation16 + $0x20] sm:$0xff]  ;;  %v5675_v44 = vld [vmem:[#allocation16 + $0x8] sm:$0xff] }
0x10da   :  { %v2315_v42 = vmul.f32 %v3358_v63, %v2305_v10  ;;  %v5663_v10 = vld [vmem:[#allocation16 + $0x28] sm:$0xff]  ;;  %6604 = vst [vmem:[#allocation61_spill] sm:$0xff] %v5675_v44  ;;  %v5678_v63 = vld [vmem:[#allocation16] sm:$0xff] }
0x10db   :  { %6605 = vst [vmem:[#allocation55_spill] sm:$0xff] %v5678_v63 }
0x10dc   :  { %2386 = vmatprep.mubr.f32.mxu1 %v2315_v42  ;;  %v5684_v42 = vld [vmem:[#allocation16 + $0x1f0] sm:$0xff] }
0x10dd   :  { %2387 = vmatmul.mubr.f32.vlgmr.msra.gmra.mxu1 %v2314_v38  ;;  %v5681_v38 = vld [vmem:[#allocation16 + $0x1f8] sm:$0xff]  ;;  %6607 = vst [vmem:[#allocation77_spill] sm:$0xff] %v5684_v42 }
0x10de   :  { %2547 = vmatpush1.msra.mxu1 %v5588_v47  ;;  %6606 = vst [vmem:[#allocation56_spill] sm:$0xff] %v5681_v38 }
0x10df   :  { %2548 = vmatprep.subr.mxu1 %v5591_v34 }
0x10e0   :  { %2549 = vmatpush1.msra.mxu1 %v5594_v11 }
0x10e1   :  { %2550 = vmatprep.subr.mxu1 %v5597_v0 }
0x10e2   :  { %2551 = vmatpush1.msra.mxu1 %v5600_v12 }
0x10e3   :  { %2552 = vmatprep.subr.mxu1 %v5603_v58 }
0x10e4   :  { %2553 = vmatpush1.msra.mxu1 %v5606_v55 }
0x10e5   :  { %2554 = vmatprep.subr.mxu1 %v5609_v51 }
0x10e6   :  { %2555 = vmatpush1.msra.mxu1 %v5612_v54 }
0x10e7   :  { %2556 = vmatprep.subr.mxu1 %v5615_v49 }
0x10e8   :  { %2557 = vmatpush1.msra.mxu1 %v5618_v28 }
0x10e9   :  { %2558 = vmatprep.subr.mxu1 %v5621_v29 }
0x10ea   :  { %2559 = vmatpush1.msra.mxu1 %v5624_v21 }
0x10eb   :  { %2560 = vmatprep.subr.mxu1 %v5627_v35 }
0x10ec   :  { %2561 = vmatpush1.msra.mxu1 %v5630_v2 }
0x10ed   :  { %2562 = vmatprep.subr.mxu1 %v5633_v20 }
0x10ee   :  { %2563 = vmatpush1.msra.mxu1 %v5636_v61 }
0x10ef   :  { %2564 = vmatprep.subr.mxu1 %v5639_v14 }
0x10f0   :  { %2565 = vmatpush1.msra.mxu1 %v5642_v48 }
0x10f1   :  { %2566 = vmatprep.subr.mxu1 %v5645_v59 }
0x10f2   :  { %2567 = vmatpush1.msra.mxu1 %v5648_v39 }
0x10f3   :  { %2568 = vmatprep.subr.mxu1 %v5651_v45 }
0x10f4   :  { %2569 = vmatpush1.msra.mxu1 %v5654_v37 }
0x10f5   :  { %2570 = vmatprep.subr.mxu1 %v5657_v3 }
0x10f6   :  { %2571 = vmatpush1.msra.mxu1 %v5660_v62 }
0x10f7   :  { %2572 = vmatprep.subr.mxu1 %v5663_v10 }
0x10f8   :  { %2573 = vmatpush1.msra.mxu1 %v5666_v26 }
0x10f9   :  { %2574 = vmatprep.subr.mxu1 %v5669_v52  ;;  %v5687_v52 = vld [vmem:[#allocation16 + $0x1e8] sm:$0xff] }
0x10fa   :  { %2575 = vmatpush1.msra.mxu1 %v5672_v7  ;;  %6608 = vst [vmem:[#allocation78_spill] sm:$0xff] %v5687_v52  ;;  %v5690_v7 = vld [vmem:[#allocation16 + $0x1e0] sm:$0xff] }
0x10fb   :  { %2576 = vmatprep.subr.mxu1 %v5675_v44  ;;  %v5693_v44 = vld [vmem:[#allocation16 + $0x1d8] sm:$0xff] }
0x10fc   :  { %2577 = vmatpush1.msra.mxu1 %v5678_v63  ;;  %v5696_v63 = vld [vmem:[#allocation16 + $0x1d0] sm:$0xff] }
0x10fd   :  { %2578 = vmatprep.subr.mxu1 %v5681_v38  ;;  %v5699_v38 = vld [vmem:[#allocation16 + $0x1c8] sm:$0xff] }
0x10fe   :  { %2579 = vmatpush2.msra.mxu1 %v5684_v42  ;;  %v5702_v42 = vld [vmem:[#allocation16 + $0x1c0] sm:$0xff] }
0x10ff   :  { %2580 = vmatprep.subr.mxu1 %v5687_v52  ;;  %v5705_v52 = vld [vmem:[#allocation16 + $0x1b8] sm:$0xff] }
0x1100   :  { %2581 = vmatpush2.msra.mxu1 %v5690_v7 }
0x1101   :  { %2582 = vmatprep.subr.mxu1 %v5693_v44 }
0x1102   :  { %2583 = vmatpush2.msra.mxu1 %v5696_v63 }
0x1103   :  { %2584 = vmatprep.subr.mxu1 %v5699_v38 }
0x1104   :  { %2585 = vmatpush2.msra.mxu1 %v5702_v42 }
0x1105   :  { %2586 = vmatprep.subr.mxu1 %v5705_v52 }
0x1106   :  { %2587 = vmatpush2.msra.mxu1 %v6577_v15 }
0x1107   :  { %2588 = vmatprep.subr.mxu1 %v6578_v16  ;;  %v6609_v16 = vld [vmem:[#allocation31_spill] sm:$0xff] }
0x1108   :  { %2589 = vmatpush2.msra.mxu1 %v6579_v18 }
0x1109   :  { %2590 = vmatprep.subr.mxu1 %v6580_v30 }
0x110a   :  { %2591 = vmatpush2.msra.mxu1 %v6581_v25 }
0x110b   :  { %2592 = vmatprep.subr.mxu1 %v6582_v46  ;;  %v6610_v46 = vld [vmem:[#allocation30_spill] sm:$0xff] }
0x110c   :  { %2593 = vmatpush2.msra.mxu1 %v6583_v23 }
0x110d   :  { %2594 = vmatprep.subr.mxu1 %v6584_v19 }
0x110e   :  { %2595 = vmatpush2.msra.mxu1 %v6585_v31 }
0x110f   :  { %2596 = vmatprep.subr.mxu1 %v6586_v33 }
0x1110   :  { %2597 = vmatpush2.msra.mxu1 %v6587_v56 }
0x1111   :  { %2598 = vmatprep.subr.mxu1 %v6588_v43 }
0x1112   :  { %2599 = vmatpush2.msra.mxu1 %v6589_v22 }
0x1113   :  { %2600 = vmatprep.subr.mxu1 %v6590_v4 }
0x1114   :  { %2601 = vmatpush2.msra.mxu1 %v6591_v5 }
0x1115   :  { %2602 = vmatprep.subr.mxu1 %v6592_v6 }
0x1116   :  { %2603 = vmatpush2.msra.mxu1 %v6593_v8 }
0x1117   :  { %2604 = vmatprep.subr.mxu1 %v6594_v9 }
0x1118   :  { %2605 = vmatpush2.msra.mxu1 %v6595_v60 }
0x1119   :  { %2606 = vmatprep.subr.mxu1 %v6596_v17 }
0x111a   :  { %2607 = vmatpush2.msra.mxu1 %v6597_v32 }
0x111b   :  { %2608 = vmatprep.subr.mxu1 %v6598_v41 }
0x111c   :  { %2609 = vmatpush2.msra.mxu1 %v6599_v40 }
0x111d   :  { %2770 = vmatprep.subr.mxu1 %v5563_v50 }
0x119d   :  { %v2388_v15 = vpop.f32.mrf.mxu1 }
0x119e   :  { %v2393_v18 = vadd.f32 %v2388_v15, %v6609_v16 }
0x119f   :  { %v2390_v30 = vpop.f32.mrf.mxu1 }
0x11a0   :  { %v2395_v25 = vmul.f32 %v2393_v18, %v6545_v1  ;;  %v2394_v23 = vadd.f32 %v2390_v30, %v6610_v46 }
0x11a2   :  { %v3130_v19 = vmul.f32 -1.442695, %v2395_v25  ;;  %v2396_v31 = vmul.f32 %v2394_v23, %v6546_v36 }
0x11a4   :  { %3359 = vpow2.f32 %v3130_v19  ;;  %v3131_v33 = vmul.f32 -1.442695, %v2396_v31 }
0x11a6   :  { %3361 = vpow2.f32 %v3131_v33  ;;  %v6613_v33 = vld [vmem:[#allocation61_spill] sm:$0xff] }
0x11b1   :  { %v3360_v56 = vpop.eup %3359 }
0x11b2   :  { %v2403_v43 = vadd.f32 1.0, %v3360_v56  ;;  %v6614_v56 = vld [vmem:[#allocation55_spill] sm:$0xff] }
0x11b3   :  { %v3362_v22 = vpop.eup %3361 }
0x11b4   :  { %3363 = vrcp.f32 %v2403_v43  ;;  %v2404_v4 = vadd.f32 1.0, %v3362_v22  ;;  %v6615_v43 = vld [vmem:[#allocation56_spill] sm:$0xff]  ;;  %v6616_v22 = vld [vmem:[#allocation77_spill] sm:$0xff] }
0x11b6   :  { %3365 = vrcp.f32 %v2404_v4  ;;  %v6617_v4 = vld [vmem:[#allocation78_spill] sm:$0xff] }
0x11c1   :  { %v3364_v5 = vpop.eup %3363 }
0x11c2   :  { %v2409_v6 = vmul.f32 %v3364_v5, %v6545_v1  ;;  %v5794_v5 = vld [vmem:[#allocation16 + $0x1b0] sm:$0xff] }
0x11c3   :  { %v3366_v8 = vpop.eup %3365 }
0x11c4   :  { %v2411_v9 = vadd.f32 %v2409_v6, %v6547_v24  ;;  %v2410_v60 = vmul.f32 %v3366_v8, %v6546_v36  ;;  %v5797_v6 = vld [vmem:[#allocation16 + $0x1a8] sm:$0xff]  ;;  %v5800_v8 = vld [vmem:[#allocation16 + $0x1a0] sm:$0xff] }
0x11c5   :  { %6618 = vst [vmem:[#allocation79_spill] sm:$0xff] %v5800_v8 }
0x11c6   :  { %2413 = vrot.lane.b32.xlu0 %v2411_v9, %s3773_s9  ;;  %v2412_v17 = vadd.f32 %v2410_v60, %v6548_v27  ;;  %v5806_v60 = vld [vmem:[#allocation16 + $0x190] sm:$0xff] }
0x11c7   :  { %6620 = vst [vmem:[#allocation54_spill] sm:$0xff] %v5806_v60 }
0x11c8   :  { %2415 = vrot.lane.b32.xlu1 %v2412_v17, %s3773_s9  ;;  %v2421_v32 = vmul.f32 %v2412_v17, %v2411_v9  ;;  %v5803_v9 = vld [vmem:[#allocation16 + $0x198] sm:$0xff]  ;;  %v5809_v17 = vld [vmem:[#allocation16 + $0x188] sm:$0xff] }
0x11c9   :  { %6619 = vst [vmem:[#allocation80_spill] sm:$0xff] %v5803_v9  ;;  %6621 = vst [vmem:[#allocation58_spill] sm:$0xff] %v5809_v17 }
0x1238   :  { %v2414_v41 = vpop.permute.xlu0 %2413 }
0x123a   :  { %v2416_v40 = vpop.permute.xlu1 %2415 }
0x123b   :  { %v2417_v50 = vsel %vm690_vm0, %v2414_v41, %v2416_v40  ;;  %v2418_v15 = vsel %vm690_vm0, %v2416_v40, %v2414_v41  ;;  %v5815_v41 = vld [vmem:[#allocation16 + $0x178] sm:$0xff]  ;;  %v5818_v40 = vld [vmem:[#allocation16 + $0x170] sm:$0xff] }
0x123c   :  { %v2419_v16 = vmul.f32 %v2417_v50, %v5582_v13  ;;  %v2420_v18 = vmul.f32 %v2418_v15, %v5584_v53  ;;  %v6611_v13 = vld [vmem:[#allocation59_spill] sm:$0xff]  ;;  %v6612_v53 = vld [vmem:[#allocation60_spill] sm:$0xff]  ;;  %6623 = vst [vmem:[#allocation73_spill] sm:$0xff] %v5815_v41  ;;  %6624 = vst [vmem:[#allocation62_spill] sm:$0xff] %v5818_v40 }
0x123e   :  { %v5748_v30 = vadd.f32 %v2421_v32, %v2419_v16  ;;  %v5750_v25 = vadd.f32 %v2421_v32, %v2420_v18  ;;  %v5812_v32 = vld [vmem:[#allocation16 + $0x180] sm:$0xff]  ;;  %v5827_v16 = vld [vmem:[#allocation16 + $0x158] sm:$0xff]  ;;  %v5830_v18 = vld [vmem:[#allocation16 + $0x150] sm:$0xff] }
0x123f   :  { %6622 = vst [vmem:[#allocation75_spill] sm:$0xff] %v5812_v32  ;;  %6627 = vst [vmem:[#allocation65_spill] sm:$0xff] %v5827_v16 }
0x1240   :  { %3367 = vtanh.f32 %v5748_v30  ;;  %6628 = vst [vmem:[#allocation66_spill] sm:$0xff] %v5830_v18 }
0x1241   :  { %3369 = vtanh.f32 %v5750_v25 }
0x124d   :  { %v3368_v46 = vpop.eup %3367 }
0x124e   :  { %v3370_v23 = vpop.eup %3369  ;;  %v2426_v19 = vmul.f32 %v3368_v46, %v2418_v15  ;;  %v5824_v15 = vld [vmem:[#allocation16 + $0x160] sm:$0xff]  ;;  %v5833_v46 = vld [vmem:[#allocation16 + $0x148] sm:$0xff] }
0x124f   :  { %v2427_v31 = vmul.f32 %v3370_v23, %v2417_v50  ;;  %v5821_v50 = vld [vmem:[#allocation16 + $0x168] sm:$0xff]  ;;  %6626 = vst [vmem:[#allocation70_spill] sm:$0xff] %v5824_v15  ;;  %6629 = vst [vmem:[#allocation67_spill] sm:$0xff] %v5833_v46  ;;  %v5836_v23 = vld [vmem:[#allocation16 + $0x140] sm:$0xff] }
0x1250   :  { %6625 = vst [vmem:[#allocation68_spill] sm:$0xff] %v5821_v50  ;;  %6630 = vst [vmem:[#allocation69_spill] sm:$0xff] %v5836_v23 }
0x1251   :  { %2498 = vmatprep.mubr.f32.mxu0 %v2427_v31  ;;  %v5842_v31 = vld [vmem:[#allocation16 + $0x130] sm:$0xff] }
0x1252   :  { %2499 = vmatmul.mubr.f32.vlgmr.msra.gmra.mxu0 %v2426_v19  ;;  %v5839_v19 = vld [vmem:[#allocation16 + $0x138] sm:$0xff]  ;;  %6632 = vst [vmem:[#allocation33_spill] sm:$0xff] %v5842_v31 }
0x1253   :  { %2659 = vmatpush1.msra.mxu0 %v5588_v47  ;;  %6631 = vst [vmem:[#allocation32_spill] sm:$0xff] %v5839_v19 }
0x1254   :  { %2660 = vmatprep.subr.mxu0 %v5591_v34 }
0x1255   :  { %2661 = vmatpush1.msra.mxu0 %v5594_v11 }
0x1256   :  { %2662 = vmatprep.subr.mxu0 %v5597_v0 }
0x1257   :  { %2663 = vmatpush1.msra.mxu0 %v5600_v12 }
0x1258   :  { %2664 = vmatprep.subr.mxu0 %v5603_v58 }
0x1259   :  { %2665 = vmatpush1.msra.mxu0 %v5606_v55 }
0x125a   :  { %2666 = vmatprep.subr.mxu0 %v5609_v51 }
0x125b   :  { %2667 = vmatpush1.msra.mxu0 %v5612_v54 }
0x125c   :  { %2668 = vmatprep.subr.mxu0 %v5615_v49 }
0x125d   :  { %2669 = vmatpush1.msra.mxu0 %v5618_v28 }
0x125e   :  { %2670 = vmatprep.subr.mxu0 %v5621_v29 }
0x125f   :  { %2671 = vmatpush1.msra.mxu0 %v5624_v21 }
0x1260   :  { %2672 = vmatprep.subr.mxu0 %v5627_v35 }
0x1261   :  { %2673 = vmatpush1.msra.mxu0 %v5630_v2 }
0x1262   :  { %2674 = vmatprep.subr.mxu0 %v5633_v20 }
0x1263   :  { %2675 = vmatpush1.msra.mxu0 %v5636_v61 }
0x1264   :  { %2676 = vmatprep.subr.mxu0 %v5639_v14 }
0x1265   :  { %2677 = vmatpush1.msra.mxu0 %v5642_v48 }
0x1266   :  { %2678 = vmatprep.subr.mxu0 %v5645_v59 }
0x1267   :  { %2679 = vmatpush1.msra.mxu0 %v5648_v39 }
0x1268   :  { %2680 = vmatprep.subr.mxu0 %v5651_v45 }
0x1269   :  { %2681 = vmatpush1.msra.mxu0 %v5654_v37 }
0x126a   :  { %2682 = vmatprep.subr.mxu0 %v5657_v3 }
0x126b   :  { %2683 = vmatpush1.msra.mxu0 %v5660_v62 }
0x126c   :  { %2684 = vmatprep.subr.mxu0 %v5663_v10 }
0x126d   :  { %2685 = vmatpush1.msra.mxu0 %v5666_v26 }
0x126e   :  { %2686 = vmatprep.subr.mxu0 %v6611_v13 }
0x126f   :  { %2687 = vmatpush1.msra.mxu0 %v6612_v53 }
0x1270   :  { %2688 = vmatprep.subr.mxu0 %v6613_v33 }
0x1271   :  { %2689 = vmatpush1.msra.mxu0 %v6614_v56 }
0x1272   :  { %2690 = vmatprep.subr.mxu0 %v6615_v43 }
0x1273   :  { %2691 = vmatpush2.msra.mxu0 %v6616_v22 }
0x1274   :  { %2692 = vmatprep.subr.mxu0 %v6617_v4 }
0x1275   :  { %2693 = vmatpush2.msra.mxu0 %v5690_v7 }
0x1276   :  { %2694 = vmatprep.subr.mxu0 %v5693_v44 }
0x1277   :  { %2695 = vmatpush2.msra.mxu0 %v5696_v63 }
0x1278   :  { %2696 = vmatprep.subr.mxu0 %v5699_v38 }
0x1279   :  { %2697 = vmatpush2.msra.mxu0 %v5702_v42 }
0x127a   :  { %2698 = vmatprep.subr.mxu0 %v5705_v52 }
0x127b   :  { %2699 = vmatpush2.msra.mxu0 %v5794_v5 }
0x127c   :  { %2700 = vmatprep.subr.mxu0 %v5797_v6 }
0x127d   :  { %2701 = vmatpush2.msra.mxu0 %v5800_v8 }
0x127e   :  { %2702 = vmatprep.subr.mxu0 %v5803_v9 }
0x127f   :  { %2703 = vmatpush2.msra.mxu0 %v5806_v60 }
0x1280   :  { %2704 = vmatprep.subr.mxu0 %v5809_v17 }
0x1281   :  { %2705 = vmatpush2.msra.mxu0 %v5812_v32 }
0x1282   :  { %2706 = vmatprep.subr.mxu0 %v5815_v41  ;;  %v6640_v41 = vld [vmem:[#allocation28_spill] sm:$0xff] }
0x1283   :  { %2707 = vmatpush2.msra.mxu0 %v5818_v40 }
0x1284   :  { %2708 = vmatprep.subr.mxu0 %v5821_v50 }
0x1285   :  { %2709 = vmatpush2.msra.mxu0 %v5824_v15  ;;  %v6639_v15 = vld [vmem:[#allocation29_spill] sm:$0xff] }
0x1286   :  { %2710 = vmatprep.subr.mxu0 %v5827_v16  ;;  %v5845_v16 = vld [vmem:[#allocation16 + $0x128] sm:$0xff] }
0x1287   :  { %2711 = vmatpush2.msra.mxu0 %v5830_v18  ;;  %6633 = vst [vmem:[#allocation34_spill] sm:$0xff] %v5845_v16  ;;  %v5848_v18 = vld [vmem:[#allocation16 + $0x120] sm:$0xff] }
0x1288   :  { %2712 = vmatprep.subr.mxu0 %v5833_v46  ;;  %6634 = vst [vmem:[#allocation35_spill] sm:$0xff] %v5848_v18  ;;  %v5851_v46 = vld [vmem:[#allocation16 + $0x118] sm:$0xff] }
0x1289   :  { %2713 = vmatpush2.msra.mxu0 %v5836_v23  ;;  %6635 = vst [vmem:[#allocation36_spill] sm:$0xff] %v5851_v46  ;;  %v5854_v23 = vld [vmem:[#allocation16 + $0x110] sm:$0xff] }
0x128a   :  { %2714 = vmatprep.subr.mxu0 %v5839_v19  ;;  %6636 = vst [vmem:[#allocation37_spill] sm:$0xff] %v5854_v23  ;;  %v5857_v19 = vld [vmem:[#allocation16 + $0x108] sm:$0xff] }
0x128b   :  { %2715 = vmatpush2.msra.mxu0 %v5842_v31  ;;  %6637 = vst [vmem:[#allocation38_spill] sm:$0xff] %v5857_v19  ;;  %v5860_v31 = vld [vmem:[#allocation16 + $0x100] sm:$0xff] }
0x128c   :  { %2716 = vmatprep.subr.mxu0 %v5845_v16  ;;  %6638 = vst [vmem:[#allocation39_spill] sm:$0xff] %v5860_v31 }
0x128d   :  { %2717 = vmatpush2.msra.mxu0 %v5848_v18 }
0x128e   :  { %2718 = vmatprep.subr.mxu0 %v5851_v46 }
0x128f   :  { %2719 = vmatpush2.msra.mxu0 %v5854_v23 }
0x1290   :  { %2720 = vmatprep.subr.mxu0 %v5857_v19 }
0x1291   :  { %2721 = vmatpush2.msra.mxu0 %v5860_v31 }
0x1312   :  { %v2500_v16 = vpop.f32.mrf.mxu0 }
0x1313   :  { %v2505_v50 = vadd.f32 %v2500_v16, %v6639_v15 }
0x1314   :  { %v2502_v18 = vpop.f32.mrf.mxu0 }
0x1315   :  { %v2507_v40 = vmul.f32 %v2505_v50, %v6545_v1  ;;  %v2506_v46 = vadd.f32 %v2502_v18, %v6640_v41 }
0x1317   :  { %v3132_v32 = vmul.f32 -1.442695, %v2507_v40  ;;  %v2508_v17 = vmul.f32 %v2506_v46, %v6546_v36 }
0x1319   :  { %3371 = vpow2.f32 %v3132_v32  ;;  %v3133_v23 = vmul.f32 -1.442695, %v2508_v17 }
0x131b   :  { %3373 = vpow2.f32 %v3133_v23 }
0x1326   :  { %v3372_v60 = vpop.eup %3371 }
0x1327   :  { %v2515_v19 = vadd.f32 1.0, %v3372_v60 }
0x1328   :  { %v3374_v9 = vpop.eup %3373 }
0x1329   :  { %3375 = vrcp.f32 %v2515_v19  ;;  %v2516_v8 = vadd.f32 1.0, %v3374_v9 }
0x132b   :  { %3377 = vrcp.f32 %v2516_v8 }
0x1336   :  { %v3376_v31 = vpop.eup %3375 }
0x1337   :  { %v2521_v15 = vmul.f32 %v3376_v31, %v6545_v1 }
0x1338   :  { %v3378_v16 = vpop.eup %3377 }
0x1339   :  { %v2523_v50 = vadd.f32 %v2521_v15, %v6547_v24  ;;  %v2522_v41 = vmul.f32 %v3378_v16, %v6546_v36 }
0x133b   :  { %2525 = vrot.lane.b32.xlu0 %v2523_v50, %s3773_s9  ;;  %v2524_v32 = vadd.f32 %v2522_v41, %v6548_v27 }
0x133d   :  { %2527 = vrot.lane.b32.xlu1 %v2524_v32, %s3773_s9  ;;  %v2533_v17 = vmul.f32 %v2524_v32, %v2523_v50 }
0x13ad   :  { %v2526_v60 = vpop.permute.xlu0 %2525 }
0x13af   :  { %v2528_v40 = vpop.permute.xlu1 %2527 }
0x13b0   :  { %v2529_v8 = vsel %vm690_vm0, %v2526_v60, %v2528_v40  ;;  %v2530_v9 = vsel %vm690_vm0, %v2528_v40, %v2526_v60 }
0x13b1   :  { %v2531_v18 = vmul.f32 %v2529_v8, %v5748_v30  ;;  %v2532_v46 = vmul.f32 %v2530_v9, %v5750_v25 }
0x13b3   :  { %v5879_v23 = vadd.f32 %v2533_v17, %v2531_v18  ;;  %v5881_v19 = vadd.f32 %v2533_v17, %v2532_v46  ;;  %v2939_v17 = vld [vmem:[#allocation19 + $0xf8] sm:$0xff] }
0x13b4   :  { %3141 = vmatprep.subr.mxu0 %v2939_v17 }
0x13b5   :  { %3379 = vtanh.f32 %v5879_v23 }
0x13b6   :  { %3381 = vtanh.f32 %v5881_v19 }
0x13c2   :  { %v3380_v31 = vpop.eup %3379 }
0x13c3   :  { %v3382_v15 = vpop.eup %3381  ;;  %v2538_v16 = vmul.f32 %v3380_v31, %v2530_v9 }
0x13c4   :  { %v2539_v50 = vmul.f32 %v3382_v15, %v2529_v8 }
0x13c6   :  { %2610 = vmatprep.mubr.f32.mxu1 %v2539_v50 }
0x13c7   :  { %2611 = vmatmul.mubr.f32.vlgmr.msra.gmra.mxu1 %v2538_v16 }
0x13c8   :  { %2771 = vmatpush1.msra.mxu1 %v5588_v47  ;;  %v6641_v47 = vld [vmem:[#allocation79_spill] sm:$0xff] }
0x13c9   :  { %2772 = vmatprep.subr.mxu1 %v5591_v34  ;;  %v6642_v34 = vld [vmem:[#allocation80_spill] sm:$0xff] }
0x13ca   :  { %2773 = vmatpush1.msra.mxu1 %v5594_v11  ;;  %v6643_v11 = vld [vmem:[#allocation54_spill] sm:$0xff] }
0x13cb   :  { %2774 = vmatprep.subr.mxu1 %v5597_v0  ;;  %v6644_v0 = vld [vmem:[#allocation58_spill] sm:$0xff] }
0x13cc   :  { %2775 = vmatpush1.msra.mxu1 %v5600_v12  ;;  %v6645_v12 = vld [vmem:[#allocation75_spill] sm:$0xff] }
0x13cd   :  { %2776 = vmatprep.subr.mxu1 %v5603_v58  ;;  %v6646_v58 = vld [vmem:[#allocation73_spill] sm:$0xff] }
0x13ce   :  { %2777 = vmatpush1.msra.mxu1 %v5606_v55  ;;  %v6647_v55 = vld [vmem:[#allocation62_spill] sm:$0xff] }
0x13cf   :  { %2778 = vmatprep.subr.mxu1 %v5609_v51  ;;  %v6648_v51 = vld [vmem:[#allocation68_spill] sm:$0xff] }
0x13d0   :  { %2779 = vmatpush1.msra.mxu1 %v5612_v54  ;;  %v6649_v54 = vld [vmem:[#allocation70_spill] sm:$0xff] }
0x13d1   :  { %2780 = vmatprep.subr.mxu1 %v5615_v49  ;;  %v6650_v49 = vld [vmem:[#allocation65_spill] sm:$0xff] }
0x13d2   :  { %2781 = vmatpush1.msra.mxu1 %v5618_v28  ;;  %v6651_v28 = vld [vmem:[#allocation66_spill] sm:$0xff] }
0x13d3   :  { %2782 = vmatprep.subr.mxu1 %v5621_v29  ;;  %v6652_v29 = vld [vmem:[#allocation67_spill] sm:$0xff] }
0x13d4   :  { %2783 = vmatpush1.msra.mxu1 %v5624_v21  ;;  %v6653_v21 = vld [vmem:[#allocation69_spill] sm:$0xff] }
0x13d5   :  { %2784 = vmatprep.subr.mxu1 %v5627_v35  ;;  %v6654_v35 = vld [vmem:[#allocation32_spill] sm:$0xff] }
0x13d6   :  { %2785 = vmatpush1.msra.mxu1 %v5630_v2  ;;  %v6655_v2 = vld [vmem:[#allocation33_spill] sm:$0xff] }
0x13d7   :  { %2786 = vmatprep.subr.mxu1 %v5633_v20  ;;  %v6656_v20 = vld [vmem:[#allocation34_spill] sm:$0xff] }
0x13d8   :  { %2787 = vmatpush1.msra.mxu1 %v5636_v61  ;;  %v6657_v61 = vld [vmem:[#allocation35_spill] sm:$0xff] }
0x13d9   :  { %2788 = vmatprep.subr.mxu1 %v5639_v14  ;;  %v6658_v14 = vld [vmem:[#allocation36_spill] sm:$0xff] }
0x13da   :  { %2789 = vmatpush1.msra.mxu1 %v5642_v48  ;;  %v6659_v48 = vld [vmem:[#allocation37_spill] sm:$0xff] }
0x13db   :  { %2790 = vmatprep.subr.mxu1 %v5645_v59  ;;  %v6660_v59 = vld [vmem:[#allocation38_spill] sm:$0xff] }
0x13dc   :  { %2791 = vmatpush1.msra.mxu1 %v5648_v39  ;;  %v6661_v39 = vld [vmem:[#allocation39_spill] sm:$0xff] }
0x13dd   :  { %2792 = vmatprep.subr.mxu1 %v5651_v45  ;;  %v6662_v45 = vld [vmem:[#allocation81_spill] sm:$0xff] }
0x13de   :  { %2793 = vmatpush1.msra.mxu1 %v5654_v37  ;;  %v6663_v37 = vld [vmem:[#allocation49_spill] sm:$0xff] }
0x13df   :  { %2794 = vmatprep.subr.mxu1 %v5657_v3  ;;  %v1693_v3 = vadd.f32 %v6663_v37, %v6662_v45  ;;  %v2913_v37 = vld [vmem:[#allocation19 + $0x28] sm:$0xff] }
0x13e0   :  { %2795 = vmatpush1.msra.mxu1 %v5660_v62 }
0x13e1   :  { %2796 = vmatprep.subr.mxu1 %v5663_v10  ;;  %v6664_v10 = vld [vmem:[#allocation82_spill] sm:$0xff] }
0x13e2   :  { %2797 = vmatpush1.msra.mxu1 %v5666_v26  ;;  %v2545_v26 = vadd.f32 %v6664_v10, %v1693_v3  ;;  %v2928_v3 = vld [vmem:[#allocation19 + $0xa0] sm:$0xff]  ;;  %v2927_v10 = vld [vmem:[#allocation19 + $0x98] sm:$0xff] }
0x13e3   :  { %2798 = vmatprep.subr.mxu1 %v6611_v13 }
0x13e4   :  { %2799 = vmatpush1.msra.mxu1 %v6612_v53 }
0x13e5   :  { %2800 = vmatprep.subr.mxu1 %v6613_v33 }
0x13e6   :  { %2801 = vmatpush1.msra.mxu1 %v6614_v56 }
0x13e7   :  { %2802 = vmatprep.subr.mxu1 %v6615_v43 }
0x13e8   :  { %2803 = vmatpush2.msra.mxu1 %v6616_v22 }
0x13e9   :  { %2804 = vmatprep.subr.mxu1 %v6617_v4 }
0x13ea   :  { %2805 = vmatpush2.msra.mxu1 %v5690_v7 }
0x13eb   :  { %2806 = vmatprep.subr.mxu1 %v5693_v44 }
0x13ec   :  { %2807 = vmatpush2.msra.mxu1 %v5696_v63 }
0x13ed   :  { %2808 = vmatprep.subr.mxu1 %v5699_v38 }
0x13ee   :  { %2809 = vmatpush2.msra.mxu1 %v5702_v42 }
0x13ef   :  { %2810 = vmatprep.subr.mxu1 %v5705_v52  ;;  %v6665_v52 = vld [vmem:[#allocation72_spill] sm:$0xff] }
0x13f0   :  { %2811 = vmatpush2.msra.mxu1 %v5794_v5 }
0x13f1   :  { %2812 = vmatprep.subr.mxu1 %v5797_v6 }
0x13f2   :  { %2813 = vmatpush2.msra.mxu1 %v6641_v47 }
0x13f3   :  { %2814 = vmatprep.subr.mxu1 %v6642_v34 }
0x13f4   :  { %2815 = vmatpush2.msra.mxu1 %v6643_v11  ;;  %v2923_v11 = vld [vmem:[#allocation19 + $0x78] sm:$0xff] }
0x13f5   :  { %2816 = vmatprep.subr.mxu1 %v6644_v0  ;;  %v2938_v0 = vld [vmem:[#allocation19 + $0xf0] sm:$0xff] }
0x13f6   :  { %2817 = vmatpush2.msra.mxu1 %v6645_v12  ;;  %v2922_v12 = vld [vmem:[#allocation19 + $0x70] sm:$0xff] }
0x13f7   :  { %2818 = vmatprep.subr.mxu1 %v6646_v58  ;;  %v2921_v58 = vld [vmem:[#allocation19 + $0x68] sm:$0xff] }
0x13f8   :  { %2819 = vmatpush2.msra.mxu1 %v6647_v55  ;;  %v2936_v55 = vld [vmem:[#allocation19 + $0xe0] sm:$0xff] }
0x13f9   :  { %2820 = vmatprep.subr.mxu1 %v6648_v51  ;;  %v2920_v51 = vld [vmem:[#allocation19 + $0x60] sm:$0xff] }
0x13fa   :  { %2821 = vmatpush2.msra.mxu1 %v6649_v54  ;;  %v2935_v54 = vld [vmem:[#allocation19 + $0xd8] sm:$0xff] }
0x13fb   :  { %2822 = vmatprep.subr.mxu1 %v6650_v49  ;;  %v2919_v49 = vld [vmem:[#allocation19 + $0x58] sm:$0xff] }
0x13fc   :  { %2823 = vmatpush2.msra.mxu1 %v6651_v28  ;;  %v2934_v28 = vld [vmem:[#allocation19 + $0xd0] sm:$0xff] }
0x13fd   :  { %2824 = vmatprep.subr.mxu1 %v6652_v29  ;;  %v2918_v29 = vld [vmem:[#allocation19 + $0x50] sm:$0xff] }
0x13fe   :  { %2825 = vmatpush2.msra.mxu1 %v6653_v21  ;;  %v2933_v21 = vld [vmem:[#allocation19 + $0xc8] sm:$0xff] }
0x13ff   :  { %2826 = vmatprep.subr.mxu1 %v6654_v35  ;;  %v2917_v35 = vld [vmem:[#allocation19 + $0x48] sm:$0xff] }
0x1400   :  { %2827 = vmatpush2.msra.mxu1 %v6655_v2  ;;  %v2932_v2 = vld [vmem:[#allocation19 + $0xc0] sm:$0xff] }
0x1401   :  { %2828 = vmatprep.subr.mxu1 %v6656_v20  ;;  %v2916_v20 = vld [vmem:[#allocation19 + $0x40] sm:$0xff] }
0x1402   :  { %2829 = vmatpush2.msra.mxu1 %v6657_v61  ;;  %v2931_v61 = vld [vmem:[#allocation19 + $0xb8] sm:$0xff] }
0x1403   :  { %2830 = vmatprep.subr.mxu1 %v6658_v14  ;;  %v2915_v14 = vld [vmem:[#allocation19 + $0x38] sm:$0xff] }
0x1404   :  { %2831 = vmatpush2.msra.mxu1 %v6659_v48  ;;  %v2930_v48 = vld [vmem:[#allocation19 + $0xb0] sm:$0xff] }
0x1405   :  { %2832 = vmatprep.subr.mxu1 %v6660_v59  ;;  %v2914_v59 = vld [vmem:[#allocation19 + $0x30] sm:$0xff] }
0x1406   :  { %2833 = vmatpush2.msra.mxu1 %v6661_v39  ;;  %v2929_v39 = vld [vmem:[#allocation19 + $0xa8] sm:$0xff] }
0x1487   :  { %v2612_v62 = vpop.f32.mrf.mxu1 }
0x1488   :  { %v2617_v7 = vadd.f32 %v2612_v62, %v6665_v52  ;;  %v2912_v62 = vld [vmem:[#allocation19 + $0x20] sm:$0xff]  ;;  %v2926_v52 = vld [vmem:[#allocation19 + $0x90] sm:$0xff] }
0x1489   :  { %v2614_v44 = vpop.f32.mrf.mxu1 }
0x148a   :  { %v2619_v63 = vmul.f32 %v2617_v7, %v6545_v1  ;;  %v2618_v38 = vadd.f32 %v2614_v44, %v2545_v26  ;;  %v2911_v26 = vld [vmem:[#allocation19 + $0x18] sm:$0xff]  ;;  %v2910_v7 = vld [vmem:[#allocation19 + $0x10] sm:$0xff]  ;;  %v2925_v44 = vld [vmem:[#allocation19 + $0x88] sm:$0xff] }
0x148c   :  { %v3134_v42 = vmul.f32 -1.442695, %v2619_v63  ;;  %v2620_v30 = vmul.f32 %v2618_v38, %v6546_v36  ;;  %v2909_v63 = vld [vmem:[#allocation19 + $0x8] sm:$0xff]  ;;  %v2924_v38 = vld [vmem:[#allocation19 + $0x80] sm:$0xff] }
0x148e   :  { %3383 = vpow2.f32 %v3134_v42  ;;  %v3135_v25 = vmul.f32 -1.442695, %v2620_v30  ;;  %v2908_v42 = vld [vmem:[#allocation19] sm:$0xff]  ;;  %v6667_v30 = vld [vmem:[#allocation64_spill] sm:$0xff] }
0x1490   :  { %3385 = vpow2.f32 %v3135_v25  ;;  %v6668_v25 = vld [vmem:[#allocation74_spill] sm:$0xff] }
0x149b   :  { %v3384_v13 = vpop.eup %3383 }
0x149c   :  { %v2627_v53 = vadd.f32 1.0, %v3384_v13  ;;  %v1699_v13 = vadd.f32 %v6668_v25, %v6662_v45 }
0x149d   :  { %v3386_v33 = vpop.eup %3385 }
0x149e   :  { %3387 = vrcp.f32 %v2627_v53  ;;  %v2628_v56 = vadd.f32 1.0, %v3386_v33  ;;  %v6669_v33 = vld [vmem:[#allocation71_spill] sm:$0xff] }
0x14a0   :  { %3389 = vrcp.f32 %v2628_v56  ;;  %v2657_v56 = vadd.f32 %v6669_v33, %v1699_v13 }
0x14ab   :  { %v3388_v43 = vpop.eup %3387 }
0x14ac   :  { %v2633_v22 = vmul.f32 %v3388_v43, %v6545_v1  ;;  %v6670_v43 = vld [vmem:[#allocation53_spill] sm:$0xff] }
0x14ad   :  { %v3390_v4 = vpop.eup %3389 }
0x14ae   :  { %v2635_v5 = vadd.f32 %v2633_v22, %v6547_v24  ;;  %v2634_v6 = vmul.f32 %v3390_v4, %v6546_v36 }
0x14b0   :  { %2637 = vrot.lane.b32.xlu0 %v2635_v5, %s3773_s9  ;;  %v2636_v41 = vadd.f32 %v2634_v6, %v6548_v27 }
0x14b2   :  { %2639 = vrot.lane.b32.xlu1 %v2636_v41, %s3773_s9  ;;  %v2645_v32 = vmul.f32 %v2636_v41, %v2635_v5 }
0x1522   :  { %v2638_v60 = vpop.permute.xlu0 %2637 }
0x1524   :  { %v2640_v40 = vpop.permute.xlu1 %2639 }
0x1525   :  { %v2641_v8 = vsel %vm690_vm0, %v2638_v60, %v2640_v40  ;;  %v2642_v9 = vsel %vm690_vm0, %v2640_v40, %v2638_v60 }
0x1526   :  { %v2643_v18 = vmul.f32 %v2641_v8, %v5879_v23  ;;  %v2644_v46 = vmul.f32 %v2642_v9, %v5881_v19  ;;  %v6666_v23 = vld [vmem:[#allocation57_spill] sm:$0xff]  ;;  %v2937_v19 = vld [vmem:[#allocation19 + $0xe8] sm:$0xff] }
0x1528   :  { %v5966_v31 = vadd.f32 %v2645_v32, %v2643_v18  ;;  %v5968_v15 = vadd.f32 %v2645_v32, %v2644_v46 }
0x152a   :  { %3391 = vtanh.f32 %v5966_v31 }
0x152b   :  { %3393 = vtanh.f32 %v5968_v15 }
0x1537   :  { %v3392_v16 = vpop.eup %3391 }
0x1538   :  { %v3394_v50 = vpop.eup %3393  ;;  %v2650_v47 = vmul.f32 %v3392_v16, %v2642_v9 }
0x1539   :  { %v2651_v34 = vmul.f32 %v3394_v50, %v2641_v8 }
0x153b   :  { %2722 = vmatprep.mubr.f32.mxu0 %v2651_v34 }
0x153c   :  { %2723 = vmatmul.mubr.f32.vlgmr.msra.gmra.mxu0 %v2650_v47 }
0x153d   :  { %3142 = vmatpush3.msra.mxu0 %v2923_v11  ;;  %3004 = vmatprep.mubr.f32.mxu0 %v6666_v23 }
0x153e   :  { %3143 = vmatprep.subr.mxu0 %v2938_v0 }
0x153f   :  { %3144 = vmatpush3.msra.mxu0 %v2922_v12 }
0x1540   :  { %3145 = vmatprep.subr.mxu0 %v2937_v19 }
0x1541   :  { %3146 = vmatpush3.msra.mxu0 %v2921_v58 }
0x1542   :  { %3147 = vmatprep.subr.mxu0 %v2936_v55 }
0x1543   :  { %3148 = vmatpush3.msra.mxu0 %v2920_v51 }
0x1544   :  { %3149 = vmatprep.subr.mxu0 %v2935_v54 }
0x1545   :  { %3150 = vmatpush3.msra.mxu0 %v2919_v49 }
0x1546   :  { %3151 = vmatprep.subr.mxu0 %v2934_v28 }
0x1547   :  { %3152 = vmatpush3.msra.mxu0 %v2918_v29 }
0x1548   :  { %3153 = vmatprep.subr.mxu0 %v2933_v21 }
0x1549   :  { %3154 = vmatpush3.msra.mxu0 %v2917_v35  ;;  %v2907_v35 = vld [vmem:[#allocation17 + $0xf8] sm:$0xff] }
0x154a   :  { %3155 = vmatprep.subr.mxu0 %v2932_v2  ;;  %v2891_v2 = vld [vmem:[#allocation17 + $0x78] sm:$0xff]  ;;  %3176 = vmatprep.subr.mxu1 %v2907_v35 }
0x154b   :  { %3156 = vmatpush3.msra.mxu0 %v2916_v20  ;;  %v2906_v20 = vld [vmem:[#allocation17 + $0xf0] sm:$0xff] }
0x154c   :  { %3157 = vmatprep.subr.mxu0 %v2931_v61  ;;  %v2889_v61 = vld [vmem:[#allocation17 + $0x68] sm:$0xff] }
0x154d   :  { %3158 = vmatpush3.msra.mxu0 %v2915_v14  ;;  %v2904_v14 = vld [vmem:[#allocation17 + $0xe0] sm:$0xff] }
0x154e   :  { %3159 = vmatprep.subr.mxu0 %v2930_v48  ;;  %v2888_v48 = vld [vmem:[#allocation17 + $0x60] sm:$0xff] }
0x154f   :  { %3160 = vmatpush3.msra.mxu0 %v2914_v59  ;;  %v6671_v59 = vld [vmem:[#allocation51_spill] sm:$0xff] }
0x1550   :  { %3161 = vmatprep.subr.mxu0 %v2929_v39  ;;  %v6672_v39 = vld [vmem:[#allocation76_spill] sm:$0xff] }
0x1551   :  { %3162 = vmatpush3.msra.mxu0 %v2913_v37  ;;  %v1703_v37 = vadd.f32 %v6672_v39, %v6671_v59 }
0x1552   :  { %3163 = vmatprep.subr.mxu0 %v2928_v3  ;;  %v6673_v3 = vld [vmem:[#allocation63_spill] sm:$0xff] }
0x1553   :  { %3164 = vmatpush3.msra.mxu0 %v2912_v62  ;;  %v1705_v62 = vadd.f32 %v6673_v3, %v6662_v45 }
0x1554   :  { %3165 = vmatprep.subr.mxu0 %v2927_v10  ;;  %v6674_v10 = vld [vmem:[#allocation50_spill] sm:$0xff] }
0x1555   :  { %3166 = vmatpush3.msra.mxu0 %v2911_v26  ;;  %v2768_v26 = vadd.f32 %v6674_v10, %v1703_v37 }
0x1556   :  { %3167 = vmatprep.subr.mxu0 %v2926_v52 }
0x1557   :  { %3168 = vmatpush3.msra.mxu0 %v2910_v7 }
0x1558   :  { %3169 = vmatprep.subr.mxu0 %v2925_v44  ;;  %v6675_v44 = vld [vmem:[#allocation52_spill] sm:$0xff] }
0x1559   :  { %3170 = vmatpush3.msra.mxu0 %v2909_v63  ;;  %v2769_v63 = vadd.f32 %v6675_v44, %v1705_v62 }
0x155a   :  { %3171 = vmatprep.subr.mxu0 %v2924_v38 }
0x155b   :  { %3172 = vmatpush3.msra.mxu0 %v2908_v42 }
0x155c   :  { %3005 = vmatmul.mubr.f32.vlgmr.msra.gmra.mxu0 %v6667_v30 }
0x15fc   :  { %v2724_v53 = vpop.f32.mrf.mxu0 }
0x15fd   :  { %v2729_v22 = vadd.f32 %v2724_v53, %v6670_v43 }
0x15fe   :  { %v2726_v4 = vpop.f32.mrf.mxu0 }
0x15ff   :  { %v2731_v5 = vmul.f32 %v2729_v22, %v6545_v1  ;;  %v2730_v6 = vadd.f32 %v2726_v4, %v2657_v56  ;;  %v2903_v22 = vld [vmem:[#allocation17 + $0xd8] sm:$0xff] }
0x1600   :  { %v2887_v4 = vld [vmem:[#allocation17 + $0x58] sm:$0xff] }
0x1601   :  { %v3136_v41 = vmul.f32 -1.442695, %v2731_v5  ;;  %v2732_v32 = vmul.f32 %v2730_v6, %v6546_v36  ;;  %v2902_v5 = vld [vmem:[#allocation17 + $0xd0] sm:$0xff] }
0x1602   :  { %v2886_v6 = vld [vmem:[#allocation17 + $0x50] sm:$0xff] }
0x1603   :  { %3395 = vpow2.f32 %v3136_v41  ;;  %v3137_v17 = vmul.f32 -1.442695, %v2732_v32  ;;  %v2901_v41 = vld [vmem:[#allocation17 + $0xc8] sm:$0xff] }
0x1604   :  { %v2885_v32 = vld [vmem:[#allocation17 + $0x48] sm:$0xff] }
0x1605   :  { %3397 = vpow2.f32 %v3137_v17  ;;  %v2900_v17 = vld [vmem:[#allocation17 + $0xc0] sm:$0xff] }
0x1610   :  { %v3396_v60 = vpop.eup %3395 }
0x1611   :  { %v2739_v40 = vadd.f32 1.0, %v3396_v60  ;;  %v2884_v60 = vld [vmem:[#allocation17 + $0x40] sm:$0xff] }
0x1612   :  { %v3398_v8 = vpop.eup %3397 }
0x1613   :  { %3399 = vrcp.f32 %v2739_v40  ;;  %v2740_v9 = vadd.f32 1.0, %v3398_v8  ;;  %v2899_v8 = vld [vmem:[#allocation17 + $0xb8] sm:$0xff] }
0x1615   :  { %3401 = vrcp.f32 %v2740_v9 }
0x161c   :  { %v3173_v3 = vpop.f32.mrf.mxu0 }
0x161e   :  { %v3174_v62 = vpop.f32.mrf.mxu0 }
0x161f   :  { %v3175_v57 = vadd.f32 %v3174_v62, %v3173_v3 }
0x1620   :  { %v3400_v18 = vpop.eup %3399 }
0x1621   :  { %v2745_v46 = vmul.f32 %v3400_v18, %v6545_v1  ;;  %v2883_v18 = vld [vmem:[#allocation17 + $0x38] sm:$0xff] }
0x1622   :  { %v3402_v16 = vpop.eup %3401 }
0x1623   :  { %v2747_v50 = vadd.f32 %v2745_v46, %v6547_v24  ;;  %v2746_v47 = vmul.f32 %v3402_v16, %v6546_v36  ;;  %v2898_v16 = vld [vmem:[#allocation17 + $0xb0] sm:$0xff] }
0x1625   :  { %2749 = vrot.lane.b32.xlu0 %v2747_v50, %s3773_s9  ;;  %v2748_v34 = vadd.f32 %v2746_v47, %v6548_v27 }
0x1627   :  { %2751 = vrot.lane.b32.xlu1 %v2748_v34, %s3773_s9  ;;  %v2757_v11 = vmul.f32 %v2748_v34, %v2747_v50  ;;  %v2882_v34 = vld [vmem:[#allocation17 + $0x30] sm:$0xff] }
0x1697   :  { %v2750_v0 = vpop.permute.xlu0 %2749 }
0x1699   :  { %v2752_v12 = vpop.permute.xlu1 %2751 }
0x169a   :  { %v2753_v23 = vsel %vm690_vm0, %v2750_v0, %v2752_v12  ;;  %v2754_v19 = vsel %vm690_vm0, %v2752_v12, %v2750_v0  ;;  %v2881_v12 = vld [vmem:[#allocation17 + $0x28] sm:$0xff] }
0x169b   :  { %v2755_v58 = vmul.f32 %v2753_v23, %v5966_v31  ;;  %v2756_v55 = vmul.f32 %v2754_v19, %v5968_v15  ;;  %v2890_v31 = vld [vmem:[#allocation17 + $0x70] sm:$0xff]  ;;  %v2905_v15 = vld [vmem:[#allocation17 + $0xe8] sm:$0xff] }
0x169d   :  { %v5992_v51 = vadd.f32 %v2757_v11, %v2755_v58  ;;  %v5994_v54 = vadd.f32 %v2757_v11, %v2756_v55  ;;  %v2897_v11 = vld [vmem:[#allocation17 + $0xa8] sm:$0xff]  ;;  %v2894_v58 = vld [vmem:[#allocation17 + $0x90] sm:$0xff] }
0x169e   :  { %v2878_v55 = vld [vmem:[#allocation17 + $0x10] sm:$0xff] }
0x169f   :  { %3403 = vtanh.f32 %v5992_v51 }
0x16a0   :  { %3405 = vtanh.f32 %v5994_v54 }
0x16ac   :  { %v3404_v49 = vpop.eup %3403 }
0x16ad   :  { %v3406_v28 = vpop.eup %3405  ;;  %v2762_v29 = vmul.f32 %v3404_v49, %v2754_v19  ;;  %v2880_v19 = vld [vmem:[#allocation17 + $0x20] sm:$0xff]  ;;  %v2893_v49 = vld [vmem:[#allocation17 + $0x88] sm:$0xff] }
0x16ae   :  { %v2763_v21 = vmul.f32 %v3406_v28, %v2753_v23  ;;  %v2892_v28 = vld [vmem:[#allocation17 + $0x80] sm:$0xff] }
0x16b0   :  { %2834 = vmatprep.mubr.f32.mxu1 %v2763_v21 }
0x16b1   :  { %2835 = vmatmul.mubr.f32.vlgmr.msra.gmra.mxu1 %v2762_v29  ;;  %v2876_v29 = vld [vmem:[#allocation17] sm:$0xff] }
0x16b2   :  { %3177 = vmatpush3.msra.mxu1 %v2891_v2 }
0x16b3   :  { %3178 = vmatprep.subr.mxu1 %v2906_v20 }
0x16b4   :  { %3179 = vmatpush3.msra.mxu1 %v2890_v31 }
0x16b5   :  { %3180 = vmatprep.subr.mxu1 %v2905_v15 }
0x16b6   :  { %3181 = vmatpush3.msra.mxu1 %v2889_v61 }
0x16b7   :  { %3182 = vmatprep.subr.mxu1 %v2904_v14 }
0x16b8   :  { %3183 = vmatpush3.msra.mxu1 %v2888_v48 }
0x16b9   :  { %3184 = vmatprep.subr.mxu1 %v2903_v22 }
0x16ba   :  { %3185 = vmatpush3.msra.mxu1 %v2887_v4 }
0x16bb   :  { %3186 = vmatprep.subr.mxu1 %v2902_v5 }
0x16bc   :  { %3187 = vmatpush3.msra.mxu1 %v2886_v6 }
0x16bd   :  { %3188 = vmatprep.subr.mxu1 %v2901_v41 }
0x16be   :  { %3189 = vmatpush3.msra.mxu1 %v2885_v32 }
0x16bf   :  { %3190 = vmatprep.subr.mxu1 %v2900_v17 }
0x16c0   :  { %3191 = vmatpush3.msra.mxu1 %v2884_v60 }
0x16c1   :  { %3192 = vmatprep.subr.mxu1 %v2899_v8 }
0x16c2   :  { %3193 = vmatpush3.msra.mxu1 %v2883_v18 }
0x16c3   :  { %3194 = vmatprep.subr.mxu1 %v2898_v16 }
0x16c4   :  { %3195 = vmatpush3.msra.mxu1 %v2882_v34 }
0x16c5   :  { %3196 = vmatprep.subr.mxu1 %v2897_v11 }
0x16c6   :  { %3197 = vmatpush3.msra.mxu1 %v2881_v12 }
0x1771   :  { %v2836_v52 = vpop.f32.mrf.mxu1 }
0x1772   :  { %v2841_v7 = vadd.f32 %v2836_v52, %v2768_v26 }
0x1773   :  { %v2838_v38 = vpop.f32.mrf.mxu1 }
0x1774   :  { %v2843_v42 = vmul.f32 %v2841_v7, %v6545_v1  ;;  %v2842_v30 = vadd.f32 %v2838_v38, %v2769_v63 }
0x1776   :  { %v3138_v25 = vmul.f32 -1.442695, %v2843_v42  ;;  %v2844_v13 = vmul.f32 %v2842_v30, %v6546_v36 }
0x1778   :  { %3407 = vpow2.f32 %v3138_v25  ;;  %v3139_v53 = vmul.f32 -1.442695, %v2844_v13 }
0x177a   :  { %3409 = vpow2.f32 %v3139_v53 }
0x1785   :  { %v3408_v33 = vpop.eup %3407 }
0x1786   :  { %v2851_v56 = vadd.f32 1.0, %v3408_v33 }
0x1787   :  { %v3410_v43 = vpop.eup %3409 }
0x1788   :  { %3411 = vrcp.f32 %v2851_v56  ;;  %v2852_v45 = vadd.f32 1.0, %v3410_v43 }
0x178a   :  { %3413 = vrcp.f32 %v2852_v45 }
0x1795   :  { %v3412_v40 = vpop.eup %3411 }
0x1796   :  { %v2857_v9 = vmul.f32 %v3412_v40, %v6545_v1  ;;  %v2896_v1 = vld [vmem:[#allocation17 + $0xa0] sm:$0xff] }
0x1797   :  { %v3414_v46 = vpop.eup %3413  ;;  %3198 = vmatprep.subr.mxu1 %v2896_v1 }
0x1798   :  { %v2859_v50 = vadd.f32 %v2857_v9, %v6547_v24  ;;  %v2858_v47 = vmul.f32 %v3414_v46, %v6546_v36  ;;  %3199 = vmatpush3.msra.mxu1 %v2880_v19  ;;  %v2895_v24 = vld [vmem:[#allocation17 + $0x98] sm:$0xff] }
0x1799   :  { %3200 = vmatprep.subr.mxu1 %v2895_v24  ;;  %v2879_v36 = vld [vmem:[#allocation17 + $0x18] sm:$0xff] }
0x179a   :  { %2861 = vrot.lane.b32.xlu0 %v2859_v50, %s3773_s9  ;;  %v2860_v0 = vadd.f32 %v2858_v47, %v6548_v27  ;;  %3201 = vmatpush3.msra.mxu1 %v2879_v36  ;;  %v2877_v27 = vld [vmem:[#allocation17 + $0x8] sm:$0xff] }
0x179b   :  { %3202 = vmatprep.subr.mxu1 %v2894_v58 }
0x179c   :  { %2863 = vrot.lane.b32.xlu1 %v2860_v0, %s3773_s9  ;;  %v2869_v23 = vmul.f32 %v2860_v0, %v2859_v50  ;;  %3203 = vmatpush3.msra.mxu1 %v2878_v55 }
0x179d   :  { %3204 = vmatprep.subr.mxu1 %v2893_v49 }
0x179e   :  { %3205 = vmatpush3.msra.mxu1 %v2877_v27 }
0x179f   :  { %3206 = vmatprep.subr.mxu1 %v2892_v28 }
0x17a0   :  { %3207 = vmatpush3.msra.mxu1 %v2876_v29 }
0x180c   :  { %v2862_v21 = vpop.permute.xlu0 %2861 }
0x180e   :  { %v2864_v35 = vpop.permute.xlu1 %2863 }
0x180f   :  { %v2865_v2 = vsel %vm690_vm0, %v2862_v21, %v2864_v35  ;;  %v2866_v20 = vsel %vm690_vm0, %v2864_v35, %v2862_v21 }
0x1810   :  { %v2867_v31 = vmul.f32 %v2865_v2, %v5992_v51  ;;  %v2868_v15 = vmul.f32 %v2866_v20, %v5994_v54  ;;  %v3140_v51 = vld [vmem:[%s6036_s12] ss:$0 sm:$0xff] }
0x1812   :  { %v2870_v61 = vadd.f32 %v2869_v23, %v2867_v31  ;;  %v2871_v14 = vadd.f32 %v2869_v23, %v2868_v15 }
0x1814   :  { %3415 = vtanh.f32 %v2870_v61 }
0x1815   :  { %3417 = vtanh.f32 %v2871_v14 }
0x1821   :  { %v3416_v48 = vpop.eup %3415 }
0x1822   :  { %v3418_v59 = vpop.eup %3417  ;;  %v2874_v39 = vmul.f32 %v3416_v48, %v2866_v20 }
0x1823   :  { %v2875_v37 = vmul.f32 %v3418_v59, %v2865_v2 }
0x1825   :  { %3074 = vmatprep.mubr.f32.mxu1 %v2875_v37 }
0x1826   :  { %3075 = vmatmul.mubr.f32.vlgmr.msra.gmra.mxu1 %v2874_v39 }
0x18e6   :  { %v3208_v10 = vpop.f32.mrf.mxu1 }
0x18e8   :  { %v3209_v26 = vpop.f32.mrf.mxu1 }
0x18e9   :  { %v3210_v52 = vadd.f32 %v3209_v26, %v3208_v10 }
0x18eb   :  { %v3077_v54 = vadd.f32 %v3210_v52, %v3175_v57 }
0x18ed   :  { %v3087_v7 = vadd.f32 %v3140_v51, %v3077_v54 }
0x18ef   :  { %3088 = vst [vmem:[#allocation20] sm:$0xff] %v3087_v7 }
0x18f0   :  { %3738 = shalt.err (!%p3735_p7)
}
0x18f1   :  { %3098 = dma.vmem_to_hbm [thread:$0]  %s3096_s20, 128, %s6037_s13, [#allocation7]  }
0x18f2   :  { %3757 = dma.done.wait [#allocation7], 128  }
0x18f3   :  { %3758 = vsyncadd [#allocation7], 4294967168 }
0x18f4   :  { %3102 = vsyncpa [#allocation6], 1 }
0x18f5   :  { %3103 = vsyncpa [#allocation9], 1 }
0x18f6   :  { %3104 = vsyncpa [#allocation12], 1 }
0x18f7   :  { %3105 = vsyncpa [#allocation15], 1 }
0x18f8   :  { %3106 = vsyncpa [#allocation18], 1 }
0x18f9   :  { %3107 = vsyncpa [#allocation7], 1 }

</bundles_post_ra>
